<compile_context>
chip_gen: v7x
topology: tpu7x:2x2x1
jax: 0.10.0
libtpu: 0.0.40
codegen_flags: <defaults>
</compile_context>

<pallas_src>
import functools
import math

import jax
import jax.numpy as jnp
from jax.experimental import pallas as pl
from jax.experimental.pallas import tpu as pltpu


_HALO = 8  # left-halo width (sublanes); the conv's real left-pad column is index 7


def _conv3x3_from_padded(pad_ref, w_ref, H, W, per_tap):
    """3x3 'SAME' conv of a padded scratch against im2col-layout weights.

    pad_ref : VMEM (H+2, W+2*_HALO, C); interior at [1:H+1, 8:W+8, :], 1-px zero
              halo at row 0 / row H+1 / col 7 / col W+8 (zeroed once at step 0).
    w_ref   : VMEM (9*C, Cout), row order (ky, kx, c).
    Returns (H*W, Cout) float32.
    """
    C = pad_ref.shape[-1]
    taps = [(ky, kx) for ky in range(3) for kx in range(3)]
    if per_tap:
        # v7x path: the MRB accumulates in place, so 9 thin K=C matmuls beat
        # materializing the 9x im2col patch copy.
        acc = jnp.zeros((H * W, w_ref.shape[-1]), jnp.float32)
        for t, (ky, kx) in enumerate(taps):
            tap = pad_ref[ky:ky + H, _HALO - 1 + kx:_HALO - 1 + kx + W, :]
            acc = acc + jnp.dot(tap.reshape(H * W, C),
                                w_ref[t * C:(t + 1) * C, :],
                                preferred_element_type=jnp.float32)
        return acc
    # v5e/v6e path: a single K=9*C MXU matmul (accumulation stays in the MXU).
    cols = [pad_ref[ky:ky + H, _HALO - 1 + kx:_HALO - 1 + kx + W, :]
            for ky, kx in taps]
    patches = jnp.concatenate(cols, axis=-1).reshape(H * W, 9 * C)
    return jnp.dot(patches, w_ref[...], preferred_element_type=jnp.float32)


def _basic_block_kernel(x_ref, w1_hbm, w2_hbm, scal_ref, o_ref,
                        xp_s, yp_s, w1_v, w2_v, wsem, *, per_tap):
    """Fused BasicBlock forward for one image (NHWC, channels on lanes).

    x_ref    : (1, H, W, C)   input block (= residual), compute dtype
    w1_hbm   : (9*C, P) HBM   conv1 weight, im2col layout, compute dtype
    w2_hbm   : (9*P, C) HBM   conv2 weight, im2col layout, compute dtype
    scal_ref : SMEM (5,) f32  [pre1, post1, pre2, mult2, post2]
    o_ref    : (1, H, W, C)   output block
    xp_s     : VMEM (H+2, W+16, C) padded conv1 input  (compute dtype)
    yp_s     : VMEM (H+2, W+16, P) padded conv1 output (compute dtype; the
                                   intermediate never leaves VMEM)
    w1_v/w2_v: VMEM weight copies -- single-buffered, persistent across steps
    wsem     : DMA semaphores (2,)
    """
    H, W = o_ref.shape[1], o_ref.shape[2]
    cdt = xp_s.dtype
    pre1, post1 = scal_ref[0], scal_ref[1]
    pre2, mult2, post2 = scal_ref[2], scal_ref[3], scal_ref[4]

    @pl.when(pl.program_id(0) == 0)
    def _init():
        # One-time setup (scratch persists across the sequential grid):
        #  * zero the padded scratches -- only the 1-px halo actually needs to
        #    stay zero; interiors are fully overwritten every step.
        #  * stage the conv weights into single-buffered VMEM (no BlockSpec
        #    double-buffering of the constant weight blocks).
        xp_s[...] = jnp.zeros_like(xp_s)
        yp_s[...] = jnp.zeros_like(yp_s)
        c1 = pltpu.make_async_copy(w1_hbm, w1_v, wsem.at[0])
        c2 = pltpu.make_async_copy(w2_hbm, w2_v, wsem.at[1])
        c1.start()
        c2.start()
        c1.wait()
        c2.wait()

    x = x_ref[0].astype(jnp.float32)                          # (H, W, C) f32

    # ---- conv1: aligned interior store (sublane offset 8), one MXU matmul ----
    xp_s[1:H + 1, _HALO:W + _HALO, :] = (x + pre1).astype(cdt)
    h1 = _conv3x3_from_padded(xp_s, w1_v, H, W, per_tap)      # (H*W, P) f32
    h1 = jnp.maximum(h1 + post1, 0.0)                         # post_bias + ReLU

    # ---- conv2 on the VMEM-resident intermediate ----
    yp_s[1:H + 1, _HALO:W + _HALO, :] = (h1 + pre2).astype(cdt).reshape(H, W, -1)
    h2 = _conv3x3_from_padded(yp_s, w2_v, H, W, per_tap)      # (H*W, C) f32
    h2 = h2 * mult2 + post2                                   # multiplier + post_bias

    # ---- residual add (identity path) + final ReLU ----
    # NOTE: on the bf16 path the residual is the bf16-cast input (the same data
    # the conv sees); keep x in f32 end-to-end if an exact-f32 skip is needed.
    out = h2.reshape(H, W, -1) + x
    o_ref[0] = jnp.maximum(out, 0.0).astype(o_ref.dtype)


def _round_up(n, m):
    return ((n + m - 1) // m) * m


def _vmem_limit_bytes():
    """Generation-aware scoped-VMEM budget (~70% of physical, capped)."""
    try:
        cap = int(pltpu.get_tpu_info().vmem_capacity_bytes)
        return max(16 << 20, min(int(cap * 0.7), 64 << 20))
    except Exception:  # interpret mode / older jax: conservative default
        return 32 << 20


def basic_block_forward_nhwc(x, params, *, compute_dtype=None, out_dtype=None,
                             lane_multiple=128, per_tap_matmul=False):
    """Fused BasicBlock forward.  x: (N, H, W, Cin).

    compute_dtype : matmul-operand / scratch / HBM-activation dtype (e.g.
                    jnp.bfloat16 on v6e/v7x).  Accumulation (preferred_element_type)
                    and all elementwise epilogue math stay f32.
    out_dtype     : output dtype (default x.dtype); use bf16 when the next block
                    also runs in bf16 to cut the write-back HBM stream.
    lane_multiple : channels are zero-padded up to a multiple of this so
                    activations/outputs are lane-dense (None/0 disables).  At
                    real ResNet widths (multiples of 128) this is a no-op.
    per_tap_matmul: v7x option -- 9 per-tap K=C matmuls accumulating in f32
                    instead of the single K=9*C im2col matmul.
    Only the default config (stride=1, groups=1, expansion=1, identity residual)
    is supported.
    """
    N, H, W, Cin = x.shape
    w1, w2 = params["w1"], params["w2"]
    P = w1.shape[-1]
    if w2.shape[-1] != Cin or w2.shape[2] != P:
        raise NotImplementedError(
            "only the identity-residual config (inplanes == expansion*planes)")

    cdt = jnp.dtype(compute_dtype) if compute_dtype is not None else jnp.dtype(x.dtype)
    odt = jnp.dtype(out_dtype) if out_dtype is not None else jnp.dtype(x.dtype)

    lm = int(lane_multiple) if lane_multiple else 1
    Cp, Pp = _round_up(Cin, lm), _round_up(P, lm)

    xk = x
    if Cp != Cin or Pp != P:
        # Zero-pad channels: padded weight rows/cols are zero and the padded
        # output channels are sliced off below, so numerics are unchanged.
        xk = jnp.pad(x, ((0, 0), (0, 0), (0, 0), (0, Cp - Cin)))
        w1 = jnp.pad(w1, ((0, 0), (0, 0), (0, Cp - Cin), (0, Pp - P)))
        w2 = jnp.pad(w2, ((0, 0), (0, 0), (0, Pp - P), (0, Cp - Cin)))
    xk = xk.astype(cdt)

    # HWIO (3,3,Ci,Co) -> im2col (9*Ci, Co); row order (ky, kx, ci) matches the
    # tap order used inside the kernel.
    w1_mat = w1.reshape(9 * Cp, Pp).astype(cdt)
    w2_mat = w2.reshape(9 * Pp, Cp).astype(cdt)

    # All five ZIConv2d scalars packed into one SMEM vector (kept f32).
    scal = jnp.concatenate([params["pre1"], params["post1"], params["pre2"],
                            params["mult2"], params["post2"]]).astype(jnp.float32)

    flops = 4 * 9 * N * H * W * Cp * Pp  # two 3x3 convs
    bytes_accessed = int(N * H * W * Cp * cdt.itemsize
                         + (w1_mat.size + w2_mat.size) * cdt.itemsize
                         + N * H * W * Cp * odt.itemsize)

    kernel = functools.partial(_basic_block_kernel, per_tap=bool(per_tap_matmul))

    out = pl.pallas_call(
        kernel,
        out_shape=jax.ShapeDtypeStruct((N, H, W, Cp), odt),
        grid=(N,),
        in_specs=[
            pl.BlockSpec((1, H, W, Cp), lambda n: (n, 0, 0, 0)),
            pl.BlockSpec(memory_space=pl.ANY),   # conv1 weights: HBM, copied once
            pl.BlockSpec(memory_space=pl.ANY),   # conv2 weights: HBM, copied once
            pl.BlockSpec(memory_space=pltpu.MemorySpace.SMEM),
        ],
        out_specs=pl.BlockSpec((1, H, W, Cp), lambda n: (n, 0, 0, 0)),
        scratch_shapes=[
            pltpu.VMEM((H + 2, W + 2 * _HALO, Cp), cdt),   # padded conv1 input
            pltpu.VMEM((H + 2, W + 2 * _HALO, Pp), cdt),   # padded conv1 activation
            pltpu.VMEM((9 * Cp, Pp), cdt),                 # conv1 weights (single buffer)
            pltpu.VMEM((9 * Pp, Cp), cdt),                 # conv2 weights (single buffer)
            pltpu.SemaphoreType.DMA((2,)),
        ],
        compiler_params=pltpu.CompilerParams(
            # Sequential grid: weights + zeroed halo borders are staged once at
            # step 0 into scratch that persists across steps (see row-tiling
            # TODO at top of file for megacore parallelism).
            dimension_semantics=("arbitrary",),
            vmem_limit_bytes=_vmem_limit_bytes(),
        ),
        cost_estimate=pl.CostEstimate(flops=flops, transcendentals=0,
                                      bytes_accessed=bytes_accessed),
    )(xk, w1_mat, w2_mat, scal)

    return out[..., :Cin] if Cp != Cin else out


def init_basic_block_params(key, inplanes, planes, expansion=1):
    k1, k2 = jax.random.split(key)
    w1 = jax.random.normal(k1, (3, 3, inplanes, planes), jnp.float32) \
        * math.sqrt(2.0 / (9 * inplanes))
    w2 = jax.random.normal(k2, (3, 3, planes, expansion * planes), jnp.float32) \
        * math.sqrt(2.0 / (9 * planes))
    zero = jnp.zeros((1,), jnp.float32)
    return {
        "w1": w1, "w2": w2,
        "pre1": zero, "post1": zero,
        "pre2": zero, "post2": zero,
        "mult2": jnp.ones((1,), jnp.float32),
    }


def _ref_forward_nhwc(x, params):
    """Pure-JAX reference of the same forward (for correctness checks)."""
    def conv(y, w):
        return jax.lax.conv_general_dilated(
            y, w, window_strides=(1, 1), padding="SAME",
            dimension_numbers=("NHWC", "HWIO", "NHWC"))
    out = conv(x + params["pre1"][0], params["w1"]) + params["post1"][0]
    out = jnp.maximum(out, 0.0)
    out = conv(out + params["pre2"][0], params["w2"]) * params["mult2"][0] \
        + params["post2"][0]
    return jnp.maximum(out + x, 0.0)


if __name__ == "__main__":
    key = jax.random.PRNGKey(0)
    kx, kp, ks = jax.random.split(key, 3)

    # PyTorch-convention input: NCHW, inplanes == planes (default residual path)
    N, C, H, W = 2, 4, 16, 16
    x_nchw = jax.random.normal(kx, (N, C, H, W), jnp.float32)
    params = init_basic_block_params(kp, inplanes=C, planes=C, expansion=1)
    # Non-trivial ZIConv2d scalars so the checks exercise their placement.
    s = 0.1 * jax.random.normal(ks, (5,), jnp.float32)
    params.update(pre1=s[0:1], post1=s[1:2], pre2=s[2:3], post2=s[3:4],
                  mult2=1.0 + s[4:5])

    x_nhwc = jnp.transpose(x_nchw, (0, 2, 3, 1))
    ref = _ref_forward_nhwc(x_nhwc, params)

    # 1) f32 operands, lane-padded channels (default), single im2col matmul.
    out_f32 = jax.block_until_ready(basic_block_forward_nhwc(x_nhwc, params))
    assert out_f32.shape == (N, H, W, C)
    assert jnp.allclose(out_f32, ref, atol=1e-4, rtol=1e-4), \
        "Pallas f32 output mismatch vs JAX reference"

    # 2) bf16 operands + bf16 output (v6e/v7x HBM saver); f32 accumulation.
    out_bf16 = jax.block_until_ready(
        basic_block_forward_nhwc(x_nhwc, params, compute_dtype=jnp.bfloat16,
                                 out_dtype=jnp.bfloat16))
    assert jnp.allclose(out_bf16.astype(jnp.float32), ref, atol=1e-1, rtol=1e-1), \
        "Pallas bf16 output mismatch vs JAX reference"

    # 3) per-tap accumulation path (v7x MRB style), no channel padding.
    out_tap = jax.block_until_ready(
        basic_block_forward_nhwc(x_nhwc, params, per_tap_matmul=True,
                                 lane_multiple=None))
    assert jnp.allclose(out_tap, ref, atol=1e-4, rtol=1e-4), \
        "Pallas per-tap output mismatch vs JAX reference"

    out_nchw = jnp.transpose(out_f32, (0, 3, 1, 2))
    assert out_nchw.shape == (N, C, H, W)

    print("KERNEL_OK")
</pallas_src>

<mosaic_0001>
module attributes {stable_mosaic.version = 11 : i64} {
  func.func @_basic_block_kernel(%arg0: i32, %arg1: memref<1x16x16x128xf32, #tpu.memory_space<vmem>>, %arg2: memref<1152x128xf32, #tpu.memory_space<any>>, %arg3: memref<1152x128xf32, #tpu.memory_space<any>>, %arg4: memref<5xf32, #tpu.memory_space<smem>>, %arg5: memref<1x16x16x128xf32, #tpu.memory_space<vmem>>, %arg6: memref<18x32x128xf32, #tpu.memory_space<vmem>>, %arg7: memref<18x32x128xf32, #tpu.memory_space<vmem>>, %arg8: memref<1152x128xf32, #tpu.memory_space<vmem>>, %arg9: memref<1152x128xf32, #tpu.memory_space<vmem>>, %arg10: memref<2x!tpu.dma_semaphore, #tpu.memory_space<semaphore_mem>>) attributes {dimension_semantics = [#tpu.dimension_semantics<arbitrary>], iteration_bounds = array<i64: 2>, scalar_prefetch = 0 : i64, scratch_operands = 5 : i64, tpu.core_type = #tpu.core_type<tc>, window_params = [{transform_indices = @transform_0, window_bounds = array<i64: 1, 16, 16, 128>}, {}, {}, {transform_indices = @transform_3, window_bounds = array<i64: 5>}, {transform_indices = @transform_4, window_bounds = array<i64: 1, 16, 16, 128>}]} {
    %c0 = arith.constant 0 : index
    %0 = memref.load %arg4[%c0] : memref<5xf32, #tpu.memory_space<smem>>
    %c1 = arith.constant 1 : index
    %1 = memref.load %arg4[%c1] : memref<5xf32, #tpu.memory_space<smem>>
    %c2 = arith.constant 2 : index
    %2 = memref.load %arg4[%c2] : memref<5xf32, #tpu.memory_space<smem>>
    %c3 = arith.constant 3 : index
    %3 = memref.load %arg4[%c3] : memref<5xf32, #tpu.memory_space<smem>>
    %c4 = arith.constant 4 : index
    %4 = memref.load %arg4[%c4] : memref<5xf32, #tpu.memory_space<smem>>
    %c0_i32 = arith.constant 0 : i32
    %5 = arith.cmpi eq, %arg0, %c0_i32 : i32
    %6 = arith.extui %5 : i1 to i32
    %c0_i32_0 = arith.constant 0 : i32
    %7 = arith.cmpi ne, %6, %c0_i32_0 : i32
    scf.if %7 {
      %cst_73 = arith.constant 0.000000e+00 : f32
      %58 = vector.broadcast %cst_73 : f32 to vector<18x32x128xf32>
      %c0_74 = arith.constant 0 : index
      %c0_75 = arith.constant 0 : index
      %c0_76 = arith.constant 0 : index
      %59 = vector.load %arg6[%c0_74, %c0_75, %c0_76] : memref<18x32x128xf32, #tpu.memory_space<vmem>>, vector<18x32x128xf32>
      tpu.vector_store %arg6[%c0_74, %c0_75, %c0_76], %58 {strides = array<i32>} : memref<18x32x128xf32, #tpu.memory_space<vmem>>, vector<18x32x128xf32>,
      %cst_77 = arith.constant 0.000000e+00 : f32
      %60 = vector.broadcast %cst_77 : f32 to vector<18x32x128xf32>
      %c0_78 = arith.constant 0 : index
      %c0_79 = arith.constant 0 : index
      %c0_80 = arith.constant 0 : index
      %61 = vector.load %arg7[%c0_78, %c0_79, %c0_80] : memref<18x32x128xf32, #tpu.memory_space<vmem>>, vector<18x32x128xf32>
      tpu.vector_store %arg7[%c0_78, %c0_79, %c0_80], %60 {strides = array<i32>} : memref<18x32x128xf32, #tpu.memory_space<vmem>>, vector<18x32x128xf32>,
      %c0_i32_81 = arith.constant 0 : i32
      %62 = tpu.memref_slice %arg10[%c0_i32_81] : memref<2x!tpu.dma_semaphore, #tpu.memory_space<semaphore_mem>> -> memref<1x!tpu.dma_semaphore, #tpu.memory_space<semaphore_mem>>
      %63 = tpu.memref_squeeze %62 : memref<1x!tpu.dma_semaphore, #tpu.memory_space<semaphore_mem>> -> memref<!tpu.dma_semaphore, #tpu.memory_space<semaphore_mem>>
      tpu.enqueue_dma source(%arg2 : memref<1152x128xf32, #tpu.memory_space<any>>) target(%arg8 : memref<1152x128xf32, #tpu.memory_space<vmem>>) target_semaphore(%63 : memref<!tpu.dma_semaphore, #tpu.memory_space<semaphore_mem>>)
      %c1_i32 = arith.constant 1 : i32
      %64 = tpu.memref_slice %arg10[%c1_i32] : memref<2x!tpu.dma_semaphore, #tpu.memory_space<semaphore_mem>> -> memref<1x!tpu.dma_semaphore, #tpu.memory_space<semaphore_mem>>
      %65 = tpu.memref_squeeze %64 : memref<1x!tpu.dma_semaphore, #tpu.memory_space<semaphore_mem>> -> memref<!tpu.dma_semaphore, #tpu.memory_space<semaphore_mem>>
      tpu.enqueue_dma source(%arg3 : memref<1152x128xf32, #tpu.memory_space<any>>) target(%arg9 : memref<1152x128xf32, #tpu.memory_space<vmem>>) target_semaphore(%65 : memref<!tpu.dma_semaphore, #tpu.memory_space<semaphore_mem>>)
      %c0_i32_82 = arith.constant 0 : i32
      %66 = tpu.memref_slice %arg10[%c0_i32_82] : memref<2x!tpu.dma_semaphore, #tpu.memory_space<semaphore_mem>> -> memref<1x!tpu.dma_semaphore, #tpu.memory_space<semaphore_mem>>
      %67 = tpu.memref_squeeze %66 : memref<1x!tpu.dma_semaphore, #tpu.memory_space<semaphore_mem>> -> memref<!tpu.dma_semaphore, #tpu.memory_space<semaphore_mem>>
      tpu.wait_dma2 semaphore(%67 : memref<!tpu.dma_semaphore, #tpu.memory_space<semaphore_mem>>) src(%arg2 : memref<1152x128xf32, #tpu.memory_space<any>>) dst(%arg8 : memref<1152x128xf32, #tpu.memory_space<vmem>>)
      %c1_i32_83 = arith.constant 1 : i32
      %68 = tpu.memref_slice %arg10[%c1_i32_83] : memref<2x!tpu.dma_semaphore, #tpu.memory_space<semaphore_mem>> -> memref<1x!tpu.dma_semaphore, #tpu.memory_space<semaphore_mem>>
      %69 = tpu.memref_squeeze %68 : memref<1x!tpu.dma_semaphore, #tpu.memory_space<semaphore_mem>> -> memref<!tpu.dma_semaphore, #tpu.memory_space<semaphore_mem>>
      tpu.wait_dma2 semaphore(%69 : memref<!tpu.dma_semaphore, #tpu.memory_space<semaphore_mem>>) src(%arg3 : memref<1152x128xf32, #tpu.memory_space<any>>) dst(%arg9 : memref<1152x128xf32, #tpu.memory_space<vmem>>)
    } else {
    }
    %c0_1 = arith.constant 0 : index
    %c0_2 = arith.constant 0 : index
    %c0_3 = arith.constant 0 : index
    %c0_4 = arith.constant 0 : index
    %8 = vector.load %arg1[%c0_1, %c0_2, %c0_3, %c0_4] : memref<1x16x16x128xf32, #tpu.memory_space<vmem>>, vector<1x16x16x128xf32>
    %9 = vector.shape_cast %8 : vector<1x16x16x128xf32> to vector<16x16x128xf32>
    %10 = vector.broadcast %0 : f32 to vector<16x16x128xf32>
    %11 = arith.addf %9, %10 : vector<16x16x128xf32>
    %c1_5 = arith.constant 1 : index
    %c8 = arith.constant 8 : index
    %c0_6 = arith.constant 0 : index
    %12 = vector.load %arg6[%c1_5, %c8, %c0_6] : memref<18x32x128xf32, #tpu.memory_space<vmem>>, vector<16x16x128xf32>
    tpu.vector_store %arg6[%c1_5, %c8, %c0_6], %11 {strides = array<i32>} : memref<18x32x128xf32, #tpu.memory_space<vmem>>, vector<16x16x128xf32>,
    %c0_7 = arith.constant 0 : index
    %c7 = arith.constant 7 : index
    %c0_8 = arith.constant 0 : index
    %13 = vector.load %arg6[%c0_7, %c7, %c0_8] : memref<18x32x128xf32, #tpu.memory_space<vmem>>, vector<16x16x128xf32>
    %c0_9 = arith.constant 0 : index
    %c8_10 = arith.constant 8 : index
    %c0_11 = arith.constant 0 : index
    %14 = vector.load %arg6[%c0_9, %c8_10, %c0_11] : memref<18x32x128xf32, #tpu.memory_space<vmem>>, vector<16x16x128xf32>
    %c0_12 = arith.constant 0 : index
    %c9 = arith.constant 9 : index
    %c0_13 = arith.constant 0 : index
    %15 = vector.load %arg6[%c0_12, %c9, %c0_13] : memref<18x32x128xf32, #tpu.memory_space<vmem>>, vector<16x16x128xf32>
    %c1_14 = arith.constant 1 : index
    %c7_15 = arith.constant 7 : index
    %c0_16 = arith.constant 0 : index
    %16 = vector.load %arg6[%c1_14, %c7_15, %c0_16] : memref<18x32x128xf32, #tpu.memory_space<vmem>>, vector<16x16x128xf32>
    %c1_17 = arith.constant 1 : index
    %c8_18 = arith.constant 8 : index
    %c0_19 = arith.constant 0 : index
    %17 = vector.load %arg6[%c1_17, %c8_18, %c0_19] : memref<18x32x128xf32, #tpu.memory_space<vmem>>, vector<16x16x128xf32>
    %c1_20 = arith.constant 1 : index
    %c9_21 = arith.constant 9 : index
    %c0_22 = arith.constant 0 : index
    %18 = vector.load %arg6[%c1_20, %c9_21, %c0_22] : memref<18x32x128xf32, #tpu.memory_space<vmem>>, vector<16x16x128xf32>
    %c2_23 = arith.constant 2 : index
    %c7_24 = arith.constant 7 : index
    %c0_25 = arith.constant 0 : index
    %19 = vector.load %arg6[%c2_23, %c7_24, %c0_25] : memref<18x32x128xf32, #tpu.memory_space<vmem>>, vector<16x16x128xf32>
    %c2_26 = arith.constant 2 : index
    %c8_27 = arith.constant 8 : index
    %c0_28 = arith.constant 0 : index
    %20 = vector.load %arg6[%c2_26, %c8_27, %c0_28] : memref<18x32x128xf32, #tpu.memory_space<vmem>>, vector<16x16x128xf32>
    %c2_29 = arith.constant 2 : index
    %c9_30 = arith.constant 9 : index
    %c0_31 = arith.constant 0 : index
    %21 = vector.load %arg6[%c2_29, %c9_30, %c0_31] : memref<18x32x128xf32, #tpu.memory_space<vmem>>, vector<16x16x128xf32>
    %22 = tpu.concatenate %13, %14, %15, %16, %17, %18, %19, %20, %21 in 2 : vector<16x16x128xf32>, vector<16x16x128xf32>, vector<16x16x128xf32>, vector<16x16x128xf32>, vector<16x16x128xf32>, vector<16x16x128xf32>, vector<16x16x128xf32>, vector<16x16x128xf32>, vector<16x16x128xf32> -> vector<16x16x1152xf32>
    %23 = vector.shape_cast %22 : vector<16x16x1152xf32> to vector<256x1152xf32>
    %c0_32 = arith.constant 0 : index
    %c0_33 = arith.constant 0 : index
    %24 = vector.load %arg8[%c0_32, %c0_33] : memref<1152x128xf32, #tpu.memory_space<vmem>>, vector<1152x128xf32>
    %cst = arith.constant dense<0.000000e+00> : vector<256x128xf32>
    %25 = tpu.matmul %23, %24, %cst {dimension_numbers = #tpu.dot_dimension_numbers<[1], [0], [0], [1], [0, 0, 1, 1], [], []>} : vector<256x1152xf32>, vector<1152x128xf32>, vector<256x128xf32> -> vector<256x128xf32>
    %26 = vector.broadcast %1 : f32 to vector<256x128xf32>
    %27 = arith.addf %25, %26 : vector<256x128xf32>
    %cst_34 = arith.constant 0.000000e+00 : f32
    %28 = vector.broadcast %cst_34 : f32 to vector<256x128xf32>
    %29 = arith.maximumf %27, %28 : vector<256x128xf32>
    %30 = vector.broadcast %2 : f32 to vector<256x128xf32>
    %31 = arith.addf %29, %30 : vector<256x128xf32>
    %32 = vector.shape_cast %31 : vector<256x128xf32> to vector<16x16x128xf32>
    %c1_35 = arith.constant 1 : index
    %c8_36 = arith.constant 8 : index
    %c0_37 = arith.constant 0 : index
    %33 = vector.load %arg7[%c1_35, %c8_36, %c0_37] : memref<18x32x128xf32, #tpu.memory_space<vmem>>, vector<16x16x128xf32>
    tpu.vector_store %arg7[%c1_35, %c8_36, %c0_37], %32 {strides = array<i32>} : memref<18x32x128xf32, #tpu.memory_space<vmem>>, vector<16x16x128xf32>,
    %c0_38 = arith.constant 0 : index
    %c7_39 = arith.constant 7 : index
    %c0_40 = arith.constant 0 : index
    %34 = vector.load %arg7[%c0_38, %c7_39, %c0_40] : memref<18x32x128xf32, #tpu.memory_space<vmem>>, vector<16x16x128xf32>
    %c0_41 = arith.constant 0 : index
    %c8_42 = arith.constant 8 : index
    %c0_43 = arith.constant 0 : index
    %35 = vector.load %arg7[%c0_41, %c8_42, %c0_43] : memref<18x32x128xf32, #tpu.memory_space<vmem>>, vector<16x16x128xf32>
    %c0_44 = arith.constant 0 : index
    %c9_45 = arith.constant 9 : index
    %c0_46 = arith.constant 0 : index
    %36 = vector.load %arg7[%c0_44, %c9_45, %c0_46] : memref<18x32x128xf32, #tpu.memory_space<vmem>>, vector<16x16x128xf32>
    %c1_47 = arith.constant 1 : index
    %c7_48 = arith.constant 7 : index
    %c0_49 = arith.constant 0 : index
    %37 = vector.load %arg7[%c1_47, %c7_48, %c0_49] : memref<18x32x128xf32, #tpu.memory_space<vmem>>, vector<16x16x128xf32>
    %c1_50 = arith.constant 1 : index
    %c8_51 = arith.constant 8 : index
    %c0_52 = arith.constant 0 : index
    %38 = vector.load %arg7[%c1_50, %c8_51, %c0_52] : memref<18x32x128xf32, #tpu.memory_space<vmem>>, vector<16x16x128xf32>
    %c1_53 = arith.constant 1 : index
    %c9_54 = arith.constant 9 : index
    %c0_55 = arith.constant 0 : index
    %39 = vector.load %arg7[%c1_53, %c9_54, %c0_55] : memref<18x32x128xf32, #tpu.memory_space<vmem>>, vector<16x16x128xf32>
    %c2_56 = arith.constant 2 : index
    %c7_57 = arith.constant 7 : index
    %c0_58 = arith.constant 0 : index
    %40 = vector.load %arg7[%c2_56, %c7_57, %c0_58] : memref<18x32x128xf32, #tpu.memory_space<vmem>>, vector<16x16x128xf32>
    %c2_59 = arith.constant 2 : index
    %c8_60 = arith.constant 8 : index
    %c0_61 = arith.constant 0 : index
    %41 = vector.load %arg7[%c2_59, %c8_60, %c0_61] : memref<18x32x128xf32, #tpu.memory_space<vmem>>, vector<16x16x128xf32>
    %c2_62 = arith.constant 2 : index
    %c9_63 = arith.constant 9 : index
    %c0_64 = arith.constant 0 : index
    %42 = vector.load %arg7[%c2_62, %c9_63, %c0_64] : memref<18x32x128xf32, #tpu.memory_space<vmem>>, vector<16x16x128xf32>
    %43 = tpu.concatenate %34, %35, %36, %37, %38, %39, %40, %41, %42 in 2 : vector<16x16x128xf32>, vector<16x16x128xf32>, vector<16x16x128xf32>, vector<16x16x128xf32>, vector<16x16x128xf32>, vector<16x16x128xf32>, vector<16x16x128xf32>, vector<16x16x128xf32>, vector<16x16x128xf32> -> vector<16x16x1152xf32>
    %44 = vector.shape_cast %43 : vector<16x16x1152xf32> to vector<256x1152xf32>
    %c0_65 = arith.constant 0 : index
    %c0_66 = arith.constant 0 : index
    %45 = vector.load %arg9[%c0_65, %c0_66] : memref<1152x128xf32, #tpu.memory_space<vmem>>, vector<1152x128xf32>
    %cst_67 = arith.constant dense<0.000000e+00> : vector<256x128xf32>
    %46 = tpu.matmul %44, %45, %cst_67 {dimension_numbers = #tpu.dot_dimension_numbers<[1], [0], [0], [1], [0, 0, 1, 1], [], []>} : vector<256x1152xf32>, vector<1152x128xf32>, vector<256x128xf32> -> vector<256x128xf32>
    %47 = vector.broadcast %3 : f32 to vector<256x128xf32>
    %48 = arith.mulf %46, %47 : vector<256x128xf32>
    %49 = vector.broadcast %4 : f32 to vector<256x128xf32>
    %50 = arith.addf %48, %49 : vector<256x128xf32>
    %51 = vector.shape_cast %50 : vector<256x128xf32> to vector<16x16x128xf32>
    %52 = arith.addf %51, %9 : vector<16x16x128xf32>
    %cst_68 = arith.constant 0.000000e+00 : f32
    %53 = vector.broadcast %cst_68 : f32 to vector<16x16x128xf32>
    %54 = arith.maximumf %52, %53 : vector<16x16x128xf32>
    %c0_69 = arith.constant 0 : index
    %c0_70 = arith.constant 0 : index
    %c0_71 = arith.constant 0 : index
    %c0_72 = arith.constant 0 : index
    %55 = vector.load %arg5[%c0_69, %c0_70, %c0_71, %c0_72] : memref<1x16x16x128xf32, #tpu.memory_space<vmem>>, vector<1x16x16x128xf32>
    %56 = vector.shape_cast %55 : vector<1x16x16x128xf32> to vector<16x16x128xf32>
    %57 = vector.shape_cast %54 : vector<16x16x128xf32> to vector<1x16x16x128xf32>
    tpu.vector_store %arg5[%c0_69, %c0_70, %c0_71, %c0_72], %57 {strides = array<i32>} : memref<1x16x16x128xf32, #tpu.memory_space<vmem>>, vector<1x16x16x128xf32>,
    return
  }
  func.func @transform_0(%arg0: i32) -> (i32, i32, i32, i32) {
    %c0_i32 = arith.constant 0 : i32
    %c0_i32_0 = arith.constant 0 : i32
    %c0_i32_1 = arith.constant 0 : i32
    %c0_i32_2 = arith.constant 0 : i32
    return %arg0, %c0_i32, %c0_i32_0, %c0_i32_1 : i32, i32, i32, i32
  }
  func.func @transform_3(%arg0: i32) -> i32 {
    %c0_i32 = arith.constant 0 : i32
    %c0_i32_0 = arith.constant 0 : i32
    return %c0_i32 : i32
  }
  func.func @transform_4(%arg0: i32) -> (i32, i32, i32, i32) {
    %c0_i32 = arith.constant 0 : i32
    %c0_i32_0 = arith.constant 0 : i32
    %c0_i32_1 = arith.constant 0 : i32
    %c0_i32_2 = arith.constant 0 : i32
    return %arg0, %c0_i32, %c0_i32_0, %c0_i32_1 : i32, i32, i32, i32
  }
}

</mosaic_0001>

<bundles_post_ra>
// kernel: tpu_custom_call.1
= control target key start
LH: loop header
LB: loop body
LE: loop exit
PB: predicated region body
PF: predicated region fallthrough
CT: control target
= control target key end

     0   :  { %s7226_s0 = inlined_call_operand.hbm [shape: f32[2,16,16,128], index: 0, kind: input, shape index: {}]   ;;  %s7227_s1 = inlined_call_operand.hbm [shape: f32[1152,128], index: 1, kind: input, shape index: {}]   ;;  %s7228_s2 = inlined_call_operand.hbm [shape: f32[1152,128], index: 2, kind: input, shape index: {}]   ;;  %s7229_s3 = inlined_call_operand.vmem [shape: f32[5], index: 3, kind: input, shape index: {}]   ;;  %s7230_s4 = inlined_call_operand.hbm [shape: f32[2,16,16,128], index: 4, kind: output, shape index: {}]  }
   0x1   :  { %7264 = sst [smem:[#allocation41_spill]] %s7226_s0 }
   0x2   :  { %7265 = sst [smem:[#allocation42_spill]] %s7229_s3 }
   0x3   :  { %9 = vsyncpa [#allocation8], 0 }
   0x4   :  { %11 = vsyncpa [#allocation8 + $0x1], 0 }
   0x5   :  { %12 = vsyncpa [#allocation10], 0 }
   0x6   :  { %13 = vsyncpa [#allocation9], 0 }
   0x7   :  { %15 = vsyncpa [#allocation9 + $0x1], 0  ;;  %s5437_s15 = smov 0   ;;  %s5439_s16 = smov 0  }
   0x8   :  { %s5441_s17 = smov 0   ;;  %s5443_s18 = smov 0  }
   0x9 LB: > { %s5458_s19 = sadd.s32 4294967295, %s5399_s18   ;;  %s3946_s20 = sadd.s32 4294967294, %s5399_s18   ;;  %s5399_s18 = sphi %s5443_s18, %s7320_s18   ;;  %s5395_s17 = sphi %s5441_s17, %s7319_s17   ;;  %s5391_s16 = sphi %s5439_s16, %s7318_s16   ;;  %s5387_s15 = sphi %s5437_s15, %s7317_s15  }
   0xa   : > { %s5462_s21 = sadd.s32 1, %s5399_s18   ;;  %s28_s22 = sadd.s32 1, %s5395_s17 }
   0xb   : > { %s25_s23 = ssub.s32 %s5399_s18, %s5462_s21  ;;  %p35_p0 = scmp.ne.s32.totalorder %s5395_s17, %s5391_s16 }
   0xc   : > { %p26_p1 = scmp.eq.s32.totalorder %s25_s23, 0  ;;  %p36_p2 = scmp.eq.s32.totalorder %s5399_s18, 0 }
   0xd   : > { %p41_p3 = scmp.ne.s32.totalorder %s5391_s16, %s5387_s15  ;;  %p7232_p4 = scmp.eq.s32.totalorder %s5458_s19, 0 }
   0xe   : > { %s5474_s24 = scalar_select %p26_p1, %s5395_s17, %s28_s22  }
   0xf   : > { %p5476_p5 = por %p36_p2, %p35_p0  ;;  %p5482_p6 = por %p7232_p4, %p41_p3 }
  0x10   : > { %7266 = sst [smem:[#allocation24_spill]] %s5474_s24  ;;  %p86_p7 = scmp.eq.s32.totalorder %s5458_s19, 1 }
  0x11   : > { %s7268_s26 = scalar_select %p5482_p6, 1, 0 }
  0x12   : > { %p92_p8 = scmp.eq.s32.totalorder %s3946_s20, 1  ;;  %p3947_p9 = scmp.ge.s32.totalorder %s5399_s18, 1 }
  0x13   : > { %p99_p10 = scmp.lt.s32.totalorder %s5399_s18, 3  ;;  %p5489_p11 = por %p86_p7, %p35_p0 }
  0x14   : > { %p5493_p12 = por %p92_p8, %p41_p3  ;;  %s7272_s3 = sld [smem:[#allocation42_spill]] }
  0x15   : > { %s7269_s27 = scalar_select %p5489_p11, 1, 0 }
  0x16   : > { %s7270_s28 = scalar_select %p5493_p12, 1, 0 }
  0x17   : > { %p5497_p13 = pnand %p3947_p9, %p99_p10  ;;  %p5128_p7 = scmp.lt.s32.totalorder %s5399_s18, 2 }
  0x18   : > { %s123_s8 = sand.u32 1, %s5395_s17  }
  0x19   : > { %p5115_p2 = pneg %p5497_p13  ;;  %p5518_p8 = pnand %p5128_p7, %p5476_p5 }
  0x1a   : > { %s112_s6 = sshll.u32 %s7272_s3, 4  ;;  %s3950_s10 = sshll.u32 %s123_s8, 8  ;;  %s113_s6 = int_to_ptr.vmem [resolvable:$true] %s112_s6 }
  0x1b   : > { %p5511_p3 = pnand %p5115_p2, %p7232_p4  ;;  %s5236_s11 = scalar_lea.vmem %s113_s6, 16 }
  0x1c   : > { %p5237_p9 = scmp.ne.s32.totalorder %s113_s6, %s5236_s11  ;;  %p5244_p12 = scmp.lt.s32.totalorder %s113_s6, %s113_s6 }
  0x1d   : > { %p5238_p10 = pneg %p5511_p3  ;;  %p5245_p11 = scmp.lt.s32.totalorder %s5236_s11, %s5236_s11 }
  0x1f   : > { %p5239_p1 = pnand %p5238_p10, %p5237_p9  ;;  %p5246_p2 = por %p5245_p11, %p5244_p12 }
  0x21   : > { %p5240_p0 = pneg %p5239_p1 }
  0x23   : > { %p5247_p4 = pnand %p5246_p2, %p5240_p0 }
  0x25   : > { %5250 = shalt.err (!%p5247_p4)
}
  0x26   : > { %s5401_s12 = smov [#allocation11]   ;;  %s3969_s13 = sshll.u32 %s5399_s18, 12 }
  0x27   : > { %5118 = dma.vmem_to_smem (!%p5511_p3), %s113_s6, 16, %s5401_s12, [#allocation10]  }
  0x28   : > { %s127_s14 = scalar_lea.vmem [#allocation7], %s3950_s10  ;;  %s7275_s0 = sld [smem:[#allocation41_spill]] }
  0x29   : > { %s134_s20 = sshll.u32 %s127_s14, 4  ;;  %s5534_s30 = scalar_lea.sflag [#allocation8], %s123_s8  ;;  %s5532_s20 = int_to_ptr.vmem [resolvable:$true] %s134_s20 }
  0x2a   : > { %p5253_p5 = pneg %p5518_p8 }
  0x2e   : > { %s5530_s25 = scalar_lea.hbm %s7275_s0, %s3969_s13  ;;  %s5256_s10 = scalar_lea.hbm %s7275_s0, 8192 }
  0x2f   : > { %s5251_s5 = scalar_lea.hbm %s5530_s25, 4096  ;;  %p5257_p1 = scmp.lt.u32.totalorder %s5530_s25, %s7275_s0 }
  0x30   : > { %p5252_p4 = scmp.ne.s32.totalorder %s5530_s25, %s5251_s5  ;;  %p5258_p0 = scmp.lt.u32.totalorder %s5256_s10, %s5251_s5 }
  0x31   : > { %p5260_p3 = scmp.lt.u32.totalorder %s5251_s5, %s5530_s25 }
  0x32   : > { %p5254_p11 = pnand %p5253_p5, %p5252_p4  ;;  %p5259_p7 = por %p5258_p0, %p5257_p1 }
  0x34   : > { %p5255_p12 = pneg %p5254_p11  ;;  %p5261_p9 = por %p5260_p3, %p5259_p7 }
  0x36   : > { %p5262_p10 = pnand %p5261_p9, %p5255_p12 }
  0x38   : > { %5265 = shalt.err (!%p5262_p10)
}
  0x39   : > { %s5266_s8 = scalar_lea.vmem %s5532_s20, 4096  ;;  %s5402_s13 = smov [#allocation7]  }
  0x3a   : > { %p5267_p2 = scmp.ne.s32.totalorder %s5532_s20, %s5266_s8  ;;  %s5271_s14 = sshll.u32 %s5402_s13, 4  ;;  %s5272_s14 = int_to_ptr.vmem [resolvable:$false] %s5271_s14 }
  0x3b   : > { %s5273_s22 = scalar_lea.vmem %s5272_s14, 8192  ;;  %p5274_p6 = scmp.lt.s32.totalorder %s5532_s20, %s5272_s14 }
  0x3c   : > { %p5269_p4 = pnand %p5267_p2, %p5253_p5  ;;  %p5275_p1 = scmp.lt.s32.totalorder %s5273_s22, %s5266_s8 }
  0x3e   : > { %p5270_p11 = pneg %p5269_p4  ;;  %p5276_p0 = por %p5275_p1, %p5274_p6 }
  0x40   : > { %p5277_p7 = pnand %p5276_p0, %p5270_p11 }
  0x42   : > { %5280 = shalt.err (!%p5277_p7)
}
  0x43   : > { %s5403_s23 = smov 128   ;;  %s5404_s5 = smov 8  }
  0x44   : > { %5122 = dma.hbm_to_vmem [thread:$0]  (!%p5518_p8), %s5530_s25, 4096, %s5532_s20, %s5534_s30, %s5403_s23, %s5403_s23, %s5404_s5  }
  0x45   : > { %146 = sbr.rel (%p5497_p13) target bundleno = 1625 (0x659), region = 28 }
  0x4c   : > { %s5565_s6 = sand.u32 1, %s5391_s16   ;;  %p7276_p6 = scmp.ne.s32.totalorder %s7268_s26, 0 }
  0x4d   : > { %s3954_s7 = sshll.u32 %s5565_s6, 8  ;;  %s149_s10 = scalar_lea.sflag [#allocation8], %s5565_s6 }
  0x4e   : > { %s5569_s11 = scalar_lea.vmem [#allocation7], %s3954_s7 }
  0x4f   : > { %5370 = dma.done.wait (%p7276_p6), %s149_s10, 4096  }
  0x50   : > { %5372 = vsyncadd (%p7276_p6), %s149_s10, 4294963200  ;;  %p7277_p8 = scmp.eq.s32.totalorder %s5458_s19, 0 }
  0x52   : > { %5374 = dma.done.wait (%p7277_p8), [#allocation10], 16   ;;  %p7278_p13 = pmov %p7277_p8 }
  0x54   : > { %5376 = vsyncadd (%p7278_p13), [#allocation10], 4294967280 }
  0x55   : > { %161 = sfence }
  0x56   : > { %s5579_s29 = sld [smem:[#allocation11]]  ;;  %s5581_s9 = sld [smem:[#allocation11 + $0x1]] }
  0x57   : > { %s5583_s20 = sld [smem:[#allocation11 + $0x2]]  ;;  %s5585_s25 = sld [smem:[#allocation11 + $0x3]] }
  0x58   : > { %s5587_s30 = sld [smem:[#allocation11 + $0x4]]  ;;  %s5589_s12 = scalar_lea.vmem [#allocation12], %s3954_s7 }
  0x59   : > { %p7279_p5 = scmp.ne.s32.totalorder %s5458_s19, 0 }
  0x5a   : > { %s5405_s26 = smov (!%p7279_p5), [#allocation4]   ;;  %v5406_v0 = vmov (!%p7279_p5), 0.0   ;;  %s5407_s13 = smov (!%p7279_p5), [#allocation5]  }
  0x5b   : > { %186 = sbr.rel (%p7279_p5) target bundleno = 192 (0xc0), region = 40  ;;  %s5593_s8 = sshll.u32 (!%p7279_p5), %s5405_s26, 4  ;;  %187 = vst [vmem:[#allocation2] sm:$0xff] (!%p7279_p5), %v5406_v0  ;;  %188 = vst [vmem:[#allocation2 + $0x8] sm:$0xff] (!%p7279_p5), %v5406_v0  ;;  %s339_s8 = int_to_ptr.vmem [resolvable:$true] %s5593_s8 }
  0x5c   : > { %189 = vst [vmem:[#allocation2 + $0x10] sm:$0xff] (!%p7279_p5), %v5406_v0  ;;  %190 = vst [vmem:[#allocation2 + $0x18] sm:$0xff] (!%p7279_p5), %v5406_v0  ;;  %s350_s14 = sshll.u32 (!%p7279_p5), %s5407_s13, 4  ;;  %s5281_s5 = scalar_lea.hbm (!%p7279_p5), %s7227_s1, 18432  ;;  %s351_s14 = int_to_ptr.vmem [resolvable:$true] %s350_s14 }
  0x5d   : > { %191 = vst [vmem:[#allocation2 + $0x20] sm:$0xff] (!%p7279_p5), %v5406_v0  ;;  %192 = vst [vmem:[#allocation2 + $0x28] sm:$0xff] (!%p7279_p5), %v5406_v0  ;;  %p5282_p12 = scmp.ne.s32.totalorder (!%p7279_p5), %s7227_s1, %s5281_s5  ;;  %p5285_p3 = scmp.lt.u32.totalorder (!%p7279_p5), %s5281_s5, %s7227_s1 }
  0x5e   : > { %193 = vst [vmem:[#allocation2 + $0x30] sm:$0xff] (!%p7279_p5), %v5406_v0  ;;  %194 = vst [vmem:[#allocation2 + $0x38] sm:$0xff] (!%p7279_p5), %v5406_v0 }
  0x5f   : > { %195 = vst [vmem:[#allocation2 + $0x40] sm:$0xff] (!%p7279_p5), %v5406_v0  ;;  %196 = vst [vmem:[#allocation2 + $0x48] sm:$0xff] (!%p7279_p5), %v5406_v0  ;;  %p5287_p9 = pnand (!%p7279_p5), %p5285_p3, %p5282_p12 }
  0x60   : > { %197 = vst [vmem:[#allocation2 + $0x50] sm:$0xff] (!%p7279_p5), %v5406_v0  ;;  %198 = vst [vmem:[#allocation2 + $0x58] sm:$0xff] (!%p7279_p5), %v5406_v0 }
  0x61   : > { %199 = vst [vmem:[#allocation2 + $0x60] sm:$0xff] (!%p7279_p5), %v5406_v0  ;;  %200 = vst [vmem:[#allocation2 + $0x68] sm:$0xff] (!%p7279_p5), %v5406_v0 }
  0x62   : > { %201 = vst [vmem:[#allocation2 + $0x70] sm:$0xff] %v5406_v0  ;;  %202 = vst [vmem:[#allocation2 + $0x78] sm:$0xff] %v5406_v0 }
  0x63   : > { %203 = vst [vmem:[#allocation2 + $0x80] sm:$0xff] %v5406_v0  ;;  %204 = vst [vmem:[#allocation2 + $0x88] sm:$0xff] %v5406_v0 }
  0x64   : > { %205 = vst [vmem:[#allocation2 + $0x90] sm:$0xff] %v5406_v0  ;;  %206 = vst [vmem:[#allocation2 + $0x98] sm:$0xff] %v5406_v0 }
  0x65   : > { %207 = vst [vmem:[#allocation2 + $0xa0] sm:$0xff] %v5406_v0  ;;  %208 = vst [vmem:[#allocation2 + $0xa8] sm:$0xff] %v5406_v0 }
  0x66   : > { %209 = vst [vmem:[#allocation2 + $0xb0] sm:$0xff] %v5406_v0  ;;  %210 = vst [vmem:[#allocation2 + $0xb8] sm:$0xff] %v5406_v0 }
  0x67   : > { %211 = vst [vmem:[#allocation2 + $0xc0] sm:$0xff] %v5406_v0  ;;  %212 = vst [vmem:[#allocation2 + $0xc8] sm:$0xff] %v5406_v0 }
  0x68   : > { %213 = vst [vmem:[#allocation2 + $0xd0] sm:$0xff] %v5406_v0  ;;  %214 = vst [vmem:[#allocation2 + $0xd8] sm:$0xff] %v5406_v0 }
  0x69   : > { %215 = vst [vmem:[#allocation2 + $0xe0] sm:$0xff] %v5406_v0  ;;  %216 = vst [vmem:[#allocation2 + $0xe8] sm:$0xff] %v5406_v0 }
  0x6a   : > { %217 = vst [vmem:[#allocation2 + $0xf0] sm:$0xff] %v5406_v0  ;;  %218 = vst [vmem:[#allocation2 + $0xf8] sm:$0xff] %v5406_v0 }
  0x6b   : > { %219 = vst [vmem:[#allocation2 + $0x100] sm:$0xff] %v5406_v0  ;;  %220 = vst [vmem:[#allocation2 + $0x108] sm:$0xff] %v5406_v0 }
  0x6c   : > { %221 = vst [vmem:[#allocation2 + $0x110] sm:$0xff] %v5406_v0  ;;  %222 = vst [vmem:[#allocation2 + $0x118] sm:$0xff] %v5406_v0 }
  0x6d   : > { %223 = vst [vmem:[#allocation2 + $0x120] sm:$0xff] %v5406_v0  ;;  %224 = vst [vmem:[#allocation2 + $0x128] sm:$0xff] %v5406_v0 }
  0x6e   : > { %225 = vst [vmem:[#allocation2 + $0x130] sm:$0xff] %v5406_v0  ;;  %226 = vst [vmem:[#allocation2 + $0x138] sm:$0xff] %v5406_v0 }
  0x6f   : > { %227 = vst [vmem:[#allocation2 + $0x140] sm:$0xff] %v5406_v0  ;;  %228 = vst [vmem:[#allocation2 + $0x148] sm:$0xff] %v5406_v0 }
  0x70   : > { %229 = vst [vmem:[#allocation2 + $0x150] sm:$0xff] %v5406_v0  ;;  %230 = vst [vmem:[#allocation2 + $0x158] sm:$0xff] %v5406_v0 }
  0x71   : > { %231 = vst [vmem:[#allocation2 + $0x160] sm:$0xff] %v5406_v0  ;;  %232 = vst [vmem:[#allocation2 + $0x168] sm:$0xff] %v5406_v0 }
  0x72   : > { %233 = vst [vmem:[#allocation2 + $0x170] sm:$0xff] %v5406_v0  ;;  %234 = vst [vmem:[#allocation2 + $0x178] sm:$0xff] %v5406_v0 }
  0x73   : > { %235 = vst [vmem:[#allocation2 + $0x180] sm:$0xff] %v5406_v0  ;;  %236 = vst [vmem:[#allocation2 + $0x188] sm:$0xff] %v5406_v0 }
  0x74   : > { %237 = vst [vmem:[#allocation2 + $0x190] sm:$0xff] %v5406_v0  ;;  %238 = vst [vmem:[#allocation2 + $0x198] sm:$0xff] %v5406_v0 }
  0x75   : > { %239 = vst [vmem:[#allocation2 + $0x1a0] sm:$0xff] %v5406_v0  ;;  %240 = vst [vmem:[#allocation2 + $0x1a8] sm:$0xff] %v5406_v0 }
  0x76   : > { %241 = vst [vmem:[#allocation2 + $0x1b0] sm:$0xff] %v5406_v0  ;;  %242 = vst [vmem:[#allocation2 + $0x1b8] sm:$0xff] %v5406_v0 }
  0x77   : > { %243 = vst [vmem:[#allocation2 + $0x1c0] sm:$0xff] %v5406_v0  ;;  %244 = vst [vmem:[#allocation2 + $0x1c8] sm:$0xff] %v5406_v0 }
  0x78   : > { %245 = vst [vmem:[#allocation2 + $0x1d0] sm:$0xff] %v5406_v0  ;;  %246 = vst [vmem:[#allocation2 + $0x1d8] sm:$0xff] %v5406_v0 }
  0x79   : > { %247 = vst [vmem:[#allocation2 + $0x1e0] sm:$0xff] %v5406_v0  ;;  %248 = vst [vmem:[#allocation2 + $0x1e8] sm:$0xff] %v5406_v0 }
  0x7a   : > { %249 = vst [vmem:[#allocation2 + $0x1f0] sm:$0xff] %v5406_v0  ;;  %250 = vst [vmem:[#allocation2 + $0x1f8] sm:$0xff] %v5406_v0 }
  0x7b   : > { %251 = vst [vmem:[#allocation2 + $0x200] sm:$0xff] %v5406_v0  ;;  %252 = vst [vmem:[#allocation2 + $0x208] sm:$0xff] %v5406_v0 }
  0x7c   : > { %253 = vst [vmem:[#allocation2 + $0x210] sm:$0xff] %v5406_v0  ;;  %254 = vst [vmem:[#allocation2 + $0x218] sm:$0xff] %v5406_v0 }
  0x7d   : > { %255 = vst [vmem:[#allocation2 + $0x220] sm:$0xff] %v5406_v0  ;;  %256 = vst [vmem:[#allocation2 + $0x228] sm:$0xff] %v5406_v0 }
  0x7e   : > { %257 = vst [vmem:[#allocation2 + $0x230] sm:$0xff] %v5406_v0  ;;  %258 = vst [vmem:[#allocation2 + $0x238] sm:$0xff] %v5406_v0 }
  0x7f   : > { %259 = vst [vmem:[#allocation3] sm:$0xff] %v5406_v0  ;;  %260 = vst [vmem:[#allocation3 + $0x8] sm:$0xff] %v5406_v0 }
  0x80   : > { %261 = vst [vmem:[#allocation3 + $0x10] sm:$0xff] %v5406_v0  ;;  %262 = vst [vmem:[#allocation3 + $0x18] sm:$0xff] %v5406_v0 }
  0x81   : > { %263 = vst [vmem:[#allocation3 + $0x20] sm:$0xff] %v5406_v0  ;;  %264 = vst [vmem:[#allocation3 + $0x28] sm:$0xff] %v5406_v0 }
  0x82   : > { %265 = vst [vmem:[#allocation3 + $0x30] sm:$0xff] %v5406_v0  ;;  %266 = vst [vmem:[#allocation3 + $0x38] sm:$0xff] %v5406_v0 }
  0x83   : > { %267 = vst [vmem:[#allocation3 + $0x40] sm:$0xff] %v5406_v0  ;;  %268 = vst [vmem:[#allocation3 + $0x48] sm:$0xff] %v5406_v0 }
  0x84   : > { %269 = vst [vmem:[#allocation3 + $0x50] sm:$0xff] %v5406_v0  ;;  %270 = vst [vmem:[#allocation3 + $0x58] sm:$0xff] %v5406_v0 }
  0x85   : > { %271 = vst [vmem:[#allocation3 + $0x60] sm:$0xff] %v5406_v0  ;;  %272 = vst [vmem:[#allocation3 + $0x68] sm:$0xff] %v5406_v0 }
  0x86   : > { %273 = vst [vmem:[#allocation3 + $0x70] sm:$0xff] %v5406_v0  ;;  %274 = vst [vmem:[#allocation3 + $0x78] sm:$0xff] %v5406_v0 }
  0x87   : > { %275 = vst [vmem:[#allocation3 + $0x80] sm:$0xff] %v5406_v0  ;;  %276 = vst [vmem:[#allocation3 + $0x88] sm:$0xff] %v5406_v0 }
  0x88   : > { %277 = vst [vmem:[#allocation3 + $0x90] sm:$0xff] %v5406_v0  ;;  %278 = vst [vmem:[#allocation3 + $0x98] sm:$0xff] %v5406_v0 }
  0x89   : > { %279 = vst [vmem:[#allocation3 + $0xa0] sm:$0xff] %v5406_v0  ;;  %280 = vst [vmem:[#allocation3 + $0xa8] sm:$0xff] %v5406_v0 }
  0x8a   : > { %281 = vst [vmem:[#allocation3 + $0xb0] sm:$0xff] %v5406_v0  ;;  %282 = vst [vmem:[#allocation3 + $0xb8] sm:$0xff] %v5406_v0 }
  0x8b   : > { %283 = vst [vmem:[#allocation3 + $0xc0] sm:$0xff] %v5406_v0  ;;  %284 = vst [vmem:[#allocation3 + $0xc8] sm:$0xff] %v5406_v0 }
  0x8c   : > { %285 = vst [vmem:[#allocation3 + $0xd0] sm:$0xff] %v5406_v0  ;;  %286 = vst [vmem:[#allocation3 + $0xd8] sm:$0xff] %v5406_v0 }
  0x8d   : > { %287 = vst [vmem:[#allocation3 + $0xe0] sm:$0xff] %v5406_v0  ;;  %288 = vst [vmem:[#allocation3 + $0xe8] sm:$0xff] %v5406_v0 }
  0x8e   : > { %289 = vst [vmem:[#allocation3 + $0xf0] sm:$0xff] %v5406_v0  ;;  %290 = vst [vmem:[#allocation3 + $0xf8] sm:$0xff] %v5406_v0 }
  0x8f   : > { %291 = vst [vmem:[#allocation3 + $0x100] sm:$0xff] %v5406_v0  ;;  %292 = vst [vmem:[#allocation3 + $0x108] sm:$0xff] %v5406_v0 }
  0x90   : > { %293 = vst [vmem:[#allocation3 + $0x110] sm:$0xff] %v5406_v0  ;;  %294 = vst [vmem:[#allocation3 + $0x118] sm:$0xff] %v5406_v0 }
  0x91   : > { %295 = vst [vmem:[#allocation3 + $0x120] sm:$0xff] %v5406_v0  ;;  %296 = vst [vmem:[#allocation3 + $0x128] sm:$0xff] %v5406_v0 }
  0x92   : > { %297 = vst [vmem:[#allocation3 + $0x130] sm:$0xff] %v5406_v0  ;;  %298 = vst [vmem:[#allocation3 + $0x138] sm:$0xff] %v5406_v0 }
  0x93   : > { %299 = vst [vmem:[#allocation3 + $0x140] sm:$0xff] %v5406_v0  ;;  %300 = vst [vmem:[#allocation3 + $0x148] sm:$0xff] %v5406_v0 }
  0x94   : > { %301 = vst [vmem:[#allocation3 + $0x150] sm:$0xff] %v5406_v0  ;;  %302 = vst [vmem:[#allocation3 + $0x158] sm:$0xff] %v5406_v0 }
  0x95   : > { %303 = vst [vmem:[#allocation3 + $0x160] sm:$0xff] %v5406_v0  ;;  %304 = vst [vmem:[#allocation3 + $0x168] sm:$0xff] %v5406_v0 }
  0x96   : > { %305 = vst [vmem:[#allocation3 + $0x170] sm:$0xff] %v5406_v0  ;;  %306 = vst [vmem:[#allocation3 + $0x178] sm:$0xff] %v5406_v0 }
  0x97   : > { %307 = vst [vmem:[#allocation3 + $0x180] sm:$0xff] %v5406_v0  ;;  %308 = vst [vmem:[#allocation3 + $0x188] sm:$0xff] %v5406_v0 }
  0x98   : > { %309 = vst [vmem:[#allocation3 + $0x190] sm:$0xff] %v5406_v0  ;;  %310 = vst [vmem:[#allocation3 + $0x198] sm:$0xff] %v5406_v0 }
  0x99   : > { %311 = vst [vmem:[#allocation3 + $0x1a0] sm:$0xff] %v5406_v0  ;;  %312 = vst [vmem:[#allocation3 + $0x1a8] sm:$0xff] %v5406_v0 }
  0x9a   : > { %313 = vst [vmem:[#allocation3 + $0x1b0] sm:$0xff] %v5406_v0  ;;  %314 = vst [vmem:[#allocation3 + $0x1b8] sm:$0xff] %v5406_v0 }
  0x9b   : > { %315 = vst [vmem:[#allocation3 + $0x1c0] sm:$0xff] %v5406_v0  ;;  %316 = vst [vmem:[#allocation3 + $0x1c8] sm:$0xff] %v5406_v0 }
  0x9c   : > { %317 = vst [vmem:[#allocation3 + $0x1d0] sm:$0xff] %v5406_v0  ;;  %318 = vst [vmem:[#allocation3 + $0x1d8] sm:$0xff] %v5406_v0 }
  0x9d   : > { %319 = vst [vmem:[#allocation3 + $0x1e0] sm:$0xff] %v5406_v0  ;;  %320 = vst [vmem:[#allocation3 + $0x1e8] sm:$0xff] %v5406_v0 }
  0x9e   : > { %321 = vst [vmem:[#allocation3 + $0x1f0] sm:$0xff] %v5406_v0  ;;  %322 = vst [vmem:[#allocation3 + $0x1f8] sm:$0xff] %v5406_v0 }
  0x9f   : > { %323 = vst [vmem:[#allocation3 + $0x200] sm:$0xff] %v5406_v0  ;;  %324 = vst [vmem:[#allocation3 + $0x208] sm:$0xff] %v5406_v0 }
  0xa0   : > { %325 = vst [vmem:[#allocation3 + $0x210] sm:$0xff] %v5406_v0  ;;  %326 = vst [vmem:[#allocation3 + $0x218] sm:$0xff] %v5406_v0 }
  0xa1   : > { %327 = vst [vmem:[#allocation3 + $0x220] sm:$0xff] %v5406_v0  ;;  %328 = vst [vmem:[#allocation3 + $0x228] sm:$0xff] %v5406_v0 }
  0xa2   : > { %329 = vst [vmem:[#allocation3 + $0x230] sm:$0xff] %v5406_v0  ;;  %330 = vst [vmem:[#allocation3 + $0x238] sm:$0xff] %v5406_v0 }
  0xa3   : > { %5290 = shalt.err (!%p5287_p9)  }
  0xa4   : > { %s5291_s3 = scalar_lea.vmem %s339_s8, 18432  ;;  %p5296_p2 = scmp.lt.s32.totalorder %s339_s8, %s339_s8 }
  0xa5   : > { %p5292_p10 = scmp.ne.s32.totalorder %s339_s8, %s5291_s3  ;;  %p5297_p4 = scmp.lt.s32.totalorder %s5291_s3, %s5291_s3 }
  0xa7   : > { %p5298_p11 = por %p5297_p4, %p5296_p2 }
  0xa9   : > { %p5299_p1 = pnand %p5298_p11, %p5292_p10 }
  0xab   : > { %5302 = shalt.err (!%p5299_p1)  }
  0xac   : > { %341 = dma.hbm_to_vmem [thread:$0]  %s7227_s1, 18432, %s339_s8, [#allocation6] }
  0xad   : > { %s5303_s10 = scalar_lea.hbm %s7228_s2, 18432 }
  0xae   : > { %p5304_p0 = scmp.ne.s32.totalorder %s7228_s2, %s5303_s10  ;;  %p5307_p7 = scmp.lt.u32.totalorder %s5303_s10, %s7228_s2 }
  0xb0   : > { %p5309_p6 = pnand %p5307_p7, %p5304_p0 }
  0xb2   : > { %5312 = shalt.err (!%p5309_p6)  }
  0xb3   : > { %s5313_s3 = scalar_lea.vmem %s351_s14, 18432  ;;  %p5318_p13 = scmp.lt.s32.totalorder %s351_s14, %s351_s14 }
  0xb4   : > { %p5314_p8 = scmp.ne.s32.totalorder %s351_s14, %s5313_s3  ;;  %p5319_p5 = scmp.lt.s32.totalorder %s5313_s3, %s5313_s3 }
  0xb6   : > { %p5320_p12 = por %p5319_p5, %p5318_p13 }
  0xb8   : > { %p5321_p3 = pnand %p5320_p12, %p5314_p8 }
  0xba   : > { %5324 = shalt.err (!%p5321_p3)  }
  0xbb   : > { %353 = dma.hbm_to_vmem [thread:$0]  %s7228_s2, 18432, %s351_s14, [#allocation6 + $0x1] }
  0xbc   : > { %5377 = dma.done.wait [#allocation6], 18432 }
  0xbd   : > { %5378 = vsyncadd [#allocation6], 4294948864 }
  0xbe   : > { %5379 = dma.done.wait [#allocation6 + $0x1], 18432 }
  0xbf   : > { %5380 = vsyncadd [#allocation6 + $0x1], 4294948864 }
  0xc0 PF: > { %v746_v1 = vld [vmem:[#allocation4] sm:$0xff]  ;;  %v747_v2 = vld [vmem:[#allocation4 + $0x8] sm:$0xff]  ;;  %v748_v3 = vld [vmem:[#allocation4 + $0x10] sm:$0xff]  ;;  %v7234_v4 = vmov 0.0|0.0   ;;  %v5768_v14 = vstv %s5579_s29  ;;  %s3970_s24 = sshll.u32 %s5458_s19, 12  ;;  %s3848_s29 = sshll.u32 %s5589_s12, 4  ;;  %s7180_s29 = int_to_ptr.vmem [resolvable:$true] %s3848_s29 }
  0xc1   : > { %4227 = vmatprep.subr.bf16.mxu0 %v7234_v4  ;;  %v4228_v5 = vpack.c.bf16 %v747_v2, %v746_v1  ;;  %v749_v6 = vld [vmem:[#allocation4 + $0x18] sm:$0xff]  ;;  %v750_v8 = vld [vmem:[#allocation4 + $0x20] sm:$0xff]  ;;  %v751_v9 = vld [vmem:[#allocation4 + $0x28] sm:$0xff]  ;;  %s3835_s19 = scalar_lea.sflag [#allocation9], %s5565_s6  ;;  %p7313_p10 = scmp.ne.s32.totalorder %s7269_s27, 0 }
  0xc2   : > { %v4231_v7 = vpack.c.bf16 %v749_v6, %v748_v3  ;;  %v4234_v10 = vpack.c.bf16 %v751_v9, %v750_v8  ;;  %v752_v11 = vld [vmem:[#allocation4 + $0x30] sm:$0xff]  ;;  %v753_v12 = vld [vmem:[#allocation4 + $0x38] sm:$0xff]  ;;  %v489_v13 = vld [vmem:[#allocation2 + $0x8] sm:$0xff] }
  0xc3   : > { %4229 = vmatpush1.bf16.msra.mxu0 %v4228_v5  ;;  %v4237_v15 = vpack.c.bf16 %v753_v12, %v752_v11  ;;  %955 = vmatprep.mubr.f32.mxu0 %v489_v13  ;;  %v754_v16 = vld [vmem:[#allocation4 + $0x40] sm:$0xff]  ;;  %v755_v17 = vld [vmem:[#allocation4 + $0x48] sm:$0xff]  ;;  %v361_v22 = vld [vmem:[%s5569_s11 + $0x10] sm:$0xff] }
  0xc4   : > { %4230 = vmatprep.subr.bf16.mxu0 %v7234_v4  ;;  %v359_v18 = vld [vmem:[%s5569_s11] sm:$0xff]  ;;  %v360_v20 = vld [vmem:[%s5569_s11 + $0x8] sm:$0xff]  ;;  %v4240_v23 = vpack.c.bf16 %v755_v17, %v754_v16  ;;  %v756_v24 = vld [vmem:[#allocation4 + $0x50] sm:$0xff]  ;;  %v5782_v25 = vadd.f32 %v5768_v14, %v361_v22 }
  0xc5   : > { %v5773_v19 = vadd.f32 %v5768_v14, %v359_v18  ;;  %v5777_v21 = vadd.f32 %v5768_v14, %v360_v20  ;;  %v362_v26 = vld [vmem:[%s5569_s11 + $0x18] sm:$0xff]  ;;  %v363_v27 = vld [vmem:[%s5569_s11 + $0x20] sm:$0xff]  ;;  %v364_v31 = vld [vmem:[%s5569_s11 + $0x28] sm:$0xff] }
  0xc6   : > { %v757_v28 = vld [vmem:[#allocation4 + $0x58] sm:$0xff]  ;;  %v5789_v29 = vadd.f32 %v5768_v14, %v362_v26  ;;  %v5792_v30 = vadd.f32 %v5768_v14, %v363_v27  ;;  %v365_v32 = vld [vmem:[%s5569_s11 + $0x30] sm:$0xff]  ;;  %427 = vst [vmem:[#allocation2 + $0x48] sm:$0xff] %v5782_v25  ;;  %v5798_v33 = vadd.f32 %v5768_v14, %v364_v31  ;;  %v367_v37 = vld [vmem:[%s5569_s11 + $0x40] sm:$0xff] }
  0xc7   : > { %4232 = vmatpush1.bf16.msra.mxu0 %v4231_v7  ;;  %425 = vst [vmem:[#allocation2 + $0x28] sm:$0xff] %v5773_v19  ;;  %426 = vst [vmem:[#allocation2 + $0x30] sm:$0xff] %v5777_v21  ;;  %v5801_v34 = vadd.f32 %v5768_v14, %v365_v32  ;;  %v366_v35 = vld [vmem:[%s5569_s11 + $0x38] sm:$0xff]  ;;  %v4243_v38 = vpack.c.bf16 %v757_v28, %v756_v24  ;;  %v758_v39 = vld [vmem:[#allocation4 + $0x60] sm:$0xff]  ;;  %v5813_v40 = vadd.f32 %v5768_v14, %v367_v37 }
  0xc8   : > { %4233 = vmatprep.subr.bf16.mxu0 %v7234_v4  ;;  %428 = vst [vmem:[#allocation2 + $0x50] sm:$0xff] %v5789_v29  ;;  %429 = vst [vmem:[#allocation2 + $0x68] sm:$0xff] %v5792_v30  ;;  %v5807_v36 = vadd.f32 %v5768_v14, %v366_v35  ;;  %v368_v41 = vld [vmem:[%s5569_s11 + $0x48] sm:$0xff]  ;;  %v369_v42 = vld [vmem:[%s5569_s11 + $0x50] sm:$0xff] }
  0xc9   : > { %430 = vst [vmem:[#allocation2 + $0x70] sm:$0xff] %v5798_v33  ;;  %431 = vst [vmem:[#allocation2 + $0x88] sm:$0xff] %v5801_v34  ;;  %v759_v43 = vld [vmem:[#allocation4 + $0x68] sm:$0xff]  ;;  %v5820_v44 = vadd.f32 %v5768_v14, %v368_v41  ;;  %v5823_v45 = vadd.f32 %v5768_v14, %v369_v42  ;;  %v370_v46 = vld [vmem:[%s5569_s11 + $0x58] sm:$0xff] }
  0xca   : > { %432 = vst [vmem:[#allocation2 + $0x90] sm:$0xff] %v5807_v36  ;;  %v371_v47 = vld [vmem:[%s5569_s11 + $0x60] sm:$0xff]  ;;  %433 = vst [vmem:[#allocation2 + $0xa8] sm:$0xff] %v5813_v40  ;;  %v5829_v48 = vadd.f32 %v5768_v14, %v370_v46  ;;  %v372_v50 = vld [vmem:[%s5569_s11 + $0x68] sm:$0xff]  ;;  %v4246_v53 = vpack.c.bf16 %v759_v43, %v758_v39 }
  0xcb   : > { %4235 = vmatpush1.bf16.msra.mxu0 %v4234_v10  ;;  %v5832_v49 = vadd.f32 %v5768_v14, %v371_v47  ;;  %434 = vst [vmem:[#allocation2 + $0xb0] sm:$0xff] %v5820_v44  ;;  %435 = vst [vmem:[#allocation2 + $0xc8] sm:$0xff] %v5823_v45  ;;  %v5838_v51 = vadd.f32 %v5768_v14, %v372_v50  ;;  %v373_v52 = vld [vmem:[%s5569_s11 + $0x70] sm:$0xff]  ;;  %v374_v55 = vld [vmem:[%s5569_s11 + $0x78] sm:$0xff] }
  0xcc   : > { %4236 = vmatprep.subr.bf16.mxu0 %v7234_v4  ;;  %436 = vst [vmem:[#allocation2 + $0xd0] sm:$0xff] %v5829_v48  ;;  %v5844_v54 = vadd.f32 %v5768_v14, %v373_v52  ;;  %v760_v56 = vld [vmem:[#allocation4 + $0x70] sm:$0xff]  ;;  %v761_v57 = vld [vmem:[#allocation4 + $0x78] sm:$0xff]  ;;  %v5850_v58 = vadd.f32 %v5768_v14, %v374_v55  ;;  %v375_v59 = vld [vmem:[%s5569_s11 + $0x80] sm:$0xff] }
  0xcd   : > { %437 = vst [vmem:[#allocation2 + $0xe8] sm:$0xff] %v5832_v49  ;;  %438 = vst [vmem:[#allocation2 + $0xf0] sm:$0xff] %v5838_v51  ;;  %v5855_v60 = vadd.f32 %v5768_v14, %v375_v59  ;;  %v376_v61 = vld [vmem:[%s5569_s11 + $0x88] sm:$0xff]  ;;  %v4249_v62 = vpack.c.bf16 %v761_v57, %v760_v56  ;;  %v377_v0 = vld [vmem:[%s5569_s11 + $0x90] sm:$0xff] }
  0xce   : > { %439 = vst [vmem:[#allocation2 + $0x108] sm:$0xff] %v5844_v54  ;;  %440 = vst [vmem:[#allocation2 + $0x110] sm:$0xff] %v5850_v58  ;;  %v5861_v63 = vadd.f32 %v5768_v14, %v376_v61  ;;  %v762_v1 = vld [vmem:[#allocation4 + $0x80] sm:$0xff]  ;;  %v763_v2 = vld [vmem:[#allocation4 + $0x88] sm:$0xff]  ;;  %v5866_v3 = vadd.f32 %v5768_v14, %v377_v0 }
  0xcf   : > { %4238 = vmatpush1.bf16.msra.mxu0 %v4237_v15  ;;  %441 = vst [vmem:[#allocation2 + $0x128] sm:$0xff] %v5855_v60  ;;  %v378_v5 = vld [vmem:[%s5569_s11 + $0x98] sm:$0xff]  ;;  %v379_v7 = vld [vmem:[%s5569_s11 + $0xa0] sm:$0xff]  ;;  %v4252_v9 = vpack.c.bf16 %v763_v2, %v762_v1  ;;  %v764_v10 = vld [vmem:[#allocation4 + $0x90] sm:$0xff] }
  0xd0   : > { %4239 = vmatprep.subr.bf16.mxu0 %v7234_v4  ;;  %442 = vst [vmem:[#allocation2 + $0x130] sm:$0xff] %v5861_v63  ;;  %v5871_v6 = vadd.f32 %v5768_v14, %v378_v5  ;;  %443 = vst [vmem:[#allocation2 + $0x148] sm:$0xff] %v5866_v3  ;;  %v5876_v8 = vadd.f32 %v5768_v14, %v379_v7  ;;  %v380_v11 = vld [vmem:[%s5569_s11 + $0xa8] sm:$0xff]  ;;  %v765_v12 = vld [vmem:[#allocation4 + $0x98] sm:$0xff] }
  0xd1   : > { %v5883_v13 = vadd.f32 %v5768_v14, %v380_v11  ;;  %v381_v15 = vld [vmem:[%s5569_s11 + $0xb0] sm:$0xff]  ;;  %v382_v16 = vld [vmem:[%s5569_s11 + $0xb8] sm:$0xff]  ;;  %v383_v20 = vld [vmem:[%s5569_s11 + $0xc0] sm:$0xff] }
  0xd2   : > { %444 = vst [vmem:[#allocation2 + $0x150] sm:$0xff] %v5871_v6  ;;  %445 = vst [vmem:[#allocation2 + $0x168] sm:$0xff] %v5876_v8  ;;  %v5888_v17 = vadd.f32 %v5768_v14, %v381_v15  ;;  %v5891_v18 = vadd.f32 %v5768_v14, %v382_v16  ;;  %v5896_v22 = vadd.f32 %v5768_v14, %v383_v20  ;;  %v384_v24 = vld [vmem:[%s5569_s11 + $0xc8] sm:$0xff]  ;;  %v766_v26 = vld [vmem:[#allocation4 + $0xa0] sm:$0xff] }
  0xd3   : > { %4241 = vmatpush1.bf16.msra.mxu0 %v4240_v23  ;;  %446 = vst [vmem:[#allocation2 + $0x170] sm:$0xff] %v5883_v13  ;;  %v4255_v23 = vpack.c.bf16 %v765_v12, %v764_v10  ;;  %v767_v27 = vld [vmem:[#allocation4 + $0xa8] sm:$0xff]  ;;  %v5904_v28 = vadd.f32 %v5768_v14, %v384_v24  ;;  %v385_v32 = vld [vmem:[%s5569_s11 + $0xd0] sm:$0xff]  ;;  %v769_v37 = vld [vmem:[#allocation4 + $0xb8] sm:$0xff] }
  0xd4   : > { %4242 = vmatprep.subr.bf16.mxu0 %v7234_v4  ;;  %447 = vst [vmem:[#allocation2 + $0x188] sm:$0xff] %v5888_v17  ;;  %448 = vst [vmem:[#allocation2 + $0x190] sm:$0xff] %v5891_v18  ;;  %v4258_v31 = vpack.c.bf16 %v767_v27, %v766_v26  ;;  %v768_v35 = vld [vmem:[#allocation4 + $0xb0] sm:$0xff]  ;;  %v386_v41 = vld [vmem:[%s5569_s11 + $0xd8] sm:$0xff] }
  0xd5   : > { %449 = vst [vmem:[#allocation2 + $0x1a8] sm:$0xff] %v5896_v22  ;;  %450 = vst [vmem:[#allocation2 + $0x1b0] sm:$0xff] %v5904_v28  ;;  %v4261_v39 = vpack.c.bf16 %v769_v37, %v768_v35  ;;  %v770_v42 = vld [vmem:[#allocation4 + $0xc0] sm:$0xff]  ;;  %v771_v43 = vld [vmem:[#allocation4 + $0xc8] sm:$0xff]  ;;  %v5916_v46 = vadd.f32 %v5768_v14, %v386_v41 }
  0xd6   : > { %v4264_v47 = vpack.c.bf16 %v771_v43, %v770_v42  ;;  %v387_v50 = vld [vmem:[%s5569_s11 + $0xe0] sm:$0xff]  ;;  %v772_v52 = vld [vmem:[#allocation4 + $0xd0] sm:$0xff]  ;;  %v388_v57 = vld [vmem:[%s5569_s11 + $0xe8] sm:$0xff] }
  0xd7   : > { %4244 = vmatpush1.bf16.msra.mxu0 %v4243_v38  ;;  %v5910_v38 = vadd.f32 %v5768_v14, %v385_v32  ;;  %452 = vst [vmem:[#allocation2 + $0x1d0] sm:$0xff] %v5916_v46  ;;  %v5922_v55 = vadd.f32 %v5768_v14, %v387_v50  ;;  %v774_v59 = vld [vmem:[#allocation4 + $0xe0] sm:$0xff]  ;;  %v775_v61 = vld [vmem:[#allocation4 + $0xe8] sm:$0xff]  ;;  %v776_v1 = vld [vmem:[#allocation4 + $0xf0] sm:$0xff] }
  0xd8   : > { %4245 = vmatprep.subr.bf16.mxu0 %v7234_v4  ;;  %v4270_v0 = vpack.c.bf16 %v775_v61, %v774_v59  ;;  %v777_v2 = vld [vmem:[#allocation4 + $0xf8] sm:$0xff]  ;;  %v778_v7 = vld [vmem:[#allocation4 + $0x100] sm:$0xff]  ;;  %v490_v12 = vld [vmem:[#allocation2 + $0x10] sm:$0xff] }
  0xd9   : > { %451 = vst [vmem:[#allocation2 + $0x1c8] sm:$0xff] %v5910_v38  ;;  %453 = vst [vmem:[#allocation2 + $0x1e8] sm:$0xff] %v5922_v55  ;;  %v4273_v5 = vpack.c.bf16 %v777_v2, %v776_v1  ;;  %v457_v10 = vld [vmem:[#allocation2 + $0x7] sm:$0xff]  ;;  %v780_v15 = vld [vmem:[#allocation4 + $0x110] sm:$0xff] }
  0xda   : > { %v781_v16 = vld [vmem:[#allocation4 + $0x118] sm:$0xff]  ;;  %v458_v20 = vld [vmem:[#allocation2 + $0xf] sm:$0xff]  ;;  %v782_v24 = vld [vmem:[#allocation4 + $0x120] sm:$0xff] }
  0xdb   : > { %4247 = vmatpush1.bf16.msra.mxu0 %v4246_v53  ;;  %v773_v53 = vld [vmem:[#allocation4 + $0xd8] sm:$0xff]  ;;  %v783_v26 = vld [vmem:[#allocation4 + $0x128] sm:$0xff]  ;;  %v784_v32 = vld [vmem:[#allocation4 + $0x130] sm:$0xff] }
  0xdc   : > { %4248 = vmatprep.subr.bf16.mxu0 %v7234_v4  ;;  %v4267_v56 = vpack.c.bf16 %v773_v53, %v772_v52  ;;  %v5936_v27 = vld [vmem:[#allocation2 + $0x27] sm:$0xff]  ;;  %v785_v35 = vld [vmem:[#allocation4 + $0x138] sm:$0xff]  ;;  %v5941_v37 = vld [vmem:[#allocation2 + $0x2f] sm:$0xff] }
  0xdd   : > { %v786_v41 = vld [vmem:[#allocation4 + $0x140] sm:$0xff]  ;;  %v789_v50 = vld [vmem:[#allocation4 + $0x158] sm:$0xff]  ;;  %v5954_v52 = vld [vmem:[#allocation2 + $0x4f] sm:$0xff] }
  0xde   : > { %v5946_v42 = vld [vmem:[#allocation2 + $0x47] sm:$0xff]  ;;  %v792_v61 = vld [vmem:[#allocation4 + $0x170] sm:$0xff] }
  0xdf   : > { %4250 = vmatpush1.bf16.msra.mxu0 %v4249_v62  ;;  %v5928_v62 = vadd.f32 %v5768_v14, %v388_v57  ;;  %v790_v53 = vld [vmem:[#allocation4 + $0x160] sm:$0xff] }
  0xe0   : > { %4251 = vmatprep.subr.bf16.mxu0 %v7234_v4  ;;  %v5959_v57 = vld [vmem:[#allocation2 + $0x67] sm:$0xff] }
  0xe1   : > { %454 = vst [vmem:[#allocation2 + $0x1f0] sm:$0xff] %v5928_v62  ;;  %v794_v2 = vld [vmem:[#allocation4 + $0x180] sm:$0xff] }
  0xe3   : > { %4253 = vmatpush1.bf16.msra.mxu0 %v4252_v9  ;;  %v779_v9 = vld [vmem:[#allocation4 + $0x108] sm:$0xff] }
  0xe4   : > { %4254 = vmatprep.subr.bf16.mxu0 %v7234_v4  ;;  %v4276_v11 = vpack.c.bf16 %v779_v9, %v778_v7  ;;  %v796_v9 = vld [vmem:[#allocation4 + $0x190] sm:$0xff] }
  0xe7   : > { %4256 = vmatpush1.bf16.msra.mxu0 %v4255_v23  ;;  %v4279_v23 = vpack.c.bf16 %v781_v16, %v780_v15  ;;  %v5979_v15 = vld [vmem:[#allocation2 + $0xa7] sm:$0xff] }
  0xe8   : > { %4257 = vmatprep.subr.bf16.mxu0 %v7234_v4 }
  0xeb   : > { %4259 = vmatpush1.bf16.msra.mxu0 %v4258_v31  ;;  %v4282_v31 = vpack.c.bf16 %v783_v26, %v782_v24  ;;  %v802_v26 = vld [vmem:[#allocation4 + $0x1c0] sm:$0xff] }
  0xec   : > { %4260 = vmatprep.subr.bf16.mxu0 %v7234_v4 }
  0xef   : > { %4262 = vmatpush1.bf16.msra.mxu0 %v4261_v39  ;;  %v4285_v39 = vpack.c.bf16 %v785_v35, %v784_v32  ;;  %v804_v35 = vld [vmem:[#allocation4 + $0x1d0] sm:$0xff] }
  0xf0   : > { %4263 = vmatprep.subr.bf16.mxu0 %v7234_v4 }
  0xf3   : > { %4265 = vmatpush1.bf16.msra.mxu0 %v4264_v47  ;;  %v5948_v47 = vld [vmem:[#allocation2 + $0x49] sm:$0xff] }
  0xf4   : > { %4266 = vmatprep.subr.bf16.mxu0 %v7234_v4  ;;  %4099 = vmatprep.mubr.f32.mxu1 %v5948_v47 }
  0xf7   : > { %4268 = vmatpush1.bf16.msra.mxu0 %v4267_v56  ;;  %v791_v56 = vld [vmem:[#allocation4 + $0x168] sm:$0xff] }
  0xf8   : > { %4269 = vmatprep.subr.bf16.mxu0 %v7234_v4  ;;  %v4294_v59 = vpack.c.bf16 %v791_v56, %v790_v53  ;;  %v6018_v56 = vld [vmem:[#allocation2 + $0x127] sm:$0xff] }
  0xfb   : > { %4271 = vmatpush1.bf16.msra.mxu0 %v4270_v0  ;;  %v5964_v0 = vld [vmem:[#allocation2 + $0x6f] sm:$0xff] }
  0xfc   : > { %4272 = vmatprep.subr.bf16.mxu0 %v7234_v4 }
  0xff   : > { %4274 = vmatpush1.bf16.msra.mxu0 %v4273_v5  ;;  %v5969_v5 = vld [vmem:[#allocation2 + $0x87] sm:$0xff] }
 0x100   : > { %4275 = vmatprep.subr.bf16.mxu0 %v7234_v4 }
 0x102   : > { %956 = vmatmul.mubr.f32.vlgmr.msra.gmra.mrb[0].mxu0 %v457_v10  ;;  %v5974_v10 = vld [vmem:[#allocation2 + $0x8f] sm:$0xff] }
 0x103   : > { %4277 = vmatpush1.bf16.msra.mxu0 %v4276_v11  ;;  %960 = vmatprep.mubr.f32.mxu0 %v490_v12  ;;  %v798_v12 = vld [vmem:[#allocation4 + $0x1a0] sm:$0xff] }
 0x104   : > { %4278 = vmatprep.subr.bf16.mxu0 %v7234_v4 }
 0x106   : > { %961 = vmatmul.mubr.f32.gmra.mrb[2].mxu0 %v458_v20  ;;  %v800_v20 = vld [vmem:[#allocation4 + $0x1b0] sm:$0xff] }
 0x107   : > { %965 = vmatprep.mubr.f32.mxu0 %v5773_v19  ;;  %4280 = vmatpush1.bf16.msra.mxu0 %v4279_v23  ;;  %v787_v19 = vld [vmem:[#allocation4 + $0x148] sm:$0xff] }
 0x108   : > { %4281 = vmatprep.subr.bf16.mxu0 %v7234_v4  ;;  %v4288_v43 = vpack.c.bf16 %v787_v19, %v786_v41  ;;  %v5984_v23 = vld [vmem:[#allocation2 + $0xaf] sm:$0xff]  ;;  %v806_v19 = vld [vmem:[#allocation4 + $0x1e0] sm:$0xff] }
 0x10a   : > { %966 = vmatmul.mubr.f32.gmra.mrb[4].mxu0 %v5936_v27 }
 0x10b   : > { %970 = vmatprep.mubr.f32.mxu0 %v5777_v21  ;;  %4283 = vmatpush1.bf16.msra.mxu0 %v4282_v31  ;;  %v788_v21 = vld [vmem:[#allocation4 + $0x150] sm:$0xff]  ;;  %v5989_v31 = vld [vmem:[#allocation2 + $0xc7] sm:$0xff] }
 0x10c   : > { %4284 = vmatprep.subr.bf16.mxu0 %v7234_v4 }
 0x10e   : > { %971 = vmatmul.mubr.f32.gmra.mrb[6].mxu0 %v5941_v37 }
 0x10f   : > { %975 = vmatprep.mubr.f32.mxu0 %v5782_v25  ;;  %4286 = vmatpush1.bf16.msra.mxu0 %v4285_v39  ;;  %v4291_v25 = vpack.c.bf16 %v789_v50, %v788_v21  ;;  %v5994_v39 = vld [vmem:[#allocation2 + $0xcf] sm:$0xff] }
 0x110   : > { %4287 = vmatprep.subr.bf16.mxu0 %v7234_v4  ;;  %v808_v50 = vld [vmem:[#allocation4 + $0x1f0] sm:$0xff] }
 0x112   : > { %976 = vmatmul.mubr.f32.gmra.mrb[8].mxu0 %v5946_v42 }
 0x113   : > { %980 = vmatprep.mubr.f32.mxu0 %v5789_v29  ;;  %4289 = vmatpush1.bf16.msra.mxu0 %v4288_v43  ;;  %v793_v29 = vld [vmem:[#allocation4 + $0x178] sm:$0xff]  ;;  %v5999_v43 = vld [vmem:[#allocation2 + $0xe7] sm:$0xff] }
 0x114   : > { %4290 = vmatprep.subr.bf16.mxu0 %v7234_v4  ;;  %v4297_v1 = vpack.c.bf16 %v793_v29, %v792_v61 }
 0x116   : > { %981 = vmatmul.mubr.f32.gmra.mrb[10].mxu0 %v5954_v52 }
 0x117   : > { %985 = vmatprep.mubr.f32.mxu0 %v5792_v30  ;;  %4292 = vmatpush1.bf16.msra.mxu0 %v4291_v25  ;;  %v795_v30 = vld [vmem:[#allocation4 + $0x188] sm:$0xff] }
 0x118   : > { %4293 = vmatprep.subr.bf16.mxu0 %v7234_v4  ;;  %v4300_v7 = vpack.c.bf16 %v795_v30, %v794_v2  ;;  %v6004_v25 = vld [vmem:[#allocation2 + $0xef] sm:$0xff] }
 0x119   : > { %v811_v2 = vld [vmem:[#allocation4 + $0x208] sm:$0xff] }
 0x11a   : > { %986 = vmatmul.mubr.f32.gmra.mrb[12].mxu0 %v5959_v57 }
 0x11b   : > { %990 = vmatprep.mubr.f32.mxu0 %v5798_v33  ;;  %4295 = vmatpush1.bf16.msra.mxu0 %v4294_v59  ;;  %v797_v33 = vld [vmem:[#allocation4 + $0x198] sm:$0xff]  ;;  %v6026_v59 = vld [vmem:[#allocation2 + $0x147] sm:$0xff] }
 0x11c   : > { %4296 = vmatprep.subr.bf16.mxu0 %v7234_v4  ;;  %v4303_v11 = vpack.c.bf16 %v797_v33, %v796_v9  ;;  %v813_v9 = vld [vmem:[#allocation4 + $0x218] sm:$0xff] }
 0x11e   : > { %991 = vmatmul.mubr.f32.gmra.mrb[14].mxu0 %v5964_v0 }
 0x11f   : > { %995 = vmatprep.mubr.f32.mxu0 %v5801_v34  ;;  %4298 = vmatpush1.bf16.msra.mxu0 %v4297_v1  ;;  %v799_v34 = vld [vmem:[#allocation4 + $0x1a8] sm:$0xff] }
 0x120   : > { %4299 = vmatprep.subr.bf16.mxu0 %v7234_v4  ;;  %v4306_v16 = vpack.c.bf16 %v799_v34, %v798_v12  ;;  %v6080_v1 = vld [vmem:[#allocation2 + $0x1ef] sm:$0xff] }
 0x121   : > { %v6087_v12 = vld [vmem:[#allocation2 + $0x29] sm:$0xff] }
 0x122   : > { %996 = vmatmul.mubr.f32.gmra.mrb[16].mxu0 %v5969_v5  ;;  %v816_v34 = vld [vmem:[#allocation4 + $0x230] sm:$0xff] }
 0x123   : > { %1000 = vmatprep.mubr.f32.mxu0 %v5807_v36  ;;  %4301 = vmatpush1.bf16.msra.mxu0 %v4300_v7  ;;  %v801_v36 = vld [vmem:[#allocation4 + $0x1b8] sm:$0xff]  ;;  %v812_v7 = vld [vmem:[#allocation4 + $0x210] sm:$0xff] }
 0x124   : > { %4302 = vmatprep.subr.bf16.mxu0 %v7234_v4  ;;  %v4309_v24 = vpack.c.bf16 %v801_v36, %v800_v20  ;;  %v4327_v33 = vpack.c.bf16 %v813_v9, %v812_v7  ;;  %v818_v36 = vld [vmem:[#allocation4 + $0x240] sm:$0xff]  ;;  %v832_v7 = vld [vmem:[#allocation4 + $0x2b0] sm:$0xff] }
 0x125   : > { %v6130_v9 = vld [vmem:[#allocation2 + $0xb1] sm:$0xff] }
 0x126   : > { %1001 = vmatmul.mubr.f32.gmra.mrb[18].mxu0 %v5974_v10 }
 0x127   : > { %1005 = vmatprep.mubr.f32.mxu0 %v5813_v40  ;;  %4304 = vmatpush1.bf16.msra.mxu0 %v4303_v11  ;;  %v803_v40 = vld [vmem:[#allocation4 + $0x1c8] sm:$0xff] }
 0x128   : > { %4305 = vmatprep.subr.bf16.mxu0 %v7234_v4  ;;  %v4312_v32 = vpack.c.bf16 %v803_v40, %v802_v26  ;;  %v815_v11 = vld [vmem:[#allocation4 + $0x228] sm:$0xff]  ;;  %v820_v26 = vld [vmem:[#allocation4 + $0x250] sm:$0xff]  ;;  %v821_v40 = vld [vmem:[#allocation4 + $0x258] sm:$0xff] }
 0x12a   : > { %1006 = vmatmul.mubr.f32.gmra.mrb[20].mxu0 %v5979_v15 }
 0x12b   : > { %1010 = vmatprep.mubr.f32.mxu0 %v5820_v44  ;;  %4307 = vmatpush1.bf16.msra.mxu0 %v4306_v16  ;;  %v805_v44 = vld [vmem:[#allocation4 + $0x1d8] sm:$0xff] }
 0x12c   : > { %4308 = vmatprep.subr.bf16.mxu0 %v7234_v4  ;;  %v4315_v41 = vpack.c.bf16 %v805_v44, %v804_v35  ;;  %v817_v16 = vld [vmem:[#allocation4 + $0x238] sm:$0xff]  ;;  %v822_v35 = vld [vmem:[#allocation4 + $0x260] sm:$0xff]  ;;  %v823_v44 = vld [vmem:[#allocation4 + $0x268] sm:$0xff] }
 0x12d   : > { %v4333_v20 = vpack.c.bf16 %v817_v16, %v816_v34  ;;  %v6140_v34 = vld [vmem:[#allocation2 + $0xd1] sm:$0xff] }
 0x12e   : > { %1011 = vmatmul.mubr.f32.gmra.mrb[22].mxu0 %v5984_v23 }
 0x12f   : > { %1015 = vmatprep.mubr.f32.mxu0 %v5823_v45  ;;  %4310 = vmatpush1.bf16.msra.mxu0 %v4309_v24  ;;  %v807_v45 = vld [vmem:[#allocation4 + $0x1e8] sm:$0xff] }
 0x130   : > { %4311 = vmatprep.subr.bf16.mxu0 %v7234_v4  ;;  %v4318_v21 = vpack.c.bf16 %v807_v45, %v806_v19  ;;  %v824_v19 = vld [vmem:[#allocation4 + $0x270] sm:$0xff] }
 0x131   : > { %v6110_v45 = vld [vmem:[#allocation2 + $0x71] sm:$0xff] }
 0x132   : > { %1016 = vmatmul.mubr.f32.gmra.mrb[24].mxu0 %v5989_v31 }
 0x133   : > { %1020 = vmatprep.mubr.f32.mxu0 %v5829_v48  ;;  %4313 = vmatpush1.bf16.msra.mxu0 %v4312_v32  ;;  %v809_v48 = vld [vmem:[#allocation4 + $0x1f8] sm:$0xff]  ;;  %v4339_v32 = vpack.c.bf16 %v821_v40, %v820_v26 }
 0x134   : > { %4314 = vmatprep.subr.bf16.mxu0 %v7234_v4  ;;  %v4321_v53 = vpack.c.bf16 %v809_v48, %v808_v50  ;;  %v826_v50 = vld [vmem:[#allocation4 + $0x280] sm:$0xff]  ;;  %v6115_v48 = vld [vmem:[#allocation2 + $0x89] sm:$0xff]  ;;  %v6150_v26 = vld [vmem:[#allocation2 + $0xf1] sm:$0xff] }
 0x136   : > { %1021 = vmatmul.mubr.f32.gmra.mrb[26].mxu0 %v5994_v39 }
 0x137   : > { %1025 = vmatprep.mubr.f32.mxu0 %v5832_v49  ;;  %4316 = vmatpush1.bf16.msra.mxu0 %v4315_v41  ;;  %v6009_v49 = vld [vmem:[#allocation2 + $0x107] sm:$0xff]  ;;  %v4342_v41 = vpack.c.bf16 %v823_v44, %v822_v35 }
 0x138   : > { %4317 = vmatprep.subr.bf16.mxu0 %v7234_v4  ;;  %v6172_v35 = vld [vmem:[#allocation2 + $0x149] sm:$0xff] }
 0x139   : > { %v875_v44 = vld [vmem:[#allocation4 + $0x408] sm:$0xff] }
 0x13a   : > { %1026 = vmatmul.mubr.f32.gmra.mrb[28].mxu0 %v5999_v43 }
 0x13b   : > { %1030 = vmatprep.mubr.f32.mxu0 %v5838_v51  ;;  %4319 = vmatpush1.bf16.msra.mxu0 %v4318_v21  ;;  %v6014_v51 = vld [vmem:[#allocation2 + $0x10f] sm:$0xff] }
 0x13c   : > { %4320 = vmatprep.subr.bf16.mxu0 %v7234_v4 }
 0x13e   : > { %1031 = vmatmul.mubr.f32.gmra.mrb[30].mxu0 %v6004_v25 }
 0x13f   : > { %1035 = vmatprep.mubr.f32.mxu0 %v5844_v54  ;;  %4322 = vmatpush1.bf16.msra.mxu0 %v4321_v53  ;;  %v6022_v54 = vld [vmem:[#allocation2 + $0x12f] sm:$0xff] }
 0x140   : > { %4323 = vmatprep.subr.bf16.mxu0 %v7234_v4 }
 0x142   : > { %1036 = vmatmul.mubr.f32.gmra.mrb[32].mxu0 %v6009_v49 }
 0x143   : > { %1040 = vmatprep.mubr.f32.mxu0 %v5850_v58  ;;  %v6030_v58 = vld [vmem:[#allocation2 + $0x14f] sm:$0xff] }
 0x146   : > { %1041 = vmatmul.mubr.f32.gmra.mrb[34].mxu0 %v6014_v51 }
 0x147   : > { %1045 = vmatprep.mubr.f32.mxu0 %v5855_v60  ;;  %v6034_v60 = vld [vmem:[#allocation2 + $0x167] sm:$0xff] }
 0x14a   : > { %1046 = vmatmul.mubr.f32.gmra.mrb[36].mxu0 %v6018_v56 }
 0x14b   : > { %1050 = vmatprep.mubr.f32.mxu0 %v5861_v63  ;;  %v6038_v63 = vld [vmem:[#allocation2 + $0x16f] sm:$0xff] }
 0x14e   : > { %1051 = vmatmul.mubr.f32.gmra.mrb[38].mxu0 %v6022_v54 }
 0x14f   : > { %1055 = vmatprep.mubr.f32.mxu0 %v5866_v3  ;;  %v6042_v3 = vld [vmem:[#allocation2 + $0x187] sm:$0xff] }
 0x152   : > { %1056 = vmatmul.mubr.f32.gmra.mrb[40].mxu0 %v6026_v59 }
 0x153   : > { %1060 = vmatprep.mubr.f32.mxu0 %v5871_v6  ;;  %v6046_v6 = vld [vmem:[#allocation2 + $0x18f] sm:$0xff] }
 0x156   : > { %1061 = vmatmul.mubr.f32.gmra.mrb[42].mxu0 %v6030_v58 }
 0x157   : > { %1065 = vmatprep.mubr.f32.mxu0 %v5876_v8  ;;  %v6050_v8 = vld [vmem:[#allocation2 + $0x1a7] sm:$0xff] }
 0x15a   : > { %1066 = vmatmul.mubr.f32.gmra.mrb[44].mxu0 %v6034_v60 }
 0x15b   : > { %1070 = vmatprep.mubr.f32.mxu0 %v5883_v13  ;;  %v6054_v13 = vld [vmem:[#allocation2 + $0x1af] sm:$0xff] }
 0x15e   : > { %1071 = vmatmul.mubr.f32.gmra.mrb[46].mxu0 %v6038_v63 }
 0x15f   : > { %1075 = vmatprep.mubr.f32.mxu0 %v5888_v17  ;;  %v389_v17 = vld [vmem:[%s5569_s11 + $0xf0] sm:$0xff] }
 0x160   : > { %v6062_v61 = vadd.f32 %v5768_v14, %v389_v17  ;;  %v828_v17 = vld [vmem:[#allocation4 + $0x290] sm:$0xff] }
 0x162   : > { %1076 = vmatmul.mubr.f32.gmra.mrb[48].mxu0 %v6042_v3  ;;  %455 = vst [vmem:[#allocation2 + $0x208] sm:$0xff] %v6062_v61 }
 0x163   : > { %1080 = vmatprep.mubr.f32.mxu0 %v5891_v18  ;;  %v6059_v18 = vld [vmem:[#allocation2 + $0x1c7] sm:$0xff] }
 0x166   : > { %1081 = vmatmul.mubr.f32.gmra.mrb[50].mxu0 %v6046_v6 }
 0x167   : > { %1085 = vmatprep.mubr.f32.mxu0 %v5896_v22  ;;  %v390_v22 = vld [vmem:[%s5569_s11 + $0xf8] sm:$0xff] }
 0x168   : > { %v6071_v29 = vadd.f32 %v5768_v14, %v390_v22  ;;  %v521_v14 = vld [vmem:[#allocation2 + $0x9] sm:$0xff]  ;;  %v6120_v22 = vld [vmem:[#allocation2 + $0x91] sm:$0xff] }
 0x16a   : > { %1086 = vmatmul.mubr.f32.gmra.mrb[52].mxu0 %v6050_v8  ;;  %456 = vst [vmem:[#allocation2 + $0x210] sm:$0xff] %v6071_v29 }
 0x16b   : > { %1090 = vmatprep.mubr.f32.mxu0 %v5904_v28  ;;  %v6068_v28 = vld [vmem:[#allocation2 + $0x1cf] sm:$0xff] }
 0x16e   : > { %1091 = vmatmul.mubr.f32.gmra.mrb[54].mxu0 %v6054_v13 }
 0x16f   : > { %1095 = vmatprep.mubr.f32.mxu0 %v5910_v38  ;;  %v6076_v38 = vld [vmem:[#allocation2 + $0x1e7] sm:$0xff] }
 0x172   : > { %1096 = vmatmul.mubr.f32.gmra.mrb[56].mxu0 %v6059_v18 }
 0x173   : > { %1100 = vmatprep.mubr.f32.mxu0 %v5916_v46  ;;  %v810_v46 = vld [vmem:[#allocation4 + $0x200] sm:$0xff] }
 0x174   : > { %v4324_v30 = vpack.c.bf16 %v811_v2, %v810_v46  ;;  %v830_v2 = vld [vmem:[#allocation4 + $0x2a0] sm:$0xff] }
 0x176   : > { %1101 = vmatmul.mubr.f32.gmra.mrb[58].mxu0 %v6068_v28 }
 0x177   : > { %1105 = vmatprep.mubr.f32.mxu0 %v5922_v55  ;;  %v522_v55 = vld [vmem:[#allocation2 + $0x11] sm:$0xff] }
 0x17a   : > { %1106 = vmatmul.mubr.f32.gmra.mrb[60].mxu0 %v6076_v38 }
 0x17b   : > { %1110 = vmatprep.mubr.f32.mxu0 %v5928_v62  ;;  %v814_v62 = vld [vmem:[#allocation4 + $0x220] sm:$0xff] }
 0x17e   : > { %1111 = vmatmul.mubr.f32.gmra.mrb[62].mxu0 %v6080_v1 }
 0x17f   : > { %1180 = vmatprep.mubr.f32.mxu0 %v5936_v27  ;;  %v4330_v27 = vpack.c.bf16 %v815_v11, %v814_v62  ;;  %v6135_v62 = vld [vmem:[#allocation2 + $0xc9] sm:$0xff] }
 0x182   : > { %1181 = vmatmul.mubr.f32.vlgmr.msra.gmra.mrb[0].mxu0 %v521_v14  ;;  %v6125_v14 = vld [vmem:[#allocation2 + $0xa9] sm:$0xff] }
 0x183   : > { %4325 = vmatpush1.bf16.msra.mxu0 %v4324_v30  ;;  %1185 = vmatprep.mubr.f32.mxu0 %v5941_v37  ;;  %v6092_v37 = vld [vmem:[#allocation2 + $0x31] sm:$0xff] }
 0x184   : > { %4326 = vmatprep.subr.bf16.mxu0 %v7234_v4 }
 0x186   : > { %1186 = vmatmul.mubr.f32.gmra.mrb[2].mxu0 %v522_v55 }
 0x187   : > { %1190 = vmatprep.mubr.f32.mxu0 %v5946_v42  ;;  %4328 = vmatpush1.bf16.msra.mxu0 %v4327_v33  ;;  %v819_v42 = vld [vmem:[#allocation4 + $0x248] sm:$0xff]  ;;  %v834_v33 = vld [vmem:[#allocation4 + $0x2c0] sm:$0xff] }
 0x188   : > { %4329 = vmatprep.subr.bf16.mxu0 %v7234_v4  ;;  %v4336_v24 = vpack.c.bf16 %v819_v42, %v818_v36  ;;  %v6145_v36 = vld [vmem:[#allocation2 + $0xe9] sm:$0xff] }
 0x18a   : > { %1191 = vmatmul.mubr.f32.gmra.mrb[4].mxu0 %v6087_v12 }
 0x18b   : > { %1195 = vmatprep.mubr.f32.mxu0 %v5954_v52  ;;  %4331 = vmatpush1.bf16.msra.mxu0 %v4330_v27  ;;  %v6100_v52 = vld [vmem:[#allocation2 + $0x51] sm:$0xff] }
 0x18c   : > { %4332 = vmatprep.subr.bf16.mxu0 %v7234_v4  ;;  %v836_v27 = vld [vmem:[#allocation4 + $0x2d0] sm:$0xff] }
 0x18e   : > { %1196 = vmatmul.mubr.f32.gmra.mrb[6].mxu0 %v6092_v37 }
 0x18f   : > { %1200 = vmatprep.mubr.f32.mxu0 %v5959_v57  ;;  %4334 = vmatpush1.bf16.msra.mxu0 %v4333_v20  ;;  %v6105_v57 = vld [vmem:[#allocation2 + $0x69] sm:$0xff]  ;;  %v838_v20 = vld [vmem:[#allocation4 + $0x2e0] sm:$0xff] }
 0x190   : > { %4335 = vmatprep.subr.bf16.mxu0 %v7234_v4 }
 0x192   : > { %1201 = vmatmul.mubr.f32.gmra.mrb[8].mxu0 %v5948_v47 }
 0x193   : > { %1205 = vmatprep.mubr.f32.mxu0 %v5964_v0  ;;  %4337 = vmatpush1.bf16.msra.mxu0 %v4336_v24  ;;  %v825_v0 = vld [vmem:[#allocation4 + $0x278] sm:$0xff]  ;;  %v840_v24 = vld [vmem:[#allocation4 + $0x2f0] sm:$0xff] }
 0x194   : > { %4338 = vmatprep.subr.bf16.mxu0 %v7234_v4  ;;  %v4345_v21 = vpack.c.bf16 %v825_v0, %v824_v19  ;;  %v877_v19 = vld [vmem:[#allocation4 + $0x418] sm:$0xff] }
 0x196   : > { %1206 = vmatmul.mubr.f32.gmra.mrb[10].mxu0 %v6100_v52 }
 0x197   : > { %1210 = vmatprep.mubr.f32.mxu0 %v5969_v5  ;;  %4340 = vmatpush1.bf16.msra.mxu0 %v4339_v32  ;;  %v827_v5 = vld [vmem:[#allocation4 + $0x288] sm:$0xff] }
 0x198   : > { %4341 = vmatprep.subr.bf16.mxu0 %v7234_v4  ;;  %v4348_v53 = vpack.c.bf16 %v827_v5, %v826_v50  ;;  %v6164_v32 = vld [vmem:[#allocation2 + $0x129] sm:$0xff] }
 0x199   : > { %v879_v50 = vld [vmem:[#allocation4 + $0x428] sm:$0xff] }
 0x19a   : > { %1211 = vmatmul.mubr.f32.gmra.mrb[12].mxu0 %v6105_v57 }
 0x19b   : > { %1215 = vmatprep.mubr.f32.mxu0 %v5974_v10  ;;  %4343 = vmatpush1.bf16.msra.mxu0 %v4342_v41  ;;  %v829_v10 = vld [vmem:[#allocation4 + $0x298] sm:$0xff] }
 0x19c   : > { %4344 = vmatprep.subr.bf16.mxu0 %v7234_v4  ;;  %v4351_v46 = vpack.c.bf16 %v829_v10, %v828_v17  ;;  %v881_v17 = vld [vmem:[#allocation4 + $0x438] sm:$0xff] }
 0x19e   : > { %1216 = vmatmul.mubr.f32.gmra.mrb[14].mxu0 %v6110_v45 }
 0x19f   : > { %1220 = vmatprep.mubr.f32.mxu0 %v5979_v15  ;;  %4346 = vmatpush1.bf16.msra.mxu0 %v4345_v21  ;;  %v831_v15 = vld [vmem:[#allocation4 + $0x2a8] sm:$0xff]  ;;  %v878_v21 = vld [vmem:[#allocation4 + $0x420] sm:$0xff] }
 0x1a0   : > { %4347 = vmatprep.subr.bf16.mxu0 %v7234_v4  ;;  %v4354_v30 = vpack.c.bf16 %v831_v15, %v830_v2  ;;  %v4427_v5 = vpack.c.bf16 %v879_v50, %v878_v21  ;;  %v883_v2 = vld [vmem:[#allocation4 + $0x448] sm:$0xff]  ;;  %v849_v21 = vld [vmem:[#allocation4 + $0x338] sm:$0xff] }
 0x1a2   : > { %1221 = vmatmul.mubr.f32.gmra.mrb[16].mxu0 %v6115_v48 }
 0x1a3   : > { %1225 = vmatprep.mubr.f32.mxu0 %v5984_v23  ;;  %4349 = vmatpush1.bf16.msra.mxu0 %v4348_v53  ;;  %v833_v23 = vld [vmem:[#allocation4 + $0x2b8] sm:$0xff]  ;;  %v880_v53 = vld [vmem:[#allocation4 + $0x430] sm:$0xff] }
 0x1a4   : > { %4350 = vmatprep.subr.bf16.mxu0 %v7234_v4  ;;  %v4357_v55 = vpack.c.bf16 %v833_v23, %v832_v7  ;;  %v4431_v10 = vpack.c.bf16 %v881_v17, %v880_v53  ;;  %v885_v7 = vld [vmem:[#allocation4 + $0x458] sm:$0xff]  ;;  %v6210_v23 = vld [vmem:[#allocation2 + $0x207] sm:$0xff]  ;;  %v5175_v53 = vld [vmem:[#allocation2 + $0x50] sm:$0xff] }
 0x1a6   : > { %1226 = vmatmul.mubr.f32.gmra.mrb[18].mxu0 %v6120_v22 }
 0x1a7   : > { %1230 = vmatprep.mubr.f32.mxu0 %v5989_v31  ;;  %4352 = vmatpush1.bf16.msra.mxu0 %v4351_v46  ;;  %v835_v31 = vld [vmem:[#allocation4 + $0x2c8] sm:$0xff]  ;;  %v882_v46 = vld [vmem:[#allocation4 + $0x440] sm:$0xff] }
 0x1a8   : > { %4353 = vmatprep.subr.bf16.mxu0 %v7234_v4  ;;  %v4360_v11 = vpack.c.bf16 %v835_v31, %v834_v33  ;;  %v4435_v15 = vpack.c.bf16 %v883_v2, %v882_v46  ;;  %v886_v33 = vld [vmem:[#allocation4 + $0x460] sm:$0xff]  ;;  %v887_v31 = vld [vmem:[#allocation4 + $0x468] sm:$0xff] }
 0x1a9   : > { %v5176_v46 = vld [vmem:[#allocation2 + $0x68] sm:$0xff] }
 0x1aa   : > { %1231 = vmatmul.mubr.f32.gmra.mrb[20].mxu0 %v6125_v14 }
 0x1ab   : > { %1235 = vmatprep.mubr.f32.mxu0 %v5994_v39  ;;  %4355 = vmatpush1.bf16.msra.mxu0 %v4354_v30  ;;  %v837_v39 = vld [vmem:[#allocation4 + $0x2d8] sm:$0xff]  ;;  %v884_v30 = vld [vmem:[#allocation4 + $0x450] sm:$0xff] }
 0x1ac   : > { %4356 = vmatprep.subr.bf16.mxu0 %v7234_v4  ;;  %v4363_v16 = vpack.c.bf16 %v837_v39, %v836_v27  ;;  %v6220_v27 = vld [vmem:[#allocation2 + $0x1f1] sm:$0xff] }
 0x1ad   : > { %v888_v39 = vld [vmem:[#allocation4 + $0x470] sm:$0xff] }
 0x1ae   : > { %1236 = vmatmul.mubr.f32.gmra.mrb[22].mxu0 %v6130_v9 }
 0x1af   : > { %1240 = vmatprep.mubr.f32.mxu0 %v5999_v43  ;;  %4358 = vmatpush1.bf16.msra.mxu0 %v4357_v55  ;;  %v839_v43 = vld [vmem:[#allocation4 + $0x2e8] sm:$0xff]  ;;  %v4439_v55 = vpack.c.bf16 %v885_v7, %v884_v30  ;;  %v5177_v30 = vld [vmem:[#allocation2 + $0x70] sm:$0xff] }
 0x1b0   : > { %4359 = vmatprep.subr.bf16.mxu0 %v7234_v4  ;;  %v4366_v42 = vpack.c.bf16 %v839_v43, %v838_v20  ;;  %v842_v20 = vld [vmem:[#allocation4 + $0x300] sm:$0xff]  ;;  %v843_v43 = vld [vmem:[#allocation4 + $0x308] sm:$0xff] }
 0x1b2   : > { %1241 = vmatmul.mubr.f32.gmra.mrb[24].mxu0 %v6135_v62 }
 0x1b3   : > { %1245 = vmatprep.mubr.f32.mxu0 %v6004_v25  ;;  %4361 = vmatpush1.bf16.msra.mxu0 %v4360_v11  ;;  %v841_v25 = vld [vmem:[#allocation4 + $0x2f8] sm:$0xff]  ;;  %v6216_v11 = vld [vmem:[#allocation2 + $0x20f] sm:$0xff] }
 0x1b4   : > { %4362 = vmatprep.subr.bf16.mxu0 %v7234_v4  ;;  %v4369_v40 = vpack.c.bf16 %v841_v25, %v840_v24  ;;  %v4372_v24 = vpack.c.bf16 %v843_v43, %v842_v20  ;;  %v844_v25 = vld [vmem:[#allocation4 + $0x310] sm:$0xff]  ;;  %v5180_v43 = vld [vmem:[#allocation2 + $0xa8] sm:$0xff] }
 0x1b5   : > { %v860_v20 = vld [vmem:[#allocation4 + $0x390] sm:$0xff] }
 0x1b6   : > { %1246 = vmatmul.mubr.f32.gmra.mrb[26].mxu0 %v6140_v34 }
 0x1b7   : > { %1250 = vmatprep.mubr.f32.mxu0 %v6009_v49  ;;  %4364 = vmatpush1.bf16.msra.mxu0 %v4363_v16  ;;  %v6155_v49 = vld [vmem:[#allocation2 + $0x109] sm:$0xff]  ;;  %v889_v16 = vld [vmem:[#allocation4 + $0x478] sm:$0xff] }
 0x1b8   : > { %4365 = vmatprep.subr.bf16.mxu0 %v7234_v4 }
 0x1ba   : > { %1251 = vmatmul.mubr.f32.gmra.mrb[28].mxu0 %v6145_v36 }
 0x1bb   : > { %1255 = vmatprep.mubr.f32.mxu0 %v6014_v51  ;;  %4367 = vmatpush1.bf16.msra.mxu0 %v4366_v42  ;;  %v6160_v51 = vld [vmem:[#allocation2 + $0x111] sm:$0xff]  ;;  %v4447_v42 = vpack.c.bf16 %v889_v16, %v888_v39 }
 0x1bc   : > { %4368 = vmatprep.subr.bf16.mxu0 %v7234_v4  ;;  %v5179_v39 = vld [vmem:[#allocation2 + $0x90] sm:$0xff] }
 0x1be   : > { %1256 = vmatmul.mubr.f32.gmra.mrb[30].mxu0 %v6150_v26 }
 0x1bf   : > { %1260 = vmatprep.mubr.f32.mxu0 %v6018_v56  ;;  %4370 = vmatpush1.bf16.msra.mxu0 %v4369_v40  ;;  %v6168_v56 = vld [vmem:[#allocation2 + $0x131] sm:$0xff] }
 0x1c0   : > { %4371 = vmatprep.subr.bf16.mxu0 %v7234_v4  ;;  %v845_v40 = vld [vmem:[#allocation4 + $0x318] sm:$0xff] }
 0x1c2   : > { %1261 = vmatmul.mubr.f32.gmra.mrb[32].mxu0 %v6155_v49 }
 0x1c3   : > { %1265 = vmatprep.mubr.f32.mxu0 %v6022_v54  ;;  %v6176_v54 = vld [vmem:[#allocation2 + $0x151] sm:$0xff] }
 0x1c6   : > { %1266 = vmatmul.mubr.f32.gmra.mrb[34].mxu0 %v6160_v51 }
 0x1c7   : > { %1270 = vmatprep.mubr.f32.mxu0 %v6026_v59  ;;  %v6180_v59 = vld [vmem:[#allocation2 + $0x169] sm:$0xff] }
 0x1ca   : > { %1271 = vmatmul.mubr.f32.gmra.mrb[36].mxu0 %v6164_v32 }
 0x1cb   : > { %1275 = vmatprep.mubr.f32.mxu0 %v6030_v58  ;;  %v6184_v58 = vld [vmem:[#allocation2 + $0x171] sm:$0xff] }
 0x1ce   : > { %1276 = vmatmul.mubr.f32.gmra.mrb[38].mxu0 %v6168_v56 }
 0x1cf   : > { %1280 = vmatprep.mubr.f32.mxu0 %v6034_v60  ;;  %v6188_v60 = vld [vmem:[#allocation2 + $0x189] sm:$0xff] }
 0x1d2   : > { %1281 = vmatmul.mubr.f32.gmra.mrb[40].mxu0 %v6172_v35 }
 0x1d3   : > { %1285 = vmatprep.mubr.f32.mxu0 %v6038_v63  ;;  %v874_v63 = vld [vmem:[#allocation4 + $0x400] sm:$0xff] }
 0x1d4   : > { %v4419_v41 = vpack.c.bf16 %v875_v44, %v874_v63  ;;  %v5172_v63 = vld [vmem:[#allocation2 + $0x28] sm:$0xff]  ;;  %v4375_v44 = vpack.c.bf16 %v845_v40, %v844_v25  ;;  %v5181_v25 = vld [vmem:[#allocation2 + $0xb0] sm:$0xff] }
 0x1d6   : > { %1286 = vmatmul.mubr.f32.gmra.mrb[42].mxu0 %v6176_v54  ;;  %4420 = vmatprep.subr.bf16.mxu1 %v4419_v41 }
 0x1d7   : > { %1290 = vmatprep.mubr.f32.mxu0 %v6042_v3  ;;  %v6192_v3 = vld [vmem:[#allocation2 + $0x191] sm:$0xff]  ;;  %4422 = vmatpush3.bf16.msra.mxu1 %v4419_v41  ;;  %v846_v41 = vld [vmem:[#allocation4 + $0x320] sm:$0xff] }
 0x1da   : > { %1291 = vmatmul.mubr.f32.gmra.mrb[44].mxu0 %v6180_v59 }
 0x1db   : > { %1295 = vmatprep.mubr.f32.mxu0 %v6046_v6  ;;  %v876_v6 = vld [vmem:[#allocation4 + $0x410] sm:$0xff] }
 0x1dc   : > { %v4423_v0 = vpack.c.bf16 %v877_v19, %v876_v6  ;;  %v847_v6 = vld [vmem:[#allocation4 + $0x328] sm:$0xff] }
 0x1dd   : > { %v4378_v19 = vpack.c.bf16 %v847_v6, %v846_v41  ;;  %v866_v6 = vld [vmem:[#allocation4 + $0x3c0] sm:$0xff] }
 0x1de   : > { %1296 = vmatmul.mubr.f32.gmra.mrb[46].mxu0 %v6184_v58  ;;  %4424 = vmatprep.subr.bf16.mxu1 %v4423_v0 }
 0x1df   : > { %1300 = vmatprep.mubr.f32.mxu0 %v6050_v8  ;;  %v6196_v8 = vld [vmem:[#allocation2 + $0x1a9] sm:$0xff]  ;;  %4426 = vmatpush3.bf16.msra.mxu1 %v4423_v0 }
 0x1e0   : > { %4428 = vmatprep.subr.bf16.mxu1 %v4427_v5  ;;  %v848_v0 = vld [vmem:[#allocation4 + $0x330] sm:$0xff] }
 0x1e1   : > { %v4381_v50 = vpack.c.bf16 %v849_v21, %v848_v0  ;;  %v868_v0 = vld [vmem:[#allocation4 + $0x3d0] sm:$0xff]  ;;  %v5184_v21 = vld [vmem:[#allocation2 + $0xe8] sm:$0xff] }
 0x1e2   : > { %1301 = vmatmul.mubr.f32.gmra.mrb[48].mxu0 %v6188_v60 }
 0x1e3   : > { %1305 = vmatprep.mubr.f32.mxu0 %v6054_v13  ;;  %v6200_v13 = vld [vmem:[#allocation2 + $0x1b1] sm:$0xff]  ;;  %4430 = vmatpush3.bf16.msra.mxu1 %v4427_v5  ;;  %v850_v5 = vld [vmem:[#allocation4 + $0x340] sm:$0xff] }
 0x1e4   : > { %4432 = vmatprep.subr.bf16.mxu1 %v4431_v10 }
 0x1e6   : > { %1306 = vmatmul.mubr.f32.gmra.mrb[50].mxu0 %v6192_v3 }
 0x1e7   : > { %1310 = vmatprep.mubr.f32.mxu0 %v6059_v18  ;;  %v6204_v18 = vld [vmem:[#allocation2 + $0x1c9] sm:$0xff]  ;;  %4434 = vmatpush3.bf16.msra.mxu1 %v4431_v10 }
 0x1e8   : > { %4436 = vmatprep.subr.bf16.mxu1 %v4435_v15  ;;  %v852_v10 = vld [vmem:[#allocation4 + $0x350] sm:$0xff] }
 0x1ea   : > { %1311 = vmatmul.mubr.f32.gmra.mrb[52].mxu0 %v6196_v8 }
 0x1eb   : > { %1315 = vmatprep.mubr.f32.mxu0 %v6068_v28  ;;  %v6208_v28 = vld [vmem:[#allocation2 + $0x1d1] sm:$0xff]  ;;  %4438 = vmatpush3.bf16.msra.mxu1 %v4435_v15  ;;  %v854_v15 = vld [vmem:[#allocation4 + $0x360] sm:$0xff] }
 0x1ec   : > { %4440 = vmatprep.subr.bf16.mxu1 %v4439_v55 }
 0x1ee   : > { %1316 = vmatmul.mubr.f32.gmra.mrb[54].mxu0 %v6200_v13 }
 0x1ef   : > { %1320 = vmatprep.mubr.f32.mxu0 %v6076_v38  ;;  %v6214_v38 = vld [vmem:[#allocation2 + $0x1e9] sm:$0xff]  ;;  %4442 = vmatpush3.bf16.msra.mxu1 %v4439_v55 }
 0x1f0   : > { %v856_v55 = vld [vmem:[#allocation4 + $0x370] sm:$0xff] }
 0x1f2   : > { %1321 = vmatmul.mubr.f32.gmra.mrb[56].mxu0 %v6204_v18 }
 0x1f3   : > { %1325 = vmatprep.mubr.f32.mxu0 %v6080_v1  ;;  %v4443_v1 = vpack.c.bf16 %v887_v31, %v886_v33  ;;  %v5178_v33 = vld [vmem:[#allocation2 + $0x88] sm:$0xff] }
 0x1f5   : > { %4444 = vmatprep.subr.bf16.mxu1 %v4443_v1 }
 0x1f6   : > { %1326 = vmatmul.mubr.f32.gmra.mrb[58].mxu0 %v6208_v28  ;;  %4446 = vmatpush3.bf16.msra.mxu1 %v4443_v1  ;;  %v858_v1 = vld [vmem:[#allocation4 + $0x380] sm:$0xff] }
 0x1f7   : > { %1330 = vmatprep.mubr.f32.mxu0 %v6210_v23  ;;  %4448 = vmatprep.subr.bf16.mxu1 %v4447_v42 }
 0x1fa   : > { %1331 = vmatmul.mubr.f32.gmra.mrb[60].mxu0 %v6214_v38  ;;  %4450 = vmatpush3.bf16.msra.mxu1 %v4447_v42 }
 0x1fb   : > { %1335 = vmatprep.mubr.f32.mxu0 %v6216_v11  ;;  %4451 = vmatprep.subr.bf16.mxu1 %v7234_v4 }
 0x1fd   : > { %4100 = vmatmul.mubr.f32.vlgmr.msra.gmra.mrb[0].mxu1 %v6100_v52 }
 0x1fe   : > { %1336 = vmatmul.mubr.f32.gmra.mrb[62].mxu0 %v6220_v27  ;;  %4102 = vmatprep.mubr.f32.mxu1 %v6105_v57 }
 0x1ff   : > { %1405 = vmatprep.mubr.f32.mxu0 %v6087_v12  ;;  %v5173_v12 = vld [vmem:[#allocation2 + $0x30] sm:$0xff] }
 0x201   : > { %4103 = vmatmul.mubr.f32.gmra.mrb[2].mxu1 %v6110_v45 }
 0x202   : > { %1406 = vmatmul.mubr.f32.vlgmr.msra.gmra.mrb[0].mxu0 %v5172_v63  ;;  %4105 = vmatprep.mubr.f32.mxu1 %v6115_v48  ;;  %v864_v63 = vld [vmem:[#allocation4 + $0x3b0] sm:$0xff] }
 0x203   : > { %4373 = vmatpush1.bf16.msra.mxu0 %v4372_v24  ;;  %1410 = vmatprep.mubr.f32.mxu0 %v6092_v37  ;;  %v5174_v37 = vld [vmem:[#allocation2 + $0x48] sm:$0xff]  ;;  %v862_v24 = vld [vmem:[#allocation4 + $0x3a0] sm:$0xff] }
 0x204   : > { %4374 = vmatprep.subr.bf16.mxu0 %v7234_v4 }
 0x205   : > { %4106 = vmatmul.mubr.f32.gmra.mrb[4].mxu1 %v6120_v22 }
 0x206   : > { %1411 = vmatmul.mubr.f32.gmra.mrb[2].mxu0 %v5173_v12  ;;  %4108 = vmatprep.mubr.f32.mxu1 %v6125_v14  ;;  %v5183_v12 = vld [vmem:[#allocation2 + $0xd0] sm:$0xff] }
 0x207   : > { %1415 = vmatprep.mubr.f32.mxu0 %v5948_v47  ;;  %4376 = vmatpush1.bf16.msra.mxu0 %v4375_v44  ;;  %v851_v47 = vld [vmem:[#allocation4 + $0x348] sm:$0xff] }
 0x208   : > { %4377 = vmatprep.subr.bf16.mxu0 %v7234_v4  ;;  %v4384_v17 = vpack.c.bf16 %v851_v47, %v850_v5  ;;  %v5182_v44 = vld [vmem:[#allocation2 + $0xc8] sm:$0xff]  ;;  %v5185_v5 = vld [vmem:[#allocation2 + $0xf0] sm:$0xff] }
 0x209   : > { %4109 = vmatmul.mubr.f32.gmra.mrb[6].mxu1 %v6130_v9 }
 0x20a   : > { %1416 = vmatmul.mubr.f32.gmra.mrb[4].mxu0 %v5174_v37  ;;  %4111 = vmatprep.mubr.f32.mxu1 %v6135_v62 }
 0x20b   : > { %1420 = vmatprep.mubr.f32.mxu0 %v6100_v52  ;;  %4379 = vmatpush1.bf16.msra.mxu0 %v4378_v19  ;;  %v853_v52 = vld [vmem:[#allocation4 + $0x358] sm:$0xff] }
 0x20c   : > { %4380 = vmatprep.subr.bf16.mxu0 %v7234_v4  ;;  %v4387_v2 = vpack.c.bf16 %v853_v52, %v852_v10  ;;  %v648_v10 = vld [vmem:[#allocation2 + $0x211] sm:$0xff]  ;;  %v5186_v52 = vld [vmem:[#allocation2 + $0x108] sm:$0xff] }
 0x20d   : > { %4112 = vmatmul.mubr.f32.gmra.mrb[8].mxu1 %v6140_v34 }
 0x20e   : > { %1421 = vmatmul.mubr.f32.gmra.mrb[6].mxu0 %v5175_v53  ;;  %4114 = vmatprep.mubr.f32.mxu1 %v6145_v36  ;;  %v647_v53 = vld [vmem:[#allocation2 + $0x209] sm:$0xff] }
 0x20f   : > { %1425 = vmatprep.mubr.f32.mxu0 %v6105_v57  ;;  %4382 = vmatpush1.bf16.msra.mxu0 %v4381_v50  ;;  %v855_v57 = vld [vmem:[#allocation4 + $0x368] sm:$0xff]  ;;  %v870_v50 = vld [vmem:[#allocation4 + $0x3e0] sm:$0xff] }
 0x210   : > { %4383 = vmatprep.subr.bf16.mxu0 %v7234_v4  ;;  %v4390_v7 = vpack.c.bf16 %v855_v57, %v854_v15  ;;  %v5189_v15 = vld [vmem:[#allocation2 + $0x130] sm:$0xff]  ;;  %v5190_v57 = vld [vmem:[#allocation2 + $0x148] sm:$0xff] }
 0x211   : > { %4115 = vmatmul.mubr.f32.gmra.mrb[10].mxu1 %v6150_v26 }
 0x212   : > { %1426 = vmatmul.mubr.f32.gmra.mrb[8].mxu0 %v5176_v46  ;;  %4117 = vmatprep.mubr.f32.mxu1 %v6155_v49 }
 0x213   : > { %1430 = vmatprep.mubr.f32.mxu0 %v6110_v45  ;;  %4385 = vmatpush1.bf16.msra.mxu0 %v4384_v17  ;;  %v857_v45 = vld [vmem:[#allocation4 + $0x378] sm:$0xff] }
 0x214   : > { %4386 = vmatprep.subr.bf16.mxu0 %v7234_v4  ;;  %v4393_v31 = vpack.c.bf16 %v857_v45, %v856_v55  ;;  %v873_v17 = vld [vmem:[#allocation4 + $0x3f8] sm:$0xff]  ;;  %v2404_v55 = vld [vmem:[#allocation5 + $0x8] sm:$0xff] }
 0x215   : > { %4118 = vmatmul.mubr.f32.gmra.mrb[12].mxu1 %v6160_v51  ;;  %v650_v45 = vld [vmem:[#allocation2 + $0x47] sm:$0xff] }
 0x216   : > { %1431 = vmatmul.mubr.f32.gmra.mrb[10].mxu0 %v5177_v30  ;;  %4120 = vmatprep.mubr.f32.mxu1 %v6164_v32  ;;  %v5192_v30 = vld [vmem:[#allocation2 + $0x168] sm:$0xff] }
 0x217   : > { %1435 = vmatprep.mubr.f32.mxu0 %v6115_v48  ;;  %4388 = vmatpush1.bf16.msra.mxu0 %v4387_v2  ;;  %v859_v48 = vld [vmem:[#allocation4 + $0x388] sm:$0xff]  ;;  %v5187_v2 = vld [vmem:[#allocation2 + $0x110] sm:$0xff] }
 0x218   : > { %4389 = vmatprep.subr.bf16.mxu0 %v7234_v4  ;;  %v4396_v16 = vpack.c.bf16 %v859_v48, %v858_v1  ;;  %v2408_v48 = vld [vmem:[#allocation5 + $0x28] sm:$0xff] }
 0x219   : > { %4121 = vmatmul.mubr.f32.gmra.mrb[14].mxu1 %v6168_v56 }
 0x21a   : > { %1436 = vmatmul.mubr.f32.gmra.mrb[12].mxu0 %v5178_v33  ;;  %4123 = vmatprep.mubr.f32.mxu1 %v6172_v35 }
 0x21b   : > { %1440 = vmatprep.mubr.f32.mxu0 %v6120_v22  ;;  %4391 = vmatpush1.bf16.msra.mxu0 %v4390_v7  ;;  %v861_v22 = vld [vmem:[#allocation4 + $0x398] sm:$0xff]  ;;  %v682_v7 = vld [vmem:[#allocation2 + $0x48] sm:$0xff] }
 0x21c   : > { %4392 = vmatprep.subr.bf16.mxu0 %v7234_v4  ;;  %v4399_v42 = vpack.c.bf16 %v861_v22, %v860_v20  ;;  %v2409_v20 = vld [vmem:[#allocation5 + $0x30] sm:$0xff]  ;;  %v2410_v22 = vld [vmem:[#allocation5 + $0x38] sm:$0xff] }
 0x21d   : > { %4124 = vmatmul.mubr.f32.gmra.mrb[16].mxu1 %v6176_v54 }
 0x21e   : > { %1441 = vmatmul.mubr.f32.gmra.mrb[14].mxu0 %v5179_v39  ;;  %4126 = vmatprep.mubr.f32.mxu1 %v6180_v59  ;;  %v651_v39 = vld [vmem:[#allocation2 + $0x4f] sm:$0xff] }
 0x21f   : > { %1445 = vmatprep.mubr.f32.mxu0 %v6125_v14  ;;  %4394 = vmatpush1.bf16.msra.mxu0 %v4393_v31  ;;  %v863_v14 = vld [vmem:[#allocation4 + $0x3a8] sm:$0xff]  ;;  %v683_v31 = vld [vmem:[#allocation2 + $0x50] sm:$0xff] }
 0x220   : > { %4395 = vmatprep.subr.bf16.mxu0 %v7234_v4  ;;  %v4402_v40 = vpack.c.bf16 %v863_v14, %v862_v24  ;;  %v2532_v24 = vld [vmem:[#allocation5 + $0x408] sm:$0xff]  ;;  %v685_v14 = vld [vmem:[#allocation2 + $0x70] sm:$0xff] }
 0x221   : > { %4127 = vmatmul.mubr.f32.gmra.mrb[18].mxu1 %v6184_v58 }
 0x222   : > { %1446 = vmatmul.mubr.f32.gmra.mrb[16].mxu0 %v5180_v43  ;;  %4129 = vmatprep.mubr.f32.mxu1 %v6188_v60  ;;  %v2531_v43 = vld [vmem:[#allocation5 + $0x400] sm:$0xff] }
 0x223   : > { %1450 = vmatprep.mubr.f32.mxu0 %v6130_v9  ;;  %4397 = vmatpush1.bf16.msra.mxu0 %v4396_v16  ;;  %v865_v9 = vld [vmem:[#allocation4 + $0x3b8] sm:$0xff]  ;;  %v684_v16 = vld [vmem:[#allocation2 + $0x68] sm:$0xff] }
 0x224   : > { %4398 = vmatprep.subr.bf16.mxu0 %v7234_v4  ;;  %v4405_v41 = vpack.c.bf16 %v865_v9, %v864_v63  ;;  %v2411_v63 = vld [vmem:[#allocation5 + $0x40] sm:$0xff]  ;;  %v2412_v9 = vld [vmem:[#allocation5 + $0x48] sm:$0xff] }
 0x225   : > { %4130 = vmatmul.mubr.f32.gmra.mrb[20].mxu1 %v6192_v3 }
 0x226   : > { %1451 = vmatmul.mubr.f32.gmra.mrb[18].mxu0 %v5181_v25  ;;  %4132 = vmatprep.mubr.f32.mxu1 %v6196_v8  ;;  %v6300_v25 = vpack.c.bf16 %v2532_v24, %v2531_v43  ;;  %v698_v43 = vld [vmem:[#allocation2 + $0x148] sm:$0xff]  ;;  %v699_v24 = vld [vmem:[#allocation2 + $0x150] sm:$0xff] }
 0x227   : > { %1455 = vmatprep.mubr.f32.mxu0 %v6135_v62  ;;  %4400 = vmatpush1.bf16.msra.mxu0 %v4399_v42  ;;  %v867_v62 = vld [vmem:[#allocation4 + $0x3c8] sm:$0xff] }
 0x228   : > { %4401 = vmatprep.subr.bf16.mxu0 %v7234_v4  ;;  %v4408_v19 = vpack.c.bf16 %v867_v62, %v866_v6  ;;  %v652_v42 = vld [vmem:[#allocation2 + $0x67] sm:$0xff]  ;;  %7280 = vst [vmem:[#allocation25_spill] sm:$0xff] %v6300_v25  ;;  %v4464_v6 = vpack.c.bf16 %v2412_v9, %v2411_v63  ;;  %v2413_v62 = vld [vmem:[#allocation5 + $0x50] sm:$0xff] }
 0x229   : > { %4133 = vmatmul.mubr.f32.gmra.mrb[22].mxu1 %v6200_v13  ;;  %v668_v63 = vld [vmem:[#allocation2 + $0x167] sm:$0xff]  ;;  %v701_v9 = vld [vmem:[#allocation2 + $0x170] sm:$0xff] }
 0x22a   : > { %1456 = vmatmul.mubr.f32.gmra.mrb[20].mxu0 %v5182_v44  ;;  %4135 = vmatprep.mubr.f32.mxu1 %v6204_v18  ;;  %v653_v44 = vld [vmem:[#allocation2 + $0x6f] sm:$0xff] }
 0x22b   : > { %1460 = vmatprep.mubr.f32.mxu0 %v6140_v34  ;;  %4403 = vmatpush1.bf16.msra.mxu0 %v4402_v40  ;;  %v869_v34 = vld [vmem:[#allocation4 + $0x3d8] sm:$0xff]  ;;  %v4461_v40 = vpack.c.bf16 %v2410_v22, %v2409_v20  ;;  %v697_v20 = vld [vmem:[#allocation2 + $0x130] sm:$0xff] }
 0x22c   : > { %4404 = vmatprep.subr.bf16.mxu0 %v7234_v4  ;;  %v4411_v37 = vpack.c.bf16 %v869_v34, %v868_v0  ;;  %v687_v0 = vld [vmem:[#allocation2 + $0x90] sm:$0xff] }
 0x22d   : > { %4136 = vmatmul.mubr.f32.gmra.mrb[24].mxu1 %v6208_v28  ;;  %v665_v22 = vld [vmem:[#allocation2 + $0x12f] sm:$0xff] }
 0x22e   : > { %1461 = vmatmul.mubr.f32.gmra.mrb[22].mxu0 %v5183_v12  ;;  %4138 = vmatprep.mubr.f32.mxu1 %v6214_v38  ;;  %v2414_v12 = vld [vmem:[#allocation5 + $0x58] sm:$0xff] }
 0x22f   : > { %1465 = vmatprep.mubr.f32.mxu0 %v6145_v36  ;;  %4406 = vmatpush1.bf16.msra.mxu0 %v4405_v41  ;;  %v871_v36 = vld [vmem:[#allocation4 + $0x3e8] sm:$0xff]  ;;  %v4467_v34 = vpack.c.bf16 %v2414_v12, %v2413_v62  ;;  %v2431_v62 = vld [vmem:[#allocation5 + $0xe0] sm:$0xff] }
 0x230   : > { %4407 = vmatprep.subr.bf16.mxu0 %v7234_v4  ;;  %v4414_v47 = vpack.c.bf16 %v871_v36, %v870_v50  ;;  %v686_v41 = vld [vmem:[#allocation2 + $0x88] sm:$0xff] }
 0x231   : > { %4139 = vmatmul.mubr.f32.gmra.mrb[26].mxu1 %v6220_v27  ;;  %v655_v50 = vld [vmem:[#allocation2 + $0x8f] sm:$0xff] }
 0x232   : > { %1466 = vmatmul.mubr.f32.gmra.mrb[24].mxu0 %v5184_v21  ;;  %4141 = vmatprep.mubr.f32.mxu1 %v647_v53  ;;  %v2415_v21 = vld [vmem:[#allocation5 + $0x60] sm:$0xff]  ;;  %v688_v36 = vld [vmem:[#allocation2 + $0xa8] sm:$0xff] }
 0x233   : > { %1470 = vmatprep.mubr.f32.mxu0 %v6150_v26  ;;  %4409 = vmatpush1.bf16.msra.mxu0 %v4408_v19  ;;  %v872_v26 = vld [vmem:[#allocation4 + $0x3f0] sm:$0xff]  ;;  %v654_v19 = vld [vmem:[#allocation2 + $0x87] sm:$0xff] }
 0x234   : > { %4410 = vmatprep.subr.bf16.mxu0 %v7234_v4  ;;  %v4417_v46 = vpack.c.bf16 %v873_v17, %v872_v26  ;;  %v656_v26 = vld [vmem:[#allocation2 + $0xa7] sm:$0xff]  ;;  %v689_v17 = vld [vmem:[#allocation2 + $0xb0] sm:$0xff] }
 0x235   : > { %4142 = vmatmul.mubr.f32.gmra.mrb[28].mxu1 %v648_v10  ;;  %v2432_v12 = vld [vmem:[#allocation5 + $0xe8] sm:$0xff] }
 0x236   : > { %1471 = vmatmul.mubr.f32.gmra.mrb[26].mxu0 %v5185_v5 }
 0x237   : > { %1475 = vmatprep.mubr.f32.mxu0 %v6155_v49  ;;  %4412 = vmatpush1.bf16.msra.mxu0 %v4411_v37  ;;  %v5188_v49 = vld [vmem:[#allocation2 + $0x128] sm:$0xff] }
 0x238   : > { %4413 = vmatprep.subr.bf16.mxu0 %v7234_v4  ;;  %v2416_v37 = vld [vmem:[#allocation5 + $0x68] sm:$0xff] }
 0x239   : > { %v4470_v5 = vpack.c.bf16 %v2416_v37, %v2415_v21  ;;  %v2433_v21 = vld [vmem:[#allocation5 + $0xf0] sm:$0xff]  ;;  %v2434_v37 = vld [vmem:[#allocation5 + $0xf8] sm:$0xff] }
 0x23a   : > { %1476 = vmatmul.mubr.f32.gmra.mrb[28].mxu0 %v5186_v52  ;;  %v2419_v52 = vld [vmem:[#allocation5 + $0x80] sm:$0xff] }
 0x23b   : > { %1480 = vmatprep.mubr.f32.mxu0 %v6160_v51  ;;  %4415 = vmatpush1.bf16.msra.mxu0 %v4414_v47  ;;  %v5191_v51 = vld [vmem:[#allocation2 + $0x150] sm:$0xff] }
 0x23c   : > { %4416 = vmatprep.subr.bf16.mxu0 %v7234_v4  ;;  %v2417_v47 = vld [vmem:[#allocation5 + $0x70] sm:$0xff] }
 0x23e   : > { %1481 = vmatmul.mubr.f32.gmra.mrb[30].mxu0 %v5187_v2  ;;  %v657_v2 = vld [vmem:[#allocation2 + $0xaf] sm:$0xff] }
 0x23f   : > { %1485 = vmatprep.mubr.f32.mxu0 %v6164_v32  ;;  %4418 = vmatpush1.bf16.msra.mxu0 %v4417_v46  ;;  %v5193_v32 = vld [vmem:[#allocation2 + $0x170] sm:$0xff]  ;;  %v2420_v46 = vld [vmem:[#allocation5 + $0x88] sm:$0xff] }
 0x240   : > { %4644 = vmatprep.subr.bf16.mxu0 %v6300_v25 }
 0x242   : > { %1486 = vmatmul.mubr.f32.gmra.mrb[32].mxu0 %v5188_v49  ;;  %v690_v49 = vld [vmem:[#allocation2 + $0xc8] sm:$0xff] }
 0x243   : > { %1490 = vmatprep.mubr.f32.mxu0 %v6168_v56  ;;  %v5194_v56 = vld [vmem:[#allocation2 + $0x188] sm:$0xff] }
 0x246   : > { %1491 = vmatmul.mubr.f32.gmra.mrb[34].mxu0 %v5189_v15  ;;  %v4476_v15 = vpack.c.bf16 %v2420_v46, %v2419_v52  ;;  %v705_v52 = vld [vmem:[#allocation2 + $0x1b0] sm:$0xff]  ;;  %v2146_v46 = vld [vmem:[#allocation3 + $0x8] sm:$0xff] }
 0x247   : > { %1495 = vmatprep.mubr.f32.mxu0 %v6172_v35  ;;  %v5195_v35 = vld [vmem:[#allocation2 + $0x190] sm:$0xff] }
 0x24a   : > { %1496 = vmatmul.mubr.f32.gmra.mrb[36].mxu0 %v5190_v57  ;;  %v2421_v57 = vld [vmem:[#allocation5 + $0x90] sm:$0xff] }
 0x24b   : > { %1500 = vmatprep.mubr.f32.mxu0 %v6176_v54  ;;  %v5196_v54 = vld [vmem:[#allocation2 + $0x1a8] sm:$0xff] }
 0x24e   : > { %1501 = vmatmul.mubr.f32.gmra.mrb[38].mxu0 %v5191_v51  ;;  %v2422_v51 = vld [vmem:[#allocation5 + $0x98] sm:$0xff] }
 0x24f   : > { %1505 = vmatprep.mubr.f32.mxu0 %v6180_v59  ;;  %v5197_v59 = vld [vmem:[#allocation2 + $0x1b0] sm:$0xff] }
 0x252   : > { %1506 = vmatmul.mubr.f32.gmra.mrb[40].mxu0 %v5192_v30  ;;  %v658_v30 = vld [vmem:[#allocation2 + $0xc7] sm:$0xff] }
 0x253   : > { %1510 = vmatprep.mubr.f32.mxu0 %v6184_v58  ;;  %v5198_v58 = vld [vmem:[#allocation2 + $0x1c8] sm:$0xff] }
 0x256   : > { %1511 = vmatmul.mubr.f32.gmra.mrb[42].mxu0 %v5193_v32  ;;  %v691_v32 = vld [vmem:[#allocation2 + $0xd0] sm:$0xff] }
 0x257   : > { %1515 = vmatprep.mubr.f32.mxu0 %v6188_v60  ;;  %v5199_v60 = vld [vmem:[#allocation2 + $0x1d0] sm:$0xff] }
 0x25a   : > { %1516 = vmatmul.mubr.f32.gmra.mrb[44].mxu0 %v5194_v56  ;;  %v4479_v56 = vpack.c.bf16 %v2422_v51, %v2421_v57  ;;  %v673_v51 = vld [vmem:[#allocation2 + $0x1af] sm:$0xff] }
 0x25b   : > { %1520 = vmatprep.mubr.f32.mxu0 %v6192_v3  ;;  %v5200_v3 = vld [vmem:[#allocation2 + $0x1e8] sm:$0xff] }
 0x25e   : > { %1521 = vmatmul.mubr.f32.gmra.mrb[46].mxu0 %v5195_v35  ;;  %v2423_v35 = vld [vmem:[#allocation5 + $0xa0] sm:$0xff] }
 0x25f   : > { %1525 = vmatprep.mubr.f32.mxu0 %v6196_v8  ;;  %v5201_v8 = vld [vmem:[#allocation2 + $0x1f0] sm:$0xff] }
 0x262   : > { %1526 = vmatmul.mubr.f32.gmra.mrb[48].mxu0 %v5196_v54  ;;  %v2424_v54 = vld [vmem:[#allocation5 + $0xa8] sm:$0xff] }
 0x263   : > { %1530 = vmatprep.mubr.f32.mxu0 %v6200_v13  ;;  %v744_v13 = vld [vmem:[#allocation2 + $0x229] sm:$0xff] }
 0x264   : > { %4144 = vmatprep.mubr.f32.mxu1 %v744_v13  ;;  %v660_v13 = vld [vmem:[#allocation2 + $0xe7] sm:$0xff] }
 0x266   : > { %1531 = vmatmul.mubr.f32.gmra.mrb[50].mxu0 %v5197_v59  ;;  %v659_v59 = vld [vmem:[#allocation2 + $0xcf] sm:$0xff] }
 0x267   : > { %1535 = vmatprep.mubr.f32.mxu0 %v6204_v18  ;;  %v745_v18 = vld [vmem:[#allocation2 + $0x231] sm:$0xff] }
 0x268   : > { %4145 = vmatmul.mubr.f32.gmra.mrb[30].mxu1 %v745_v18  ;;  %v693_v18 = vld [vmem:[#allocation2 + $0xf0] sm:$0xff] }
 0x269   : > { %2611 = vmatprep.mubr.f32.mxu1 %v2146_v46 }
 0x26a   : > { %1536 = vmatmul.mubr.f32.gmra.mrb[52].mxu0 %v5198_v58  ;;  %v692_v58 = vld [vmem:[#allocation2 + $0xe8] sm:$0xff] }
 0x26b   : > { %1540 = vmatprep.mubr.f32.mxu0 %v6208_v28  ;;  %v2403_v28 = vld [vmem:[#allocation5] sm:$0xff] }
 0x26c   : > { %v4452_v33 = vpack.c.bf16 %v2404_v55, %v2403_v28  ;;  %v2427_v28 = vld [vmem:[#allocation5 + $0xc0] sm:$0xff]  ;;  %v2428_v55 = vld [vmem:[#allocation5 + $0xc8] sm:$0xff] }
 0x26e   : > { %1541 = vmatmul.mubr.f32.gmra.mrb[54].mxu0 %v5199_v60  ;;  %4453 = vmatpush1.bf16.msra.mxu1 %v4452_v33  ;;  %v4482_v60 = vpack.c.bf16 %v2424_v54, %v2423_v35  ;;  %v4488_v33 = vpack.c.bf16 %v2428_v55, %v2427_v28  ;;  %v2538_v35 = vld [vmem:[#allocation5 + $0x438] sm:$0xff]  ;;  %v2115_v54 = vld [vmem:[#allocation3 + $0xf] sm:$0xff] }
 0x26f   : > { %1545 = vmatprep.mubr.f32.mxu0 %v6214_v38  ;;  %v2405_v38 = vld [vmem:[#allocation5 + $0x10] sm:$0xff]  ;;  %4454 = vmatprep.subr.bf16.mxu1 %v7234_v4  ;;  %v708_v55 = vld [vmem:[#allocation2 + $0x1e8] sm:$0xff] }
 0x270   : > { %v675_v28 = vld [vmem:[#allocation2 + $0x1cf] sm:$0xff] }
 0x272   : > { %1546 = vmatmul.mubr.f32.gmra.mrb[56].mxu0 %v5200_v3  ;;  %v2425_v3 = vld [vmem:[#allocation5 + $0xb0] sm:$0xff] }
 0x273   : > { %1550 = vmatprep.mubr.f32.mxu0 %v6220_v27  ;;  %v2406_v27 = vld [vmem:[#allocation5 + $0x18] sm:$0xff] }
 0x274   : > { %v4455_v1 = vpack.c.bf16 %v2406_v27, %v2405_v38  ;;  %v661_v38 = vld [vmem:[#allocation2 + $0xef] sm:$0xff] }
 0x275   : > { %v2429_v27 = vld [vmem:[#allocation5 + $0xd0] sm:$0xff] }
 0x276   : > { %1551 = vmatmul.mubr.f32.gmra.mrb[58].mxu0 %v5201_v8  ;;  %4456 = vmatpush1.bf16.msra.mxu1 %v4455_v1  ;;  %v2426_v8 = vld [vmem:[#allocation5 + $0xb8] sm:$0xff]  ;;  %v662_v1 = vld [vmem:[#allocation2 + $0x107] sm:$0xff] }
 0x277   : > { %1555 = vmatprep.mubr.f32.mxu0 %v647_v53  ;;  %4457 = vmatprep.subr.bf16.mxu1 %v7234_v4  ;;  %v2418_v53 = vld [vmem:[#allocation5 + $0x78] sm:$0xff] }
 0x27a   : > { %1556 = vmatmul.mubr.f32.gmra.mrb[60].mxu0 %v6062_v61  ;;  %v2407_v61 = vld [vmem:[#allocation5 + $0x20] sm:$0xff] }
 0x27b   : > { %1560 = vmatprep.mubr.f32.mxu0 %v648_v10  ;;  %v4473_v10 = vpack.c.bf16 %v2418_v53, %v2417_v47  ;;  %v4497_v47 = vpack.c.bf16 %v2434_v37, %v2433_v21  ;;  %v680_v37 = vld [vmem:[#allocation2 + $0x227] sm:$0xff] }
 0x27e   : > { %1561 = vmatmul.mubr.f32.gmra.mrb[62].mxu0 %v6071_v29  ;;  %v4458_v29 = vpack.c.bf16 %v2408_v48, %v2407_v61  ;;  %v695_v61 = vld [vmem:[#allocation2 + $0x110] sm:$0xff] }
 0x27f   : > { %1630 = vmatprep.mubr.f32.mxu0 %v682_v7  ;;  %v4485_v7 = vpack.c.bf16 %v2426_v8, %v2425_v3  ;;  %v674_v3 = vld [vmem:[#allocation2 + $0x1c7] sm:$0xff]  ;;  %v707_v8 = vld [vmem:[#allocation2 + $0x1d0] sm:$0xff] }
 0x280   : > { %4459 = vmatpush1.bf16.msra.mxu1 %v4458_v29  ;;  %v664_v29 = vld [vmem:[#allocation2 + $0x127] sm:$0xff] }
 0x281   : > { %4460 = vmatprep.subr.bf16.mxu1 %v7234_v4 }
 0x282   : > { %1631 = vmatmul.mubr.f32.vlgmr.msra.gmra.mrb[0].mxu0 %v650_v45  ;;  %v694_v45 = vld [vmem:[#allocation2 + $0x108] sm:$0xff] }
 0x283   : > { %1635 = vmatprep.mubr.f32.mxu0 %v683_v31  ;;  %4646 = vmatpush3.bf16.msra.mxu0 %v6300_v25  ;;  %v2430_v31 = vld [vmem:[#allocation5 + $0xd8] sm:$0xff] }
 0x284   : > { %4462 = vmatpush1.bf16.msra.mxu1 %v4461_v40  ;;  %v4491_v48 = vpack.c.bf16 %v2430_v31, %v2429_v27  ;;  %v700_v40 = vld [vmem:[#allocation2 + $0x168] sm:$0xff]  ;;  %v2435_v31 = vld [vmem:[#allocation5 + $0x100] sm:$0xff] }
 0x285   : > { %4463 = vmatprep.subr.bf16.mxu1 %v7234_v4 }
 0x286   : > { %1636 = vmatmul.mubr.f32.gmra.mrb[2].mxu0 %v651_v39  ;;  %v663_v39 = vld [vmem:[#allocation2 + $0x10f] sm:$0xff] }
 0x287   : > { %1640 = vmatprep.mubr.f32.mxu0 %v684_v16  ;;  %v696_v16 = vld [vmem:[#allocation2 + $0x128] sm:$0xff] }
 0x288   : > { %4465 = vmatpush1.bf16.msra.mxu1 %v4464_v6  ;;  %v670_v6 = vld [vmem:[#allocation2 + $0x187] sm:$0xff] }
 0x289   : > { %4466 = vmatprep.subr.bf16.mxu1 %v7234_v4 }
 0x28a   : > { %1641 = vmatmul.mubr.f32.gmra.mrb[4].mxu0 %v652_v42  ;;  %v666_v42 = vld [vmem:[#allocation2 + $0x147] sm:$0xff] }
 0x28b   : > { %1645 = vmatprep.mubr.f32.mxu0 %v685_v14  ;;  %v667_v14 = vld [vmem:[#allocation2 + $0x14f] sm:$0xff] }
 0x28c   : > { %4468 = vmatpush1.bf16.msra.mxu1 %v4467_v34  ;;  %v671_v34 = vld [vmem:[#allocation2 + $0x18f] sm:$0xff] }
 0x28d   : > { %4469 = vmatprep.subr.bf16.mxu1 %v7234_v4 }
 0x28e   : > { %1646 = vmatmul.mubr.f32.gmra.mrb[6].mxu0 %v653_v44  ;;  %v669_v44 = vld [vmem:[#allocation2 + $0x16f] sm:$0xff] }
 0x28f   : > { %1650 = vmatprep.mubr.f32.mxu0 %v686_v41  ;;  %v702_v41 = vld [vmem:[#allocation2 + $0x188] sm:$0xff] }
 0x290   : > { %4471 = vmatpush1.bf16.msra.mxu1 %v4470_v5  ;;  %v2534_v5 = vld [vmem:[#allocation5 + $0x418] sm:$0xff] }
 0x291   : > { %4472 = vmatprep.subr.bf16.mxu1 %v7234_v4 }
 0x292   : > { %1651 = vmatmul.mubr.f32.gmra.mrb[8].mxu0 %v654_v19  ;;  %v703_v19 = vld [vmem:[#allocation2 + $0x190] sm:$0xff] }
 0x293   : > { %1655 = vmatprep.mubr.f32.mxu0 %v687_v0  ;;  %v4494_v0 = vpack.c.bf16 %v2432_v12, %v2431_v62  ;;  %v5203_v62 = vld [vmem:[#allocation2 + $0x210] sm:$0xff]  ;;  %v712_v12 = vld [vmem:[#allocation2 + $0x228] sm:$0xff] }
 0x294   : > { %4474 = vmatpush1.bf16.msra.mxu1 %v4473_v10  ;;  %v672_v10 = vld [vmem:[#allocation2 + $0x1a7] sm:$0xff] }
 0x295   : > { %4475 = vmatprep.subr.bf16.mxu1 %v7234_v4 }
 0x296   : > { %1656 = vmatmul.mubr.f32.gmra.mrb[10].mxu0 %v655_v50  ;;  %v704_v50 = vld [vmem:[#allocation2 + $0x1a8] sm:$0xff] }
 0x297   : > { %1660 = vmatprep.mubr.f32.mxu0 %v688_v36  ;;  %v2533_v36 = vld [vmem:[#allocation5 + $0x410] sm:$0xff] }
 0x298   : > { %4477 = vmatpush1.bf16.msra.mxu1 %v4476_v15  ;;  %v2114_v15 = vld [vmem:[#allocation3 + $0x7] sm:$0xff] }
 0x299   : > { %4478 = vmatprep.subr.bf16.mxu1 %v7234_v4 }
 0x29a   : > { %1661 = vmatmul.mubr.f32.gmra.mrb[12].mxu0 %v656_v26  ;;  %v6319_v26 = vpack.c.bf16 %v2534_v5, %v2533_v36  ;;  %v713_v36 = vld [vmem:[#allocation2 + $0x230] sm:$0xff] }
 0x29b   : > { %1665 = vmatprep.mubr.f32.mxu0 %v689_v17 }
 0x29c   : > { %4480 = vmatpush1.bf16.msra.mxu1 %v4479_v56  ;;  %7281 = vst [vmem:[#allocation26_spill] sm:$0xff] %v6319_v26  ;;  %4648 = vmatprep.subr.bf16.mxu0 %v6319_v26  ;;  %v2537_v56 = vld [vmem:[#allocation5 + $0x430] sm:$0xff] }
 0x29d   : > { %4481 = vmatprep.subr.bf16.mxu1 %v7234_v4  ;;  %4650 = vmatpush3.bf16.msra.mxu0 %v6319_v26 }
 0x29e   : > { %1666 = vmatmul.mubr.f32.gmra.mrb[14].mxu0 %v657_v2  ;;  %v2535_v2 = vld [vmem:[#allocation5 + $0x420] sm:$0xff] }
 0x29f   : > { %1670 = vmatprep.mubr.f32.mxu0 %v690_v49  ;;  %v2536_v49 = vld [vmem:[#allocation5 + $0x428] sm:$0xff] }
 0x2a0   : > { %4483 = vmatpush1.bf16.msra.mxu1 %v4482_v60  ;;  %v6325_v57 = vpack.c.bf16 %v2536_v49, %v2535_v2  ;;  %v2443_v2 = vld [vmem:[#allocation5 + $0x140] sm:$0xff]  ;;  %v2444_v49 = vld [vmem:[#allocation5 + $0x148] sm:$0xff] }
 0x2a1   : > { %4484 = vmatprep.subr.bf16.mxu1 %v7234_v4 }
 0x2a2   : > { %1671 = vmatmul.mubr.f32.gmra.mrb[16].mxu0 %v658_v30  ;;  %7282 = vst [vmem:[#allocation27_spill] sm:$0xff] %v6325_v57  ;;  %v706_v30 = vld [vmem:[#allocation2 + $0x1c8] sm:$0xff]  ;;  %4652 = vmatprep.subr.bf16.mxu0 %v6325_v57 }
 0x2a3   : > { %1675 = vmatprep.mubr.f32.mxu0 %v691_v32  ;;  %v2147_v32 = vld [vmem:[#allocation3 + $0x10] sm:$0xff]  ;;  %4654 = vmatpush3.bf16.msra.mxu0 %v6325_v57 }
 0x2a4   : > { %4486 = vmatpush1.bf16.msra.mxu1 %v4485_v7 }
 0x2a5   : > { %4487 = vmatprep.subr.bf16.mxu1 %v7234_v4 }
 0x2a6   : > { %1676 = vmatmul.mubr.f32.gmra.mrb[18].mxu0 %v659_v59 }
 0x2a7   : > { %1680 = vmatprep.mubr.f32.mxu0 %v692_v58  ;;  %v6332_v58 = vpack.c.bf16 %v2538_v35, %v2537_v56  ;;  %v2446_v56 = vld [vmem:[#allocation5 + $0x158] sm:$0xff] }
 0x2a8   : > { %4489 = vmatpush1.bf16.msra.mxu1 %v4488_v33 }
 0x2a9   : > { %4490 = vmatprep.subr.bf16.mxu1 %v7234_v4  ;;  %7283 = vst [vmem:[#allocation28_spill] sm:$0xff] %v6332_v58  ;;  %4656 = vmatprep.subr.bf16.mxu0 %v6332_v58 }
 0x2aa   : > { %1681 = vmatmul.mubr.f32.gmra.mrb[20].mxu0 %v660_v13  ;;  %v2539_v13 = vld [vmem:[#allocation5 + $0x440] sm:$0xff] }
 0x2ab   : > { %1685 = vmatprep.mubr.f32.mxu0 %v693_v18  ;;  %4658 = vmatpush3.bf16.msra.mxu0 %v6332_v58  ;;  %v2540_v18 = vld [vmem:[#allocation5 + $0x448] sm:$0xff] }
 0x2ac   : > { %4492 = vmatpush1.bf16.msra.mxu1 %v4491_v48  ;;  %v6338_v7 = vpack.c.bf16 %v2540_v18, %v2539_v13  ;;  %v676_v48 = vld [vmem:[#allocation2 + $0x1e7] sm:$0xff] }
 0x2ad   : > { %4493 = vmatprep.subr.bf16.mxu1 %v7234_v4  ;;  %v2448_v13 = vld [vmem:[#allocation5 + $0x168] sm:$0xff] }
 0x2ae   : > { %1686 = vmatmul.mubr.f32.gmra.mrb[22].mxu0 %v661_v38  ;;  %7284 = vst [vmem:[#allocation29_spill] sm:$0xff] %v6338_v7  ;;  %4660 = vmatprep.subr.bf16.mxu0 %v6338_v7  ;;  %v2541_v38 = vld [vmem:[#allocation5 + $0x450] sm:$0xff] }
 0x2af   : > { %1690 = vmatprep.mubr.f32.mxu0 %v694_v45  ;;  %4662 = vmatpush3.bf16.msra.mxu0 %v6338_v7  ;;  %v2542_v45 = vld [vmem:[#allocation5 + $0x458] sm:$0xff] }
 0x2b0   : > { %4495 = vmatpush1.bf16.msra.mxu1 %v4494_v0  ;;  %v6344_v27 = vpack.c.bf16 %v2542_v45, %v2541_v38  ;;  %v2439_v0 = vld [vmem:[#allocation5 + $0x120] sm:$0xff]  ;;  %v2449_v38 = vld [vmem:[#allocation5 + $0x170] sm:$0xff]  ;;  %v2450_v45 = vld [vmem:[#allocation5 + $0x178] sm:$0xff] }
 0x2b1   : > { %4496 = vmatprep.subr.bf16.mxu1 %v7234_v4 }
 0x2b2   : > { %1691 = vmatmul.mubr.f32.gmra.mrb[24].mxu0 %v662_v1  ;;  %7285 = vst [vmem:[#allocation30_spill] sm:$0xff] %v6344_v27  ;;  %v2436_v1 = vld [vmem:[#allocation5 + $0x108] sm:$0xff]  ;;  %4664 = vmatprep.subr.bf16.mxu0 %v6344_v27 }
 0x2b3   : > { %1695 = vmatprep.mubr.f32.mxu0 %v695_v61  ;;  %4666 = vmatpush3.bf16.msra.mxu0 %v6344_v27 }
 0x2b4   : > { %4498 = vmatpush1.bf16.msra.mxu1 %v4497_v47  ;;  %v2441_v47 = vld [vmem:[#allocation5 + $0x130] sm:$0xff] }
 0x2b5   : > { %4499 = vmatprep.subr.bf16.mxu1 %v7234_v4 }
 0x2b6   : > { %1696 = vmatmul.mubr.f32.gmra.mrb[26].mxu0 %v663_v39  ;;  %v4500_v39 = vpack.c.bf16 %v2436_v1, %v2435_v31  ;;  %v4521_v1 = vpack.c.bf16 %v2450_v45, %v2449_v38  ;;  %v2464_v38 = vld [vmem:[#allocation5 + $0x1e8] sm:$0xff] }
 0x2b7   : > { %1700 = vmatprep.mubr.f32.mxu0 %v696_v16  ;;  %2612 = vmatmul.mubr.f32.vlgmr.msra.gmra.mrb[32].mxu1 %v2114_v15  ;;  %v709_v16 = vld [vmem:[#allocation2 + $0x1f0] sm:$0xff] }
 0x2b8   : > { %2616 = vmatprep.mubr.f32.mxu1 %v2147_v32  ;;  %4501 = vmatpush1.bf16.msra.mxu1 %v4500_v39  ;;  %v2445_v32 = vld [vmem:[#allocation5 + $0x150] sm:$0xff]  ;;  %v2451_v39 = vld [vmem:[#allocation5 + $0x180] sm:$0xff] }
 0x2b9   : > { %4502 = vmatprep.subr.bf16.mxu1 %v7234_v4 }
 0x2ba   : > { %1701 = vmatmul.mubr.f32.gmra.mrb[28].mxu0 %v664_v29  ;;  %v2543_v29 = vld [vmem:[#allocation5 + $0x460] sm:$0xff] }
 0x2bb   : > { %1705 = vmatprep.mubr.f32.mxu0 %v697_v20  ;;  %2617 = vmatmul.mubr.f32.gmra.mrb[34].mxu1 %v2115_v54  ;;  %v2544_v20 = vld [vmem:[#allocation5 + $0x468] sm:$0xff]  ;;  %v4515_v54 = vpack.c.bf16 %v2446_v56, %v2445_v32  ;;  %v2462_v32 = vld [vmem:[#allocation5 + $0x1d8] sm:$0xff] }
 0x2be   : > { %1706 = vmatmul.mubr.f32.gmra.mrb[30].mxu0 %v665_v22  ;;  %v6350_v22 = vpack.c.bf16 %v2544_v20, %v2543_v29 }
 0x2bf   : > { %1710 = vmatprep.mubr.f32.mxu0 %v698_v43  ;;  %v677_v43 = vld [vmem:[#allocation2 + $0x1ef] sm:$0xff] }
 0x2c0   : > { %7286 = vst [vmem:[#allocation31_spill] sm:$0xff] %v6350_v22  ;;  %4668 = vmatprep.subr.bf16.mxu0 %v6350_v22 }
 0x2c1   : > { %4670 = vmatpush3.bf16.msra.mxu0 %v6350_v22 }
 0x2c2   : > { %1711 = vmatmul.mubr.f32.gmra.mrb[32].mxu0 %v666_v42  ;;  %v2545_v42 = vld [vmem:[#allocation5 + $0x470] sm:$0xff] }
 0x2c3   : > { %1715 = vmatprep.mubr.f32.mxu0 %v699_v24  ;;  %v2546_v24 = vld [vmem:[#allocation5 + $0x478] sm:$0xff] }
 0x2c6   : > { %1716 = vmatmul.mubr.f32.gmra.mrb[34].mxu0 %v667_v14 }
 0x2c7   : > { %1720 = vmatprep.mubr.f32.mxu0 %v700_v40  ;;  %v6357_v40 = vpack.c.bf16 %v2546_v24, %v2545_v42  ;;  %v2453_v42 = vld [vmem:[#allocation5 + $0x190] sm:$0xff]  ;;  %v2454_v24 = vld [vmem:[#allocation5 + $0x198] sm:$0xff] }
 0x2c9   : > { %7287 = vst [vmem:[#allocation32_spill] sm:$0xff] %v6357_v40  ;;  %4672 = vmatprep.subr.bf16.mxu0 %v6357_v40 }
 0x2ca   : > { %1721 = vmatmul.mubr.f32.gmra.mrb[36].mxu0 %v668_v63  ;;  %v2437_v63 = vld [vmem:[#allocation5 + $0x110] sm:$0xff] }
 0x2cb   : > { %1725 = vmatprep.mubr.f32.mxu0 %v701_v9  ;;  %v2438_v9 = vld [vmem:[#allocation5 + $0x118] sm:$0xff]  ;;  %4674 = vmatpush3.bf16.msra.mxu0 %v6357_v40 }
 0x2ce   : > { %1726 = vmatmul.mubr.f32.gmra.mrb[38].mxu0 %v669_v44 }
 0x2cf   : > { %1730 = vmatprep.mubr.f32.mxu0 %v702_v41  ;;  %v5202_v41 = vld [vmem:[#allocation2 + $0x208] sm:$0xff] }
 0x2d0   : > { %v6317_v53 = vpop.f32.mrb[0].mxu1 }
 0x2d1   : > { %v6321_v17 = vpop.f32.mrb[1].mxu1 }
 0x2d2   : > { %1731 = vmatmul.mubr.f32.gmra.mrb[40].mxu0 %v670_v6  ;;  %v4503_v6 = vpack.c.bf16 %v2438_v9, %v2437_v63  ;;  %v4527_v9 = vpack.c.bf16 %v2454_v24, %v2453_v42  ;;  %v2465_v42 = vld [vmem:[#allocation5 + $0x1f0] sm:$0xff]  ;;  %v2466_v24 = vld [vmem:[#allocation5 + $0x1f8] sm:$0xff] }
 0x2d3   : > { %1735 = vmatprep.mubr.f32.mxu0 %v703_v19 }
 0x2d4   : > { %v6330_v59 = vpop.f32.mrb[2].mxu1  ;;  %4504 = vmatpush1.bf16.msra.mxu1 %v4503_v6  ;;  %v2455_v6 = vld [vmem:[#allocation5 + $0x1a0] sm:$0xff] }
 0x2d5   : > { %v6334_v60 = vpop.f32.mrb[3].mxu1  ;;  %4505 = vmatprep.subr.bf16.mxu1 %v7234_v4 }
 0x2d6   : > { %1736 = vmatmul.mubr.f32.gmra.mrb[42].mxu0 %v671_v34  ;;  %v2440_v34 = vld [vmem:[#allocation5 + $0x128] sm:$0xff] }
 0x2d7   : > { %1740 = vmatprep.mubr.f32.mxu0 %v704_v50  ;;  %v4506_v50 = vpack.c.bf16 %v2440_v34, %v2439_v0 }
 0x2d8   : > { %v6342_v33 = vpop.f32.mrb[4].mxu1 }
 0x2d9   : > { %v6346_v61 = vpop.f32.mrb[5].mxu1  ;;  %4507 = vmatpush1.bf16.msra.mxu1 %v4506_v50  ;;  %v2458_v50 = vld [vmem:[#allocation5 + $0x1b8] sm:$0xff] }
 0x2da   : > { %1741 = vmatmul.mubr.f32.gmra.mrb[44].mxu0 %v672_v10  ;;  %4508 = vmatprep.subr.bf16.mxu1 %v7234_v4  ;;  %v2442_v10 = vld [vmem:[#allocation5 + $0x138] sm:$0xff] }
 0x2db   : > { %1745 = vmatprep.mubr.f32.mxu0 %v705_v52  ;;  %v4509_v52 = vpack.c.bf16 %v2442_v10, %v2441_v47  ;;  %v2459_v10 = vld [vmem:[#allocation5 + $0x1c0] sm:$0xff] }
 0x2dc   : > { %v6355_v14 = vpop.f32.mrb[6].mxu1 }
 0x2dd   : > { %v6359_v44 = vpop.f32.mrb[7].mxu1  ;;  %4510 = vmatpush1.bf16.msra.mxu1 %v4509_v52  ;;  %v2460_v52 = vld [vmem:[#allocation5 + $0x1c8] sm:$0xff] }
 0x2de   : > { %1746 = vmatmul.mubr.f32.gmra.mrb[46].mxu0 %v673_v51  ;;  %4511 = vmatprep.subr.bf16.mxu1 %v7234_v4  ;;  %v4512_v51 = vpack.c.bf16 %v2444_v49, %v2443_v2  ;;  %v4536_v49 = vpack.c.bf16 %v2460_v52, %v2459_v10 }
 0x2df   : > { %1750 = vmatprep.mubr.f32.mxu0 %v706_v30 }
 0x2e0   : > { %v6365_v19 = vpop.f32.mrb[8].mxu1 }
 0x2e1   : > { %v6368_v21 = vpop.f32.mrb[9].mxu1  ;;  %4513 = vmatpush1.bf16.msra.mxu1 %v4512_v51  ;;  %v2461_v51 = vld [vmem:[#allocation5 + $0x1d0] sm:$0xff] }
 0x2e2   : > { %1751 = vmatmul.mubr.f32.gmra.mrb[48].mxu0 %v674_v3  ;;  %4514 = vmatprep.subr.bf16.mxu1 %v7234_v4 }
 0x2e3   : > { %1755 = vmatprep.mubr.f32.mxu0 %v707_v8  ;;  %v2447_v8 = vld [vmem:[#allocation5 + $0x160] sm:$0xff] }
 0x2e4   : > { %v6371_v5 = vpop.f32.mrb[10].mxu1 }
 0x2e5   : > { %4516 = vmatpush1.bf16.msra.mxu1 %v4515_v54  ;;  %v4539_v54 = vpack.c.bf16 %v2462_v32, %v2461_v51 }
 0x2e6   : > { %1756 = vmatmul.mubr.f32.gmra.mrb[50].mxu0 %v675_v28  ;;  %4517 = vmatprep.subr.bf16.mxu1 %v7234_v4  ;;  %v4518_v28 = vpack.c.bf16 %v2448_v13, %v2447_v8  ;;  %v6427_v13 = vstv %s5581_s9 }
 0x2e7   : > { %1760 = vmatprep.mubr.f32.mxu0 %v708_v55 }
 0x2e9   : > { %4519 = vmatpush1.bf16.msra.mxu1 %v4518_v28  ;;  %v2463_v28 = vld [vmem:[#allocation5 + $0x1e0] sm:$0xff] }
 0x2ea   : > { %1761 = vmatmul.mubr.f32.gmra.mrb[52].mxu0 %v676_v48  ;;  %4520 = vmatprep.subr.bf16.mxu1 %v7234_v4 }
 0x2eb   : > { %1765 = vmatprep.mubr.f32.mxu0 %v709_v16  ;;  %v2452_v16 = vld [vmem:[#allocation5 + $0x188] sm:$0xff] }
 0x2ec   : > { %v4524_v20 = vpack.c.bf16 %v2452_v16, %v2451_v39 }
 0x2ed   : > { %4522 = vmatpush1.bf16.msra.mxu1 %v4521_v1  ;;  %v4542_v1 = vpack.c.bf16 %v2464_v38, %v2463_v28 }
 0x2ee   : > { %1766 = vmatmul.mubr.f32.gmra.mrb[54].mxu0 %v677_v43  ;;  %4523 = vmatprep.subr.bf16.mxu1 %v7234_v4 }
 0x2ef   : > { %1770 = vmatprep.mubr.f32.mxu0 %v5202_v41 }
 0x2f1   : > { %4525 = vmatpush1.bf16.msra.mxu1 %v4524_v20 }
 0x2f2   : > { %1771 = vmatmul.mubr.f32.gmra.mrb[56].mxu0 %v6210_v23  ;;  %v681_v23 = vld [vmem:[#allocation2 + $0x22f] sm:$0xff]  ;;  %4526 = vmatprep.subr.bf16.mxu1 %v7234_v4 }
 0x2f3   : > { %1775 = vmatprep.mubr.f32.mxu0 %v5203_v62  ;;  %v2456_v62 = vld [vmem:[#allocation5 + $0x1a8] sm:$0xff] }
 0x2f4   : > { %v4530_v0 = vpack.c.bf16 %v2456_v62, %v2455_v6  ;;  %v4545_v62 = vpack.c.bf16 %v2466_v24, %v2465_v42 }
 0x2f5   : > { %4528 = vmatpush1.bf16.msra.mxu1 %v4527_v9  ;;  %v6433_v9 = vstv %s5583_s20 }
 0x2f6   : > { %1776 = vmatmul.mubr.f32.gmra.mrb[58].mxu0 %v6216_v11  ;;  %v6373_v11 = vpop.f32.mrb[11].mxu1  ;;  %4529 = vmatprep.subr.bf16.mxu1 %v7234_v4 }
 0x2f7   : > { %1780 = vmatprep.mubr.f32.mxu0 %v712_v12  ;;  %v6376_v46 = vpop.f32.mrb[12].mxu1 }
 0x2f8   : > { %v6378_v15 = vpop.f32.mrb[13].mxu1 }
 0x2f9   : > { %v6381_v30 = vpop.f32.mrb[14].mxu1  ;;  %4531 = vmatpush1.bf16.msra.mxu1 %v4530_v0 }
 0x2fa   : > { %1781 = vmatmul.mubr.f32.gmra.mrb[60].mxu0 %v680_v37  ;;  %v6383_v35 = vpop.f32.mrb[15].mxu1  ;;  %4532 = vmatprep.subr.bf16.mxu1 %v7234_v4  ;;  %v2457_v37 = vld [vmem:[#allocation5 + $0x1b0] sm:$0xff] }
 0x2fb   : > { %1785 = vmatprep.mubr.f32.mxu0 %v713_v36  ;;  %v6386_v3 = vpop.f32.mrb[16].mxu1 }
 0x2fc   : > { %v6388_v18 = vpop.f32.mrb[17].mxu1 }
 0x2fd   : > { %v6391_v55 = vpop.f32.mrb[18].mxu1 }
 0x2fe   : > { %1786 = vmatmul.mubr.f32.gmra.mrb[62].mxu0 %v681_v23  ;;  %v6393_v31 = vpop.f32.mrb[19].mxu1  ;;  %v4533_v23 = vpack.c.bf16 %v2458_v50, %v2457_v37 }
 0x2ff   : > { %v6396_v48 = vpop.f32.mrb[20].mxu1 }
 0x300   : > { %v6398_v29 = vpop.f32.mrb[21].mxu1  ;;  %4534 = vmatpush1.bf16.msra.mxu1 %v4533_v23 }
 0x301   : > { %v6401_v43 = vpop.f32.mrb[22].mxu1  ;;  %4535 = vmatprep.subr.bf16.mxu1 %v7234_v4 }
 0x302   : > { %v6403_v63 = vpop.f32.mrb[23].mxu1 }
 0x303   : > { %v6406_v41 = vpop.f32.mrb[24].mxu1 }
 0x304   : > { %v6408_v12 = vpop.f32.mrb[25].mxu1  ;;  %4537 = vmatpush1.bf16.msra.mxu1 %v4536_v49 }
 0x305   : > { %v6411_v34 = vpop.f32.mrb[26].mxu1  ;;  %4538 = vmatprep.subr.bf16.mxu1 %v7234_v4 }
 0x306   : > { %v6413_v36 = vpop.f32.mrb[27].mxu1 }
 0x308   : > { %v6416_v47 = vpop.f32.mrb[28].mxu1  ;;  %4540 = vmatpush1.bf16.msra.mxu1 %v4539_v54 }
 0x309   : > { %v6418_v2 = vpop.f32.mrb[29].mxu1  ;;  %4541 = vmatprep.subr.bf16.mxu1 %v7234_v4 }
 0x30c   : > { %4543 = vmatpush1.bf16.msra.mxu1 %v4542_v1 }
 0x30d   : > { %4544 = vmatprep.subr.bf16.mxu1 %v7234_v4 }
 0x310   : > { %4546 = vmatpush1.bf16.msra.mxu1 %v4545_v62 }
 0x311   : > { %4547 = vmatprep.subr.bf16.mxu1 %v7234_v4 }
 0x33b   : > { %v6421_v56 = vpop.f32.mrb[30].mxu1 }
 0x33c   : > { %v6423_v8 = vpop.f32.mrb[31].mxu1 }
 0x355   : > { %v1632_v45 = vpop.f32.mrb[0].mxu0 }
 0x356   : > { %v4691_v39 = vadd.f32 %v1632_v45, %v6427_v13  ;;  %v1634_v16 = vpop.f32.mrb[1].mxu0 }
 0x358   : > { %v1858_v20 = vadd.f32 %v4691_v39, %v6321_v17 }
 0x359   : > { %v1637_v6 = vpop.f32.mrb[2].mxu0 }
 0x35a   : > { %v2016_v0 = vmax.f32 %v1858_v20, 0.0  ;;  %v4692_v37 = vadd.f32 %v1637_v6, %v6427_v13  ;;  %v1639_v50 = vpop.f32.mrb[3].mxu0 }
 0x35c   : > { %v2049_v23 = vadd.f32 %v6433_v9, %v2016_v0  ;;  %v1863_v10 = vadd.f32 %v4692_v37, %v6317_v53 }
 0x35d   : > { %v1642_v17 = vpop.f32.mrb[4].mxu0 }
 0x35e   : > { %2082 = vst [vmem:[#allocation3 + $0x28] sm:$0xff] %v2049_v23  ;;  %v2017_v52 = vmax.f32 %v1863_v10, 0.0  ;;  %v4693_v49 = vadd.f32 %v1642_v17, %v6427_v13  ;;  %v1644_v51 = vpop.f32.mrb[5].mxu0  ;;  %2621 = vmatprep.mubr.f32.mxu1 %v2049_v23 }
 0x360   : > { %v2050_v32 = vadd.f32 %v6433_v9, %v2017_v52  ;;  %v1868_v54 = vadd.f32 %v4693_v49, %v6334_v60 }
 0x361   : > { %v1647_v28 = vpop.f32.mrb[6].mxu0 }
 0x362   : > { %2083 = vst [vmem:[#allocation3 + $0x30] sm:$0xff] %v2050_v32  ;;  %v2018_v38 = vmax.f32 %v1868_v54, 0.0  ;;  %v4694_v45 = vadd.f32 %v1647_v28, %v6427_v13  ;;  %v1649_v1 = vpop.f32.mrb[7].mxu0 }
 0x364   : > { %v2051_v53 = vadd.f32 %v6433_v9, %v2018_v38  ;;  %v1873_v39 = vadd.f32 %v4694_v45, %v6330_v59 }
 0x365   : > { %v1652_v16 = vpop.f32.mrb[8].mxu0  ;;  %v6445_v20 = vld [vmem:[#allocation3 + $0x27] sm:$0xff] }
 0x366   : > { %2084 = vst [vmem:[#allocation3 + $0x48] sm:$0xff] %v2051_v53  ;;  %v2019_v42 = vmax.f32 %v1873_v39, 0.0  ;;  %v4695_v24 = vadd.f32 %v1652_v16, %v6427_v13  ;;  %v1654_v6 = vpop.f32.mrb[9].mxu0  ;;  %2622 = vmatmul.mubr.f32.gmra.mrb[36].mxu1 %v6445_v20 }
 0x367   : > { %2626 = vmatprep.mubr.f32.mxu1 %v2050_v32 }
 0x368   : > { %v2052_v60 = vadd.f32 %v6433_v9, %v2019_v42  ;;  %v1878_v62 = vadd.f32 %v4695_v24, %v6346_v61 }
 0x369   : > { %v1657_v0 = vpop.f32.mrb[10].mxu0  ;;  %v6451_v37 = vld [vmem:[#allocation3 + $0x2f] sm:$0xff] }
 0x36a   : > { %2085 = vst [vmem:[#allocation3 + $0x50] sm:$0xff] %v2052_v60  ;;  %v2020_v59 = vmax.f32 %v1878_v62, 0.0  ;;  %v4696_v50 = vadd.f32 %v1657_v0, %v6427_v13  ;;  %v1659_v23 = vpop.f32.mrb[11].mxu0  ;;  %2627 = vmatmul.mubr.f32.gmra.mrb[38].mxu1 %v6451_v37 }
 0x36b   : > { %2631 = vmatprep.mubr.f32.mxu1 %v2051_v53 }
 0x36c   : > { %v2053_v10 = vadd.f32 %v6433_v9, %v2020_v59  ;;  %v1883_v17 = vadd.f32 %v4696_v50, %v6342_v33 }
 0x36d   : > { %v1662_v52 = vpop.f32.mrb[12].mxu0  ;;  %v6457_v49 = vld [vmem:[#allocation3 + $0x47] sm:$0xff] }
 0x36e   : > { %2086 = vst [vmem:[#allocation3 + $0x68] sm:$0xff] %v2053_v10  ;;  %v2021_v61 = vmax.f32 %v1883_v17, 0.0  ;;  %v4697_v51 = vadd.f32 %v1662_v52, %v6427_v13  ;;  %v1664_v32 = vpop.f32.mrb[13].mxu0  ;;  %2632 = vmatmul.mubr.f32.gmra.mrb[40].mxu1 %v6457_v49 }
 0x36f   : > { %2636 = vmatprep.mubr.f32.mxu1 %v2052_v60 }
 0x370   : > { %v2054_v54 = vadd.f32 %v6433_v9, %v2021_v61  ;;  %v1888_v28 = vadd.f32 %v4697_v51, %v6359_v44 }
 0x371   : > { %v1667_v38 = vpop.f32.mrb[14].mxu0  ;;  %v6463_v45 = vld [vmem:[#allocation3 + $0x49] sm:$0xff]  ;;  %v6467_v33 = vld [vmem:[#allocation3 + $0x51] sm:$0xff] }
 0x372   : > { %v6465_v1 = vld [vmem:[#allocation3 + $0x4f] sm:$0xff]  ;;  %2087 = vst [vmem:[#allocation3 + $0x70] sm:$0xff] %v2054_v54  ;;  %v2022_v53 = vmax.f32 %v1888_v28, 0.0  ;;  %v4698_v39 = vadd.f32 %v1667_v38, %v6427_v13  ;;  %v1669_v16 = vpop.f32.mrb[15].mxu0  ;;  %4179 = vmatprep.mubr.f32.mxu0 %v6463_v45 }
 0x373   : > { %2637 = vmatmul.mubr.f32.gmra.mrb[42].mxu1 %v6465_v1  ;;  %4180 = vmatmul.mubr.f32.vlgmr.msra.gmra.mrb[64].mxu0 %v6467_v33 }
 0x374   : > { %2641 = vmatprep.mubr.f32.mxu1 %v2053_v10  ;;  %v2055_v44 = vadd.f32 %v6433_v9, %v2022_v53  ;;  %v1893_v42 = vadd.f32 %v4698_v39, %v6355_v14 }
 0x375   : > { %v1672_v24 = vpop.f32.mrb[16].mxu0  ;;  %v6475_v6 = vld [vmem:[#allocation3 + $0x67] sm:$0xff] }
 0x376   : > { %2088 = vst [vmem:[#allocation3 + $0x88] sm:$0xff] %v2055_v44  ;;  %v2023_v60 = vmax.f32 %v1893_v42, 0.0  ;;  %v4699_v62 = vadd.f32 %v1672_v24, %v6427_v13  ;;  %v1674_v0 = vpop.f32.mrb[17].mxu0 }
 0x377   : > { %2642 = vmatmul.mubr.f32.gmra.mrb[44].mxu1 %v6475_v6 }
 0x378   : > { %2646 = vmatprep.mubr.f32.mxu1 %v2054_v54  ;;  %v2056_v59 = vadd.f32 %v6433_v9, %v2023_v60  ;;  %v1898_v50 = vadd.f32 %v4699_v62, %v6368_v21 }
 0x379   : > { %v1677_v23 = vpop.f32.mrb[18].mxu0  ;;  %v6481_v10 = vld [vmem:[#allocation3 + $0x69] sm:$0xff]  ;;  %v6485_v14 = vld [vmem:[#allocation3 + $0x71] sm:$0xff] }
 0x37a   : > { %v6483_v17 = vld [vmem:[#allocation3 + $0x6f] sm:$0xff]  ;;  %2089 = vst [vmem:[#allocation3 + $0x90] sm:$0xff] %v2056_v59  ;;  %v2024_v52 = vmax.f32 %v1898_v50, 0.0  ;;  %v4700_v61 = vadd.f32 %v1677_v23, %v6427_v13  ;;  %v1679_v51 = vpop.f32.mrb[19].mxu0  ;;  %4182 = vmatprep.mubr.f32.mxu0 %v6481_v10 }
 0x37b   : > { %2647 = vmatmul.mubr.f32.gmra.mrb[46].mxu1 %v6483_v17  ;;  %4183 = vmatmul.mubr.f32.gmra.mrb[66].mxu0 %v6485_v14 }
 0x37c   : > { %2651 = vmatprep.mubr.f32.mxu1 %v2055_v44  ;;  %v2057_v21 = vadd.f32 %v6433_v9, %v2024_v52  ;;  %v1903_v32 = vadd.f32 %v4700_v61, %v6365_v19 }
 0x37d   : > { %v1682_v54 = vpop.f32.mrb[20].mxu0  ;;  %v6493_v28 = vld [vmem:[#allocation3 + $0x87] sm:$0xff] }
 0x37e   : > { %2090 = vst [vmem:[#allocation3 + $0xa8] sm:$0xff] %v2057_v21  ;;  %v2025_v38 = vmax.f32 %v1903_v32, 0.0  ;;  %v4701_v53 = vadd.f32 %v1682_v54, %v6427_v13  ;;  %v1684_v39 = vpop.f32.mrb[21].mxu0 }
 0x37f   : > { %2652 = vmatmul.mubr.f32.gmra.mrb[48].mxu1 %v6493_v28 }
 0x380   : > { %2656 = vmatprep.mubr.f32.mxu1 %v2056_v59  ;;  %v2058_v16 = vadd.f32 %v6433_v9, %v2025_v38  ;;  %v1908_v42 = vadd.f32 %v4701_v53, %v6373_v11 }
 0x381   : > { %v1687_v44 = vpop.f32.mrb[22].mxu0  ;;  %v6499_v24 = vld [vmem:[#allocation3 + $0x89] sm:$0xff]  ;;  %v6503_v19 = vld [vmem:[#allocation3 + $0x91] sm:$0xff] }
 0x382   : > { %v6501_v60 = vld [vmem:[#allocation3 + $0x8f] sm:$0xff]  ;;  %2091 = vst [vmem:[#allocation3 + $0xb0] sm:$0xff] %v2058_v16  ;;  %v2026_v62 = vmax.f32 %v1908_v42, 0.0  ;;  %v4702_v0 = vadd.f32 %v1687_v44, %v6427_v13  ;;  %v1689_v50 = vpop.f32.mrb[23].mxu0  ;;  %4185 = vmatprep.mubr.f32.mxu0 %v6499_v24 }
 0x383   : > { %2657 = vmatmul.mubr.f32.gmra.mrb[50].mxu1 %v6501_v60  ;;  %4186 = vmatmul.mubr.f32.gmra.mrb[68].mxu0 %v6503_v19 }
 0x384   : > { %2661 = vmatprep.mubr.f32.mxu1 %v2057_v21  ;;  %v2059_v11 = vadd.f32 %v6433_v9, %v2026_v62  ;;  %v1913_v59 = vadd.f32 %v4702_v0, %v6371_v5 }
 0x385   : > { %v1692_v23 = vpop.f32.mrb[24].mxu0  ;;  %v6511_v52 = vld [vmem:[#allocation3 + $0xa7] sm:$0xff] }
 0x386   : > { %2092 = vst [vmem:[#allocation3 + $0xc8] sm:$0xff] %v2059_v11  ;;  %v2027_v61 = vmax.f32 %v1913_v59, 0.0  ;;  %v4703_v51 = vadd.f32 %v1692_v23, %v6427_v13  ;;  %v1694_v32 = vpop.f32.mrb[25].mxu0 }
 0x387   : > { %2662 = vmatmul.mubr.f32.gmra.mrb[52].mxu1 %v6511_v52 }
 0x388   : > { %2666 = vmatprep.mubr.f32.mxu1 %v2058_v16  ;;  %v2060_v54 = vadd.f32 %v6433_v9, %v2027_v61  ;;  %v1918_v38 = vadd.f32 %v4703_v51, %v6378_v15 }
 0x389   : > { %v1697_v21 = vpop.f32.mrb[26].mxu0  ;;  %v6517_v53 = vld [vmem:[#allocation3 + $0xa9] sm:$0xff]  ;;  %v6521_v5 = vld [vmem:[#allocation3 + $0xb1] sm:$0xff] }
 0x38a   : > { %v6519_v39 = vld [vmem:[#allocation3 + $0xaf] sm:$0xff]  ;;  %2093 = vst [vmem:[#allocation3 + $0xd0] sm:$0xff] %v2060_v54  ;;  %v2028_v42 = vmax.f32 %v1918_v38, 0.0  ;;  %v4704_v44 = vadd.f32 %v1697_v21, %v6427_v13  ;;  %v1699_v62 = vpop.f32.mrb[27].mxu0  ;;  %4188 = vmatprep.mubr.f32.mxu0 %v6517_v53 }
 0x38b   : > { %2667 = vmatmul.mubr.f32.gmra.mrb[54].mxu1 %v6519_v39  ;;  %4189 = vmatmul.mubr.f32.gmra.mrb[70].mxu0 %v6521_v5 }
 0x38c   : > { %2671 = vmatprep.mubr.f32.mxu1 %v2059_v11  ;;  %v2061_v15 = vadd.f32 %v6433_v9, %v2028_v42  ;;  %v1923_v16 = vadd.f32 %v4704_v44, %v6376_v46 }
 0x38d   : > { %v1702_v0 = vpop.f32.mrb[28].mxu0  ;;  %v6529_v50 = vld [vmem:[#allocation3 + $0xc7] sm:$0xff] }
 0x38e   : > { %2094 = vst [vmem:[#allocation3 + $0xe8] sm:$0xff] %v2061_v15  ;;  %v2029_v59 = vmax.f32 %v1923_v16, 0.0  ;;  %v4705_v23 = vadd.f32 %v1702_v0, %v6427_v13  ;;  %v1704_v61 = vpop.f32.mrb[29].mxu0 }
 0x38f   : > { %2672 = vmatmul.mubr.f32.gmra.mrb[56].mxu1 %v6529_v50 }
 0x390   : > { %2676 = vmatprep.mubr.f32.mxu1 %v2060_v54  ;;  %v2062_v51 = vadd.f32 %v6433_v9, %v2029_v59  ;;  %v1928_v32 = vadd.f32 %v4705_v23, %v6383_v35 }
 0x391   : > { %v1707_v11 = vpop.f32.mrb[30].mxu0  ;;  %v6535_v38 = vld [vmem:[#allocation3 + $0xc9] sm:$0xff]  ;;  %v6539_v46 = vld [vmem:[#allocation3 + $0xd1] sm:$0xff] }
 0x392   : > { %v6537_v21 = vld [vmem:[#allocation3 + $0xcf] sm:$0xff]  ;;  %2095 = vst [vmem:[#allocation3 + $0xf0] sm:$0xff] %v2062_v51  ;;  %v2030_v42 = vmax.f32 %v1928_v32, 0.0  ;;  %v4706_v44 = vadd.f32 %v1707_v11, %v6427_v13  ;;  %v1709_v62 = vpop.f32.mrb[31].mxu0  ;;  %4191 = vmatprep.mubr.f32.mxu0 %v6535_v38 }
 0x393   : > { %2677 = vmatmul.mubr.f32.gmra.mrb[58].mxu1 %v6537_v21  ;;  %4192 = vmatmul.mubr.f32.gmra.mrb[72].mxu0 %v6539_v46 }
 0x394   : > { %2681 = vmatprep.mubr.f32.mxu1 %v2061_v15  ;;  %v2063_v35 = vadd.f32 %v6433_v9, %v2030_v42  ;;  %v1933_v54 = vadd.f32 %v4706_v44, %v6381_v30 }
 0x395   : > { %v1712_v16 = vpop.f32.mrb[32].mxu0  ;;  %v6547_v0 = vld [vmem:[#allocation3 + $0xe7] sm:$0xff] }
 0x396   : > { %2096 = vst [vmem:[#allocation3 + $0x108] sm:$0xff] %v2063_v35  ;;  %v2031_v59 = vmax.f32 %v1933_v54, 0.0  ;;  %v4707_v23 = vadd.f32 %v1712_v16, %v6427_v13  ;;  %v1714_v61 = vpop.f32.mrb[33].mxu0 }
 0x397   : > { %2682 = vmatmul.mubr.f32.gmra.mrb[60].mxu1 %v6547_v0 }
 0x398   : > { %2686 = vmatprep.mubr.f32.mxu1 %v2062_v51  ;;  %v2064_v32 = vadd.f32 %v6433_v9, %v2031_v59  ;;  %v1938_v11 = vadd.f32 %v4707_v23, %v6388_v18 }
 0x399   : > { %v1717_v15 = vpop.f32.mrb[34].mxu0  ;;  %v6553_v62 = vld [vmem:[#allocation3 + $0xe9] sm:$0xff]  ;;  %v6557_v30 = vld [vmem:[#allocation3 + $0xf1] sm:$0xff] }
 0x39a   : > { %v6555_v42 = vld [vmem:[#allocation3 + $0xef] sm:$0xff]  ;;  %2097 = vst [vmem:[#allocation3 + $0x110] sm:$0xff] %v2064_v32  ;;  %v2032_v44 = vmax.f32 %v1938_v11, 0.0  ;;  %v4708_v54 = vadd.f32 %v1717_v15, %v6427_v13  ;;  %v1719_v16 = vpop.f32.mrb[35].mxu0  ;;  %4194 = vmatprep.mubr.f32.mxu0 %v6553_v62 }
 0x39b   : > { %2687 = vmatmul.mubr.f32.gmra.mrb[62].mxu1 %v6555_v42  ;;  %4195 = vmatmul.mubr.f32.gmra.mrb[74].mxu0 %v6557_v30 }
 0x39c   : > { %2691 = vmatprep.mubr.f32.mxu1 %v2063_v35  ;;  %v2065_v18 = vadd.f32 %v6433_v9, %v2032_v44  ;;  %v1943_v51 = vadd.f32 %v4708_v54, %v6386_v3 }
 0x39d   : > { %v1722_v59 = vpop.f32.mrb[36].mxu0  ;;  %v6565_v23 = vld [vmem:[#allocation3 + $0x107] sm:$0xff] }
 0x39e   : > { %2098 = vst [vmem:[#allocation3 + $0x128] sm:$0xff] %v2065_v18  ;;  %v2033_v61 = vmax.f32 %v1943_v51, 0.0  ;;  %v4709_v11 = vadd.f32 %v1722_v59, %v6427_v13  ;;  %v1724_v15 = vpop.f32.mrb[37].mxu0 }
 0x39f   : > { %2692 = vmatmul.mubr.f32.gmra.mrb[64].mxu1 %v6565_v23 }
 0x3a0   : > { %2696 = vmatprep.mubr.f32.mxu1 %v2064_v32  ;;  %v2066_v16 = vadd.f32 %v6433_v9, %v2033_v61  ;;  %v1948_v4 = vadd.f32 %v4709_v11, %v6393_v31 }
 0x3a1   : > { %v1727_v35 = vpop.f32.mrb[38].mxu0  ;;  %v6571_v40 = vld [vmem:[#allocation3 + $0x109] sm:$0xff]  ;;  %v6575_v3 = vld [vmem:[#allocation3 + $0x111] sm:$0xff] }
 0x3a2   : > { %v6573_v44 = vld [vmem:[#allocation3 + $0x10f] sm:$0xff]  ;;  %2099 = vst [vmem:[#allocation3 + $0x130] sm:$0xff] %v2066_v16  ;;  %v2034_v54 = vmax.f32 %v1948_v4, 0.0  ;;  %v4710_v51 = vadd.f32 %v1727_v35, %v6427_v13  ;;  %v1729_v59 = vpop.f32.mrb[39].mxu0  ;;  %4197 = vmatprep.mubr.f32.mxu0 %v6571_v40 }
 0x3a3   : > { %2697 = vmatmul.mubr.f32.gmra.mrb[66].mxu1 %v6573_v44  ;;  %4198 = vmatmul.mubr.f32.gmra.mrb[76].mxu0 %v6575_v3 }
 0x3a4   : > { %2701 = vmatprep.mubr.f32.mxu1 %v2065_v18  ;;  %v2067_v31 = vadd.f32 %v6433_v9, %v2034_v54  ;;  %v1953_v32 = vadd.f32 %v4710_v51, %v6391_v55 }
 0x3a5   : > { %v1732_v61 = vpop.f32.mrb[40].mxu0  ;;  %v6583_v11 = vld [vmem:[#allocation3 + $0x127] sm:$0xff] }
 0x3a6   : > { %2100 = vst [vmem:[#allocation3 + $0x148] sm:$0xff] %v2067_v31  ;;  %v2035_v15 = vmax.f32 %v1953_v32, 0.0  ;;  %v4711_v4 = vadd.f32 %v1732_v61, %v6427_v13  ;;  %v1734_v35 = vpop.f32.mrb[41].mxu0 }
 0x3a7   : > { %2702 = vmatmul.mubr.f32.gmra.mrb[68].mxu1 %v6583_v11 }
 0x3a8   : > { %2706 = vmatprep.mubr.f32.mxu1 %v2066_v16  ;;  %v2068_v59 = vadd.f32 %v6433_v9, %v2035_v15  ;;  %v1958_v22 = vadd.f32 %v4711_v4, %v6398_v29 }
 0x3a9   : > { %v1737_v18 = vpop.f32.mrb[42].mxu0  ;;  %v6589_v27 = vld [vmem:[#allocation3 + $0x129] sm:$0xff]  ;;  %v6593_v55 = vld [vmem:[#allocation3 + $0x131] sm:$0xff] }
 0x3aa   : > { %v6591_v54 = vld [vmem:[#allocation3 + $0x12f] sm:$0xff]  ;;  %2101 = vst [vmem:[#allocation3 + $0x150] sm:$0xff] %v2068_v59  ;;  %v2036_v51 = vmax.f32 %v1958_v22, 0.0  ;;  %v4712_v32 = vadd.f32 %v1737_v18, %v6427_v13  ;;  %v1739_v61 = vpop.f32.mrb[43].mxu0  ;;  %4200 = vmatprep.mubr.f32.mxu0 %v6589_v27 }
 0x3ab   : > { %2707 = vmatmul.mubr.f32.gmra.mrb[70].mxu1 %v6591_v54  ;;  %4201 = vmatmul.mubr.f32.gmra.mrb[78].mxu0 %v6593_v55 }
 0x3ac   : > { %2711 = vmatprep.mubr.f32.mxu1 %v2067_v31  ;;  %v2069_v29 = vadd.f32 %v6433_v9, %v2036_v51  ;;  %v1963_v16 = vadd.f32 %v4712_v32, %v6396_v48 }
 0x3ad   : > { %v1742_v15 = vpop.f32.mrb[44].mxu0  ;;  %v6601_v4 = vld [vmem:[#allocation3 + $0x147] sm:$0xff] }
 0x3ae   : > { %2102 = vst [vmem:[#allocation3 + $0x168] sm:$0xff] %v2069_v29  ;;  %v2037_v35 = vmax.f32 %v1963_v16, 0.0  ;;  %v4713_v22 = vadd.f32 %v1742_v15, %v6427_v13  ;;  %v1744_v18 = vpop.f32.mrb[45].mxu0 }
 0x3af   : > { %2712 = vmatmul.mubr.f32.gmra.mrb[72].mxu1 %v6601_v4 }
 0x3b0   : > { %2716 = vmatprep.mubr.f32.mxu1 %v2068_v59  ;;  %v2070_v61 = vadd.f32 %v6433_v9, %v2037_v35  ;;  %v1968_v7 = vadd.f32 %v4713_v22, %v6403_v63 }
 0x3b1   : > { %v1747_v31 = vpop.f32.mrb[46].mxu0  ;;  %v6607_v58 = vld [vmem:[#allocation3 + $0x149] sm:$0xff]  ;;  %v6611_v48 = vld [vmem:[#allocation3 + $0x151] sm:$0xff] }
 0x3b2   : > { %v6609_v51 = vld [vmem:[#allocation3 + $0x14f] sm:$0xff]  ;;  %2103 = vst [vmem:[#allocation3 + $0x170] sm:$0xff] %v2070_v61  ;;  %v2038_v32 = vmax.f32 %v1968_v7, 0.0  ;;  %v4714_v16 = vadd.f32 %v1747_v31, %v6427_v13  ;;  %v1749_v15 = vpop.f32.mrb[47].mxu0  ;;  %4203 = vmatprep.mubr.f32.mxu0 %v6607_v58 }
 0x3b3   : > { %2717 = vmatmul.mubr.f32.gmra.mrb[74].mxu1 %v6609_v51  ;;  %4204 = vmatmul.mubr.f32.gmra.mrb[80].mxu0 %v6611_v48 }
 0x3b4   : > { %2721 = vmatprep.mubr.f32.mxu1 %v2069_v29  ;;  %v2071_v63 = vadd.f32 %v6433_v9, %v2038_v32  ;;  %v1973_v59 = vadd.f32 %v4714_v16, %v6401_v43 }
 0x3b5   : > { %v1752_v35 = vpop.f32.mrb[48].mxu0  ;;  %v6619_v22 = vld [vmem:[#allocation3 + $0x167] sm:$0xff] }
 0x3b6   : > { %2104 = vst [vmem:[#allocation3 + $0x188] sm:$0xff] %v2071_v63  ;;  %v2039_v18 = vmax.f32 %v1973_v59, 0.0  ;;  %v4715_v7 = vadd.f32 %v1752_v35, %v6427_v13  ;;  %v1754_v31 = vpop.f32.mrb[49].mxu0 }
 0x3b7   : > { %2722 = vmatmul.mubr.f32.gmra.mrb[76].mxu1 %v6619_v22 }
 0x3b8   : > { %2726 = vmatprep.mubr.f32.mxu1 %v2070_v61  ;;  %v2072_v15 = vadd.f32 %v6433_v9, %v2039_v18  ;;  %v1978_v57 = vadd.f32 %v4715_v7, %v6408_v12 }
 0x3b9   : > { %v1757_v29 = vpop.f32.mrb[50].mxu0  ;;  %v6625_v26 = vld [vmem:[#allocation3 + $0x169] sm:$0xff]  ;;  %v6629_v43 = vld [vmem:[#allocation3 + $0x171] sm:$0xff] }
 0x3ba   : > { %v6627_v32 = vld [vmem:[#allocation3 + $0x16f] sm:$0xff]  ;;  %7288 = vst [vmem:[#allocation33_spill] sm:$0xff] %v6629_v43  ;;  %2105 = vst [vmem:[#allocation3 + $0x190] sm:$0xff] %v2072_v15  ;;  %v2040_v16 = vmax.f32 %v1978_v57, 0.0  ;;  %v4716_v59 = vadd.f32 %v1757_v29, %v6427_v13  ;;  %v1759_v35 = vpop.f32.mrb[51].mxu0  ;;  %4206 = vmatprep.mubr.f32.mxu0 %v6625_v26 }
 0x3bb   : > { %2727 = vmatmul.mubr.f32.gmra.mrb[78].mxu1 %v6627_v32  ;;  %4207 = vmatmul.mubr.f32.gmra.mrb[82].mxu0 %v6629_v43 }
 0x3bc   : > { %2731 = vmatprep.mubr.f32.mxu1 %v2071_v63  ;;  %v2073_v12 = vadd.f32 %v6433_v9, %v2040_v16  ;;  %v1983_v61 = vadd.f32 %v4716_v59, %v6406_v41 }
 0x3bd   : > { %v1762_v18 = vpop.f32.mrb[52].mxu0  ;;  %v6637_v7 = vld [vmem:[#allocation3 + $0x187] sm:$0xff] }
 0x3be   : > { %2106 = vst [vmem:[#allocation3 + $0x1a8] sm:$0xff] %v2073_v12  ;;  %v2041_v31 = vmax.f32 %v1983_v61, 0.0  ;;  %v4717_v57 = vadd.f32 %v1762_v18, %v6427_v13  ;;  %v1764_v29 = vpop.f32.mrb[53].mxu0 }
 0x3bf   : > { %2732 = vmatmul.mubr.f32.gmra.mrb[80].mxu1 %v6637_v7 }
 0x3c0   : > { %2736 = vmatprep.mubr.f32.mxu1 %v2072_v15  ;;  %v2074_v35 = vadd.f32 %v6433_v9, %v2041_v31  ;;  %v1988_v25 = vadd.f32 %v4717_v57, %v6413_v36 }
 0x3c1   : > { %v1767_v63 = vpop.f32.mrb[54].mxu0  ;;  %v6643_v43 = vld [vmem:[#allocation3 + $0x189] sm:$0xff]  ;;  %v6647_v41 = vld [vmem:[#allocation3 + $0x191] sm:$0xff] }
 0x3c2   : > { %v6645_v16 = vld [vmem:[#allocation3 + $0x18f] sm:$0xff]  ;;  %7289 = vst [vmem:[#allocation34_spill] sm:$0xff] %v6647_v41  ;;  %2107 = vst [vmem:[#allocation3 + $0x1b0] sm:$0xff] %v2074_v35  ;;  %v2042_v59 = vmax.f32 %v1988_v25, 0.0  ;;  %v4718_v61 = vadd.f32 %v1767_v63, %v6427_v13  ;;  %v1769_v18 = vpop.f32.mrb[55].mxu0  ;;  %4209 = vmatprep.mubr.f32.mxu0 %v6643_v43 }
 0x3c3   : > { %2737 = vmatmul.mubr.f32.gmra.mrb[82].mxu1 %v6645_v16  ;;  %4210 = vmatmul.mubr.f32.gmra.mrb[84].mxu0 %v6647_v41 }
 0x3c4   : > { %2741 = vmatprep.mubr.f32.mxu1 %v2073_v12  ;;  %v6654_v36 = vadd.f32 %v6433_v9, %v2042_v59  ;;  %v1993_v15 = vadd.f32 %v4718_v61, %v6411_v34 }
 0x3c5   : > { %v1772_v31 = vpop.f32.mrb[56].mxu0  ;;  %v6657_v57 = vld [vmem:[#allocation3 + $0x1a7] sm:$0xff] }
 0x3c6   : > { %7290 = vst [vmem:[#allocation35_spill] sm:$0xff] %v6654_v36  ;;  %2108 = vst [vmem:[#allocation3 + $0x1c8] sm:$0xff] %v6654_v36  ;;  %v2043_v25 = vmax.f32 %v1993_v15, 0.0  ;;  %v4719_v29 = vadd.f32 %v1772_v31, %v6427_v13  ;;  %v1774_v63 = vpop.f32.mrb[57].mxu0 }
 0x3c7   : > { %2742 = vmatmul.mubr.f32.gmra.mrb[84].mxu1 %v6657_v57 }
 0x3c8   : > { %2746 = vmatprep.mubr.f32.mxu1 %v2074_v35  ;;  %v6663_v18 = vadd.f32 %v6433_v9, %v2043_v25  ;;  %v1998_v12 = vadd.f32 %v4719_v29, %v6418_v2 }
 0x3c9   : > { %v1777_v59 = vpop.f32.mrb[58].mxu0  ;;  %v6666_v41 = vld [vmem:[#allocation3 + $0x1a9] sm:$0xff]  ;;  %v6670_v61 = vld [vmem:[#allocation3 + $0x1b1] sm:$0xff] }
 0x3ca   : > { %7291 = vst [vmem:[#allocation36_spill] sm:$0xff] %v6666_v41  ;;  %v6668_v34 = vld [vmem:[#allocation3 + $0x1af] sm:$0xff]  ;;  %7292 = vst [vmem:[#allocation37_spill] sm:$0xff] %v6670_v61  ;;  %v2044_v15 = vmax.f32 %v1998_v12, 0.0  ;;  %v4720_v31 = vadd.f32 %v1777_v59, %v6427_v13  ;;  %v1779_v63 = vpop.f32.mrb[59].mxu0  ;;  %4212 = vmatprep.mubr.f32.mxu0 %v6666_v41 }
 0x3cb   : > { %2109 = vst [vmem:[#allocation3 + $0x1d0] sm:$0xff] %v6663_v18  ;;  %2747 = vmatmul.mubr.f32.gmra.mrb[86].mxu1 %v6668_v34  ;;  %4213 = vmatmul.mubr.f32.gmra.mrb[86].mxu0 %v6670_v61 }
 0x3cc   : > { %2751 = vmatprep.mubr.f32.mxu1 %v6654_v36  ;;  %v6679_v2 = vadd.f32 %v6433_v9, %v2044_v15  ;;  %v2003_v35 = vadd.f32 %v4720_v31, %v6416_v47 }
 0x3cd   : > { %v1782_v25 = vpop.f32.mrb[60].mxu0  ;;  %v6682_v29 = vld [vmem:[#allocation3 + $0x1c7] sm:$0xff] }
 0x3ce   : > { %2110 = vst [vmem:[#allocation3 + $0x1e8] sm:$0xff] %v6679_v2  ;;  %v2045_v12 = vmax.f32 %v2003_v35, 0.0  ;;  %v4721_v59 = vadd.f32 %v1782_v25, %v6427_v13  ;;  %v1784_v63 = vpop.f32.mrb[61].mxu0 }
 0x3cf   : > { %2752 = vmatmul.mubr.f32.gmra.mrb[88].mxu1 %v6682_v29 }
 0x3d0   : > { %2756 = vmatprep.mubr.f32.mxu1 %v6663_v18  ;;  %v6689_v36 = vadd.f32 %v6433_v9, %v2045_v12  ;;  %v2008_v15 = vadd.f32 %v4721_v59, %v6423_v8 }
 0x3d1   : > { %v1787_v61 = vpop.f32.mrb[62].mxu0 }
 0x3d2   : > { %7293 = vst [vmem:[#allocation38_spill] sm:$0xff] %v6689_v36  ;;  %v6692_v47 = vld [vmem:[#allocation3 + $0x1cf] sm:$0xff]  ;;  %2111 = vst [vmem:[#allocation3 + $0x1f0] sm:$0xff] %v6689_v36  ;;  %v2046_v31 = vmax.f32 %v2008_v15, 0.0  ;;  %v4722_v35 = vadd.f32 %v1787_v61, %v6427_v13  ;;  %v1789_v41 = vpop.f32.mrb[63].mxu0 }
 0x3d3   : > { %2757 = vmatmul.mubr.f32.gmra.mrb[90].mxu1 %v6692_v47  ;;  %v2467_v41 = vld [vmem:[#allocation5 + $0x200] sm:$0xff]  ;;  %v2468_v61 = vld [vmem:[#allocation5 + $0x208] sm:$0xff] }
 0x3d4   : > { %2761 = vmatprep.mubr.f32.mxu1 %v6679_v2  ;;  %v6699_v25 = vadd.f32 %v6433_v9, %v2046_v31  ;;  %v2013_v12 = vadd.f32 %v4722_v35, %v6421_v56  ;;  %v2178_v56 = vld [vmem:[#allocation3 + $0x9] sm:$0xff]  ;;  %v4548_v15 = vpack.c.bf16 %v2468_v61, %v2467_v41  ;;  %v2470_v35 = vld [vmem:[#allocation5 + $0x218] sm:$0xff] }
 0x3d5   : > { %v6702_v63 = vld [vmem:[#allocation3 + $0x1e7] sm:$0xff]  ;;  %v2469_v31 = vld [vmem:[#allocation5 + $0x210] sm:$0xff]  ;;  %v2474_v41 = vld [vmem:[#allocation5 + $0x238] sm:$0xff] }
 0x3d6   : > { %7294 = vst [vmem:[#allocation39_spill] sm:$0xff] %v6699_v25  ;;  %2112 = vst [vmem:[#allocation3 + $0x208] sm:$0xff] %v6699_v25  ;;  %v2047_v8 = vmax.f32 %v2013_v12, 0.0  ;;  %v4551_v12 = vpack.c.bf16 %v2470_v35, %v2469_v31  ;;  %v2471_v25 = vld [vmem:[#allocation5 + $0x220] sm:$0xff]  ;;  %v6719_v61 = vld [vmem:[#allocation3 + $0x29] sm:$0xff] }
 0x3d7   : > { %2762 = vmatmul.mubr.f32.gmra.mrb[92].mxu1 %v6702_v63  ;;  %v6724_v31 = vld [vmem:[#allocation3 + $0x31] sm:$0xff]  ;;  %v2480_v35 = vld [vmem:[#allocation5 + $0x268] sm:$0xff] }
 0x3d8   : > { %2766 = vmatprep.mubr.f32.mxu1 %v6689_v36  ;;  %v6708_v13 = vadd.f32 %v6433_v9, %v2047_v8  ;;  %v2179_v9 = vld [vmem:[#allocation3 + $0x11] sm:$0xff]  ;;  %v7296_v8 = vmov 0.0|0.0   ;;  %v2472_v36 = vld [vmem:[#allocation5 + $0x228] sm:$0xff] }
 0x3d9   : > { %v6710_v59 = vld [vmem:[#allocation3 + $0x1ef] sm:$0xff] }
 0x3da   : > { %7295 = vst [vmem:[#allocation40_spill] sm:$0xff] %v6708_v13  ;;  %2113 = vst [vmem:[#allocation3 + $0x210] sm:$0xff] %v6708_v13  ;;  %v4554_v13 = vpack.c.bf16 %v2472_v36, %v2471_v25  ;;  %v2477_v36 = vld [vmem:[#allocation5 + $0x250] sm:$0xff]  ;;  %v2478_v25 = vld [vmem:[#allocation5 + $0x258] sm:$0xff] }
 0x3db   : > { %2767 = vmatmul.mubr.f32.gmra.mrb[94].mxu1 %v6710_v59 }
 0x3dc   : > { %2836 = vmatprep.mubr.f32.mxu1 %v6445_v20  ;;  %v2473_v20 = vld [vmem:[#allocation5 + $0x230] sm:$0xff] }
 0x3df   : > { %2837 = vmatmul.mubr.f32.vlgmr.msra.gmra.mrb[32].mxu1 %v2178_v56  ;;  %v2475_v56 = vld [vmem:[#allocation5 + $0x240] sm:$0xff] }
 0x3e0   : > { %2841 = vmatprep.mubr.f32.mxu1 %v6451_v37  ;;  %4549 = vmatpush1.bf16.msra.mxu1 %v4548_v15  ;;  %v4557_v37 = vpack.c.bf16 %v2474_v41, %v2473_v20  ;;  %v2476_v15 = vld [vmem:[#allocation5 + $0x248] sm:$0xff]  ;;  %v2486_v41 = vld [vmem:[#allocation5 + $0x298] sm:$0xff] }
 0x3e1   : > { %4550 = vmatprep.subr.bf16.mxu1 %v7296_v8  ;;  %v2484_v20 = vld [vmem:[#allocation5 + $0x288] sm:$0xff] }
 0x3e3   : > { %2842 = vmatmul.mubr.f32.gmra.mrb[34].mxu1 %v2179_v9  ;;  %v2481_v9 = vld [vmem:[#allocation5 + $0x270] sm:$0xff] }
 0x3e4   : > { %2846 = vmatprep.mubr.f32.mxu1 %v6457_v49  ;;  %4552 = vmatpush1.bf16.msra.mxu1 %v4551_v12  ;;  %v4560_v49 = vpack.c.bf16 %v2476_v15, %v2475_v56  ;;  %v2482_v12 = vld [vmem:[#allocation5 + $0x278] sm:$0xff]  ;;  %v2492_v15 = vld [vmem:[#allocation5 + $0x2c8] sm:$0xff] }
 0x3e5   : > { %4553 = vmatprep.subr.bf16.mxu1 %v7296_v8  ;;  %v2490_v56 = vld [vmem:[#allocation5 + $0x2b8] sm:$0xff] }
 0x3e7   : > { %2847 = vmatmul.mubr.f32.gmra.mrb[36].mxu1 %v6719_v61 }
 0x3e8   : > { %2851 = vmatprep.mubr.f32.mxu1 %v6465_v1  ;;  %4555 = vmatpush1.bf16.msra.mxu1 %v4554_v13  ;;  %v4563_v1 = vpack.c.bf16 %v2478_v25, %v2477_v36  ;;  %v2479_v13 = vld [vmem:[#allocation5 + $0x260] sm:$0xff]  ;;  %v2496_v36 = vld [vmem:[#allocation5 + $0x2e8] sm:$0xff]  ;;  %v2498_v25 = vld [vmem:[#allocation5 + $0x2f8] sm:$0xff] }
 0x3e9   : > { %4556 = vmatprep.subr.bf16.mxu1 %v7296_v8 }
 0x3eb   : > { %2852 = vmatmul.mubr.f32.gmra.mrb[38].mxu1 %v6724_v31 }
 0x3ec   : > { %2856 = vmatprep.mubr.f32.mxu1 %v6475_v6  ;;  %4558 = vmatpush1.bf16.msra.mxu1 %v4557_v37  ;;  %v4566_v6 = vpack.c.bf16 %v2480_v35, %v2479_v13  ;;  %v2488_v37 = vld [vmem:[#allocation5 + $0x2a8] sm:$0xff]  ;;  %v2503_v13 = vld [vmem:[#allocation5 + $0x320] sm:$0xff] }
 0x3ed   : > { %4559 = vmatprep.subr.bf16.mxu1 %v7296_v8  ;;  %v2504_v35 = vld [vmem:[#allocation5 + $0x328] sm:$0xff] }
 0x3ef   : > { %2857 = vmatmul.mubr.f32.gmra.mrb[40].mxu1 %v6463_v45  ;;  %v4569_v45 = vpack.c.bf16 %v2482_v12, %v2481_v9  ;;  %v4602_v9 = vpack.c.bf16 %v2504_v35, %v2503_v13  ;;  %v2505_v12 = vld [vmem:[#allocation5 + $0x330] sm:$0xff] }
 0x3f0   : > { %2861 = vmatprep.mubr.f32.mxu1 %v6483_v17  ;;  %4561 = vmatpush1.bf16.msra.mxu1 %v4560_v49  ;;  %v2483_v17 = vld [vmem:[#allocation5 + $0x280] sm:$0xff]  ;;  %v2494_v49 = vld [vmem:[#allocation5 + $0x2d8] sm:$0xff]  ;;  %v2282_v13 = vld [vmem:[#allocation3 + $0xa9] sm:$0xff] }
 0x3f1   : > { %4562 = vmatprep.subr.bf16.mxu1 %v7296_v8 }
 0x3f3   : > { %2862 = vmatmul.mubr.f32.gmra.mrb[42].mxu1 %v6467_v33  ;;  %v4572_v33 = vpack.c.bf16 %v2484_v20, %v2483_v17  ;;  %v6828_v17 = vld [vmem:[#allocation3 + $0x48] sm:$0xff] }
 0x3f4   : > { %2866 = vmatprep.mubr.f32.mxu1 %v6493_v28  ;;  %4564 = vmatpush1.bf16.msra.mxu1 %v4563_v1  ;;  %v2485_v28 = vld [vmem:[#allocation5 + $0x290] sm:$0xff] }
 0x3f5   : > { %4565 = vmatprep.subr.bf16.mxu1 %v7296_v8 }
 0x3f7   : > { %2867 = vmatmul.mubr.f32.gmra.mrb[44].mxu1 %v6481_v10  ;;  %v4575_v10 = vpack.c.bf16 %v2486_v41, %v2485_v28  ;;  %v2507_v41 = vld [vmem:[#allocation5 + $0x340] sm:$0xff] }
 0x3f8   : > { %2871 = vmatprep.mubr.f32.mxu1 %v6501_v60  ;;  %4567 = vmatpush1.bf16.msra.mxu1 %v4566_v6  ;;  %v2487_v60 = vld [vmem:[#allocation5 + $0x2a0] sm:$0xff]  ;;  %v2243_v6 = vld [vmem:[#allocation3 + $0x30] sm:$0xff] }
 0x3f9   : > { %4568 = vmatprep.subr.bf16.mxu1 %v7296_v8 }
 0x3fb   : > { %2872 = vmatmul.mubr.f32.gmra.mrb[46].mxu1 %v6485_v14  ;;  %v4578_v14 = vpack.c.bf16 %v2488_v37, %v2487_v60  ;;  %v6836_v60 = vld [vmem:[#allocation3 + $0x50] sm:$0xff] }
 0x3fc   : > { %2876 = vmatprep.mubr.f32.mxu1 %v6511_v52  ;;  %4570 = vmatpush1.bf16.msra.mxu1 %v4569_v45  ;;  %v2489_v52 = vld [vmem:[#allocation5 + $0x2b0] sm:$0xff]  ;;  %v2506_v45 = vld [vmem:[#allocation5 + $0x338] sm:$0xff] }
 0x3fd   : > { %4571 = vmatprep.subr.bf16.mxu1 %v7296_v8  ;;  %v4605_v28 = vpack.c.bf16 %v2506_v45, %v2505_v12  ;;  %v2278_v37 = vld [vmem:[#allocation3 + $0x69] sm:$0xff]  ;;  %v2283_v45 = vld [vmem:[#allocation3 + $0xb1] sm:$0xff] }
 0x3ff   : > { %2877 = vmatmul.mubr.f32.gmra.mrb[48].mxu1 %v6499_v24  ;;  %v4581_v24 = vpack.c.bf16 %v2490_v56, %v2489_v52  ;;  %v2509_v52 = vld [vmem:[#allocation5 + $0x350] sm:$0xff]  ;;  %v2510_v56 = vld [vmem:[#allocation5 + $0x358] sm:$0xff] }
 0x400   : > { %2881 = vmatprep.mubr.f32.mxu1 %v6519_v39  ;;  %4573 = vmatpush1.bf16.msra.mxu1 %v4572_v33  ;;  %v2491_v39 = vld [vmem:[#allocation5 + $0x2c0] sm:$0xff] }
 0x401   : > { %4574 = vmatprep.subr.bf16.mxu1 %v7296_v8 }
 0x403   : > { %2882 = vmatmul.mubr.f32.gmra.mrb[50].mxu1 %v6503_v19  ;;  %v4584_v19 = vpack.c.bf16 %v2492_v15, %v2491_v39  ;;  %v2279_v15 = vld [vmem:[#allocation3 + $0x71] sm:$0xff] }
 0x404   : > { %2886 = vmatprep.mubr.f32.mxu1 %v6529_v50  ;;  %4576 = vmatpush1.bf16.msra.mxu1 %v4575_v10  ;;  %v2493_v50 = vld [vmem:[#allocation5 + $0x2d0] sm:$0xff]  ;;  %v2508_v10 = vld [vmem:[#allocation5 + $0x348] sm:$0xff] }
 0x405   : > { %4577 = vmatprep.subr.bf16.mxu1 %v7296_v8 }
 0x407   : > { %2887 = vmatmul.mubr.f32.gmra.mrb[52].mxu1 %v6517_v53  ;;  %v4587_v53 = vpack.c.bf16 %v2494_v49, %v2493_v50  ;;  %v4611_v50 = vpack.c.bf16 %v2510_v56, %v2509_v52  ;;  %v2511_v49 = vld [vmem:[#allocation5 + $0x360] sm:$0xff]  ;;  %v2521_v56 = vld [vmem:[#allocation5 + $0x3b0] sm:$0xff] }
 0x408   : > { %2891 = vmatprep.mubr.f32.mxu1 %v6537_v21  ;;  %4579 = vmatpush1.bf16.msra.mxu1 %v4578_v14  ;;  %v2495_v21 = vld [vmem:[#allocation5 + $0x2e0] sm:$0xff]  ;;  %v4608_v14 = vpack.c.bf16 %v2508_v10, %v2507_v41  ;;  %v2520_v10 = vld [vmem:[#allocation5 + $0x3a8] sm:$0xff] }
 0x409   : > { %4580 = vmatprep.subr.bf16.mxu1 %v7296_v8  ;;  %v2519_v41 = vld [vmem:[#allocation5 + $0x3a0] sm:$0xff] }
 0x40a   : > { %v4626_v52 = vpack.c.bf16 %v2520_v10, %v2519_v41  ;;  %v2527_v41 = vld [vmem:[#allocation5 + $0x3e0] sm:$0xff]  ;;  %v2528_v10 = vld [vmem:[#allocation5 + $0x3e8] sm:$0xff] }
 0x40b   : > { %2892 = vmatmul.mubr.f32.gmra.mrb[54].mxu1 %v6521_v5  ;;  %v4590_v5 = vpack.c.bf16 %v2496_v36, %v2495_v21  ;;  %v6848_v21 = vld [vmem:[#allocation3 + $0x70] sm:$0xff] }
 0x40c   : > { %2896 = vmatprep.mubr.f32.mxu1 %v6547_v0  ;;  %4582 = vmatpush1.bf16.msra.mxu1 %v4581_v24  ;;  %v2497_v0 = vld [vmem:[#allocation5 + $0x2f0] sm:$0xff]  ;;  %v6840_v24 = vld [vmem:[#allocation3 + $0x68] sm:$0xff] }
 0x40d   : > { %4583 = vmatprep.subr.bf16.mxu1 %v7296_v8  ;;  %v2280_v36 = vld [vmem:[#allocation3 + $0x89] sm:$0xff] }
 0x40f   : > { %2897 = vmatmul.mubr.f32.gmra.mrb[56].mxu1 %v6535_v38  ;;  %v4593_v38 = vpack.c.bf16 %v2498_v25, %v2497_v0  ;;  %v2513_v0 = vld [vmem:[#allocation5 + $0x370] sm:$0xff]  ;;  %v2514_v25 = vld [vmem:[#allocation5 + $0x378] sm:$0xff] }
 0x410   : > { %2901 = vmatprep.mubr.f32.mxu1 %v6555_v42  ;;  %4585 = vmatpush1.bf16.msra.mxu1 %v4584_v19 }
 0x411   : > { %4586 = vmatprep.subr.bf16.mxu1 %v7296_v8 }
 0x413   : > { %2902 = vmatmul.mubr.f32.gmra.mrb[58].mxu1 %v6539_v46 }
 0x414   : > { %2906 = vmatprep.mubr.f32.mxu1 %v6565_v23  ;;  %4588 = vmatpush1.bf16.msra.mxu1 %v4587_v53  ;;  %v6793_v23 = vld [vmem:[#allocation3 + $0x1c9] sm:$0xff] }
 0x415   : > { %4589 = vmatprep.subr.bf16.mxu1 %v7296_v8  ;;  %v2512_v53 = vld [vmem:[#allocation5 + $0x368] sm:$0xff] }
 0x417   : > { %2907 = vmatmul.mubr.f32.gmra.mrb[60].mxu1 %v6553_v62  ;;  %v7299_v62 = vld [vmem:[#allocation36_spill] sm:$0xff] }
 0x418   : > { %2911 = vmatprep.mubr.f32.mxu1 %v6573_v44  ;;  %4591 = vmatpush1.bf16.msra.mxu1 %v4590_v5  ;;  %v4614_v5 = vpack.c.bf16 %v2512_v53, %v2511_v49  ;;  %v2285_v53 = vld [vmem:[#allocation3 + $0xd1] sm:$0xff] }
 0x419   : > { %4592 = vmatprep.subr.bf16.mxu1 %v7296_v8 }
 0x41b   : > { %2912 = vmatmul.mubr.f32.gmra.mrb[62].mxu1 %v6557_v30  ;;  %v7300_v30 = vld [vmem:[#allocation37_spill] sm:$0xff] }
 0x41c   : > { %2916 = vmatprep.mubr.f32.mxu1 %v6583_v11  ;;  %4594 = vmatpush1.bf16.msra.mxu1 %v4593_v38  ;;  %v6801_v11 = vld [vmem:[#allocation3 + $0x1d1] sm:$0xff]  ;;  %v6852_v38 = vld [vmem:[#allocation3 + $0x88] sm:$0xff] }
 0x41d   : > { %4595 = vmatprep.subr.bf16.mxu1 %v7296_v8 }
 0x41f   : > { %2917 = vmatmul.mubr.f32.gmra.mrb[64].mxu1 %v6571_v40  ;;  %v7297_v40 = vld [vmem:[#allocation33_spill] sm:$0xff] }
 0x420   : > { %2921 = vmatprep.mubr.f32.mxu1 %v6591_v54  ;;  %v6804_v54 = vld [vmem:[#allocation3 + $0x207] sm:$0xff] }
 0x423   : > { %2922 = vmatmul.mubr.f32.gmra.mrb[66].mxu1 %v6575_v3 }
 0x424   : > { %2926 = vmatprep.mubr.f32.mxu1 %v6601_v4 }
 0x427   : > { %2927 = vmatmul.mubr.f32.gmra.mrb[68].mxu1 %v6589_v27  ;;  %v7298_v27 = vld [vmem:[#allocation34_spill] sm:$0xff] }
 0x428   : > { %2931 = vmatprep.mubr.f32.mxu1 %v6609_v51  ;;  %v6812_v51 = vld [vmem:[#allocation3 + $0x20f] sm:$0xff] }
 0x42b   : > { %2932 = vmatmul.mubr.f32.gmra.mrb[70].mxu1 %v6593_v55  ;;  %v6807_v55 = vld [vmem:[#allocation3 + $0x1e9] sm:$0xff] }
 0x42c   : > { %2936 = vmatprep.mubr.f32.mxu1 %v6619_v22 }
 0x42f   : > { %2937 = vmatmul.mubr.f32.gmra.mrb[72].mxu1 %v6607_v58 }
 0x430   : > { %2941 = vmatprep.mubr.f32.mxu1 %v6627_v32  ;;  %v2499_v32 = vld [vmem:[#allocation5 + $0x300] sm:$0xff] }
 0x433   : > { %2942 = vmatmul.mubr.f32.gmra.mrb[74].mxu1 %v6611_v48 }
 0x434   : > { %2946 = vmatprep.mubr.f32.mxu1 %v6637_v7  ;;  %v2500_v7 = vld [vmem:[#allocation5 + $0x308] sm:$0xff] }
 0x437   : > { %2947 = vmatmul.mubr.f32.gmra.mrb[76].mxu1 %v6625_v26 }
 0x438   : > { %2951 = vmatprep.mubr.f32.mxu1 %v6645_v16  ;;  %v6817_v16 = vld [vmem:[#allocation3 + $0x1f1] sm:$0xff] }
 0x43b   : > { %2952 = vmatmul.mubr.f32.gmra.mrb[78].mxu1 %v7297_v40 }
 0x43c   : > { %2956 = vmatprep.mubr.f32.mxu1 %v6657_v57  ;;  %v4596_v57 = vpack.c.bf16 %v2500_v7, %v2499_v32  ;;  %v2281_v7 = vld [vmem:[#allocation3 + $0x91] sm:$0xff] }
 0x43f   : > { %2957 = vmatmul.mubr.f32.gmra.mrb[80].mxu1 %v6643_v43 }
 0x440   : > { %2961 = vmatprep.mubr.f32.mxu1 %v6668_v34  ;;  %v2501_v34 = vld [vmem:[#allocation5 + $0x310] sm:$0xff] }
 0x443   : > { %2962 = vmatmul.mubr.f32.gmra.mrb[82].mxu1 %v7298_v27 }
 0x444   : > { %2966 = vmatprep.mubr.f32.mxu1 %v6682_v29  ;;  %v2502_v29 = vld [vmem:[#allocation5 + $0x318] sm:$0xff] }
 0x445   : > { %v4599_v1 = vpack.c.bf16 %v2502_v29, %v2501_v34  ;;  %v4617_v34 = vpack.c.bf16 %v2514_v25, %v2513_v0  ;;  %v2515_v29 = vld [vmem:[#allocation5 + $0x380] sm:$0xff]  ;;  %v2524_v25 = vld [vmem:[#allocation5 + $0x3c8] sm:$0xff] }
 0x446   : > { %v6785_v46 = vpop.f32.mrb[64].mxu0  ;;  %v2523_v0 = vld [vmem:[#allocation5 + $0x3c0] sm:$0xff] }
 0x447   : > { %2967 = vmatmul.mubr.f32.gmra.mrb[84].mxu1 %v7299_v62  ;;  %v6788_v42 = vpop.f32.mrb[65].mxu0 }
 0x448   : > { %2971 = vmatprep.mubr.f32.mxu1 %v6692_v47  ;;  %v2242_v47 = vld [vmem:[#allocation3 + $0x28] sm:$0xff] }
 0x44b   : > { %2972 = vmatmul.mubr.f32.gmra.mrb[86].mxu1 %v7300_v30 }
 0x44c   : > { %2976 = vmatprep.mubr.f32.mxu1 %v6702_v63 }
 0x44e   : > { %v6795_v44 = vpop.f32.mrb[66].mxu0 }
 0x44f   : > { %2977 = vmatmul.mubr.f32.gmra.mrb[88].mxu1 %v6793_v23  ;;  %v6798_v3 = vpop.f32.mrb[67].mxu0 }
 0x450   : > { %2981 = vmatprep.mubr.f32.mxu1 %v6710_v59 }
 0x453   : > { %2982 = vmatmul.mubr.f32.gmra.mrb[90].mxu1 %v6801_v11 }
 0x454   : > { %2986 = vmatprep.mubr.f32.mxu1 %v6804_v54 }
 0x456   : > { %v6809_v4 = vpop.f32.mrb[68].mxu0 }
 0x457   : > { %2987 = vmatmul.mubr.f32.gmra.mrb[92].mxu1 %v6807_v55  ;;  %v6814_v22 = vpop.f32.mrb[69].mxu0 }
 0x458   : > { %2991 = vmatprep.mubr.f32.mxu1 %v6812_v51 }
 0x45b   : > { %2992 = vmatmul.mubr.f32.gmra.mrb[94].mxu1 %v6817_v16 }
 0x45c   : > { %3061 = vmatprep.mubr.f32.mxu1 %v6719_v61  ;;  %v2276_v61 = vld [vmem:[#allocation3 + $0x49] sm:$0xff] }
 0x45e   : > { %v6821_v63 = vpop.f32.mrb[70].mxu0 }
 0x45f   : > { %3062 = vmatmul.mubr.f32.vlgmr.msra.gmra.mrb[32].mxu1 %v2242_v47  ;;  %v6823_v59 = vpop.f32.mrb[71].mxu0  ;;  %v2516_v47 = vld [vmem:[#allocation5 + $0x388] sm:$0xff] }
 0x460   : > { %3066 = vmatprep.mubr.f32.mxu1 %v6724_v31  ;;  %4597 = vmatpush1.bf16.msra.mxu1 %v4596_v57  ;;  %v2277_v31 = vld [vmem:[#allocation3 + $0x51] sm:$0xff]  ;;  %v4620_v35 = vpack.c.bf16 %v2516_v47, %v2515_v29  ;;  %v4632_v29 = vpack.c.bf16 %v2524_v25, %v2523_v0 }
 0x461   : > { %4598 = vmatprep.subr.bf16.mxu1 %v7296_v8  ;;  %v2525_v47 = vld [vmem:[#allocation5 + $0x3d0] sm:$0xff] }
 0x462   : > { %v2289_v25 = vld [vmem:[#allocation3 + $0x111] sm:$0xff] }
 0x463   : > { %3067 = vmatmul.mubr.f32.gmra.mrb[34].mxu1 %v2243_v6  ;;  %v2517_v6 = vld [vmem:[#allocation5 + $0x390] sm:$0xff] }
 0x464   : > { %3071 = vmatprep.mubr.f32.mxu1 %v2276_v61  ;;  %4600 = vmatpush1.bf16.msra.mxu1 %v4599_v1  ;;  %v6860_v1 = vld [vmem:[#allocation3 + $0x90] sm:$0xff]  ;;  %v2518_v61 = vld [vmem:[#allocation5 + $0x398] sm:$0xff] }
 0x465   : > { %4601 = vmatprep.subr.bf16.mxu1 %v7296_v8 }
 0x466   : > { %v6830_v20 = vpop.f32.mrb[72].mxu0 }
 0x467   : > { %3072 = vmatmul.mubr.f32.gmra.mrb[36].mxu1 %v6828_v17  ;;  %v6833_v33 = vpop.f32.mrb[73].mxu0 }
 0x468   : > { %3076 = vmatprep.mubr.f32.mxu1 %v2277_v31  ;;  %4603 = vmatpush1.bf16.msra.mxu1 %v4602_v9  ;;  %v6864_v9 = vld [vmem:[#allocation3 + $0xa8] sm:$0xff] }
 0x469   : > { %4604 = vmatprep.subr.bf16.mxu1 %v7296_v8 }
 0x46b   : > { %3077 = vmatmul.mubr.f32.gmra.mrb[38].mxu1 %v6836_v60 }
 0x46c   : > { %3081 = vmatprep.mubr.f32.mxu1 %v2278_v37  ;;  %4606 = vmatpush1.bf16.msra.mxu1 %v4605_v28  ;;  %v4623_v28 = vpack.c.bf16 %v2518_v61, %v2517_v6  ;;  %v6872_v37 = vld [vmem:[#allocation3 + $0xb0] sm:$0xff] }
 0x46d   : > { %4607 = vmatprep.subr.bf16.mxu1 %v7296_v8  ;;  %v2287_v61 = vld [vmem:[#allocation3 + $0xf1] sm:$0xff] }
 0x46e   : > { %v6842_v39 = vpop.f32.mrb[74].mxu0 }
 0x46f   : > { %3082 = vmatmul.mubr.f32.gmra.mrb[40].mxu1 %v6840_v24  ;;  %v6845_v19 = vpop.f32.mrb[75].mxu0 }
 0x470   : > { %3086 = vmatprep.mubr.f32.mxu1 %v2279_v15  ;;  %4609 = vmatpush1.bf16.msra.mxu1 %v4608_v14  ;;  %v2284_v14 = vld [vmem:[#allocation3 + $0xc9] sm:$0xff]  ;;  %v2522_v15 = vld [vmem:[#allocation5 + $0x3b8] sm:$0xff] }
 0x471   : > { %4610 = vmatprep.subr.bf16.mxu1 %v7296_v8 }
 0x473   : > { %3087 = vmatmul.mubr.f32.gmra.mrb[42].mxu1 %v6848_v21 }
 0x474   : > { %3091 = vmatprep.mubr.f32.mxu1 %v2280_v36  ;;  %4612 = vmatpush1.bf16.msra.mxu1 %v4611_v50  ;;  %v6876_v50 = vld [vmem:[#allocation3 + $0xc8] sm:$0xff] }
 0x475   : > { %4613 = vmatprep.subr.bf16.mxu1 %v7296_v8 }
 0x476   : > { %v6854_v32 = vpop.f32.mrb[76].mxu0 }
 0x477   : > { %3092 = vmatmul.mubr.f32.gmra.mrb[44].mxu1 %v6852_v38  ;;  %v6857_v57 = vpop.f32.mrb[77].mxu0 }
 0x478   : > { %3096 = vmatprep.mubr.f32.mxu1 %v2281_v7  ;;  %4615 = vmatpush1.bf16.msra.mxu1 %v4614_v5  ;;  %v4629_v5 = vpack.c.bf16 %v2522_v15, %v2521_v56  ;;  %v6884_v7 = vld [vmem:[#allocation3 + $0xd0] sm:$0xff]  ;;  %v4638_v56 = vpack.c.bf16 %v2528_v10, %v2527_v41 }
 0x479   : > { %4616 = vmatprep.subr.bf16.mxu1 %v7296_v8  ;;  %v2529_v15 = vld [vmem:[#allocation5 + $0x3f0] sm:$0xff] }
 0x47a   : > { %v2291_v10 = vld [vmem:[#allocation3 + $0x131] sm:$0xff] }
 0x47b   : > { %3097 = vmatmul.mubr.f32.gmra.mrb[46].mxu1 %v6860_v1 }
 0x47c   : > { %3101 = vmatprep.mubr.f32.mxu1 %v2282_v13  ;;  %4618 = vmatpush1.bf16.msra.mxu1 %v4617_v34  ;;  %v2286_v34 = vld [vmem:[#allocation3 + $0xe9] sm:$0xff]  ;;  %v2526_v13 = vld [vmem:[#allocation5 + $0x3d8] sm:$0xff] }
 0x47d   : > { %4619 = vmatprep.subr.bf16.mxu1 %v7296_v8 }
 0x47e   : > { %v6866_v12 = vpop.f32.mrb[78].mxu0 }
 0x47f   : > { %3102 = vmatmul.mubr.f32.gmra.mrb[48].mxu1 %v6864_v9  ;;  %v6869_v31 = vpop.f32.mrb[79].mxu0 }
 0x480   : > { %3106 = vmatprep.mubr.f32.mxu1 %v2283_v45  ;;  %4621 = vmatpush1.bf16.msra.mxu1 %v4620_v35  ;;  %v6888_v35 = vld [vmem:[#allocation3 + $0xe8] sm:$0xff] }
 0x481   : > { %4622 = vmatprep.subr.bf16.mxu1 %v7296_v8 }
 0x483   : > { %3107 = vmatmul.mubr.f32.gmra.mrb[50].mxu1 %v6872_v37 }
 0x484   : > { %3111 = vmatprep.mubr.f32.mxu1 %v2284_v14  ;;  %4624 = vmatpush1.bf16.msra.mxu1 %v4623_v28  ;;  %v4635_v28 = vpack.c.bf16 %v2526_v13, %v2525_v47  ;;  %v6896_v14 = vld [vmem:[#allocation3 + $0xf0] sm:$0xff] }
 0x485   : > { %4625 = vmatprep.subr.bf16.mxu1 %v7296_v8  ;;  %v6908_v47 = vld [vmem:[#allocation3 + $0x110] sm:$0xff] }
 0x486   : > { %v6878_v49 = vpop.f32.mrb[80].mxu0  ;;  %v2290_v13 = vld [vmem:[#allocation3 + $0x129] sm:$0xff] }
 0x487   : > { %3112 = vmatmul.mubr.f32.gmra.mrb[52].mxu1 %v6876_v50  ;;  %v6881_v36 = vpop.f32.mrb[81].mxu0 }
 0x488   : > { %3116 = vmatprep.mubr.f32.mxu1 %v2285_v53  ;;  %4627 = vmatpush1.bf16.msra.mxu1 %v4626_v52  ;;  %v2288_v52 = vld [vmem:[#allocation3 + $0x109] sm:$0xff]  ;;  %v2530_v53 = vld [vmem:[#allocation5 + $0x3f8] sm:$0xff] }
 0x489   : > { %4628 = vmatprep.subr.bf16.mxu1 %v7296_v8 }
 0x48b   : > { %3117 = vmatmul.mubr.f32.gmra.mrb[54].mxu1 %v6884_v7 }
 0x48c   : > { %3121 = vmatprep.mubr.f32.mxu1 %v2286_v34  ;;  %4630 = vmatpush1.bf16.msra.mxu1 %v4629_v5  ;;  %v6900_v5 = vld [vmem:[#allocation3 + $0x108] sm:$0xff] }
 0x48d   : > { %4631 = vmatprep.subr.bf16.mxu1 %v7296_v8 }
 0x48e   : > { %v6890_v6 = vpop.f32.mrb[82].mxu0 }
 0x48f   : > { %3122 = vmatmul.mubr.f32.gmra.mrb[56].mxu1 %v6888_v35  ;;  %v6893_v45 = vpop.f32.mrb[83].mxu0 }
 0x490   : > { %3126 = vmatprep.mubr.f32.mxu1 %v2287_v61  ;;  %4633 = vmatpush1.bf16.msra.mxu1 %v4632_v29  ;;  %v4641_v29 = vpack.c.bf16 %v2530_v53, %v2529_v15  ;;  %v7301_v61 = vld [vmem:[#allocation25_spill] sm:$0xff]  ;;  %v6927_v15 = vld [vmem:[#allocation3 + $0x150] sm:$0xff]  ;;  %v6931_v53 = vld [vmem:[#allocation3 + $0x168] sm:$0xff] }
 0x491   : > { %4634 = vmatprep.subr.bf16.mxu1 %v7296_v8 }
 0x493   : > { %3127 = vmatmul.mubr.f32.gmra.mrb[58].mxu1 %v6896_v14 }
 0x494   : > { %3131 = vmatprep.mubr.f32.mxu1 %v2288_v52  ;;  %4636 = vmatpush1.bf16.msra.mxu1 %v4635_v28  ;;  %v6912_v28 = vld [vmem:[#allocation3 + $0x128] sm:$0xff] }
 0x495   : > { %4637 = vmatprep.subr.bf16.mxu1 %v7296_v8 }
 0x496   : > { %v6902_v0 = vpop.f32.mrb[84].mxu0 }
 0x497   : > { %3132 = vmatmul.mubr.f32.gmra.mrb[60].mxu1 %v6900_v5  ;;  %v6905_v34 = vpop.f32.mrb[85].mxu0 }
 0x498   : > { %3136 = vmatprep.mubr.f32.mxu1 %v2289_v25  ;;  %4639 = vmatpush1.bf16.msra.mxu1 %v4638_v56  ;;  %v6923_v56 = vld [vmem:[#allocation3 + $0x148] sm:$0xff]  ;;  %v6935_v25 = vld [vmem:[#allocation3 + $0x170] sm:$0xff] }
 0x499   : > { %4640 = vmatprep.subr.bf16.mxu1 %v7296_v8  ;;  %v6919_v8 = vld [vmem:[#allocation3 + $0x130] sm:$0xff] }
 0x49b   : > { %3137 = vmatmul.mubr.f32.gmra.mrb[62].mxu1 %v6908_v47 }
 0x49c   : > { %3141 = vmatprep.mubr.f32.mxu1 %v2290_v13  ;;  %4642 = vmatpush1.bf16.msra.mxu1 %v4641_v29  ;;  %v6966_v29 = vld [vmem:[#allocation3 + $0x211] sm:$0xff] }
 0x49d   : > { %4675 = vmatprep.subr.bf16.mxu1 %v7301_v61  ;;  %v7305_v13 = vld [vmem:[#allocation40_spill] sm:$0xff] }
 0x49e   : > { %v6914_v41 = vpop.f32.mrb[86].mxu0 }
 0x49f   : > { %3142 = vmatmul.mubr.f32.gmra.mrb[64].mxu1 %v6912_v28  ;;  %v6917_v52 = vpop.f32.mrb[87].mxu0 }
 0x4a0   : > { %3146 = vmatprep.mubr.f32.mxu1 %v2291_v10  ;;  %v2308_v10 = vld [vmem:[#allocation3 + $0x4f] sm:$0xff] }
 0x4a3   : > { %3147 = vmatmul.mubr.f32.gmra.mrb[66].mxu1 %v6919_v8 }
 0x4a4   : > { %3151 = vmatprep.mubr.f32.mxu1 %v6607_v58  ;;  %v6939_v58 = vld [vmem:[#allocation3 + $0x188] sm:$0xff] }
 0x4a7   : > { %3152 = vmatmul.mubr.f32.gmra.mrb[68].mxu1 %v6923_v56 }
 0x4a8   : > { %3156 = vmatprep.mubr.f32.mxu1 %v6611_v48  ;;  %v6943_v48 = vld [vmem:[#allocation3 + $0x190] sm:$0xff] }
 0x4ab   : > { %3157 = vmatmul.mubr.f32.gmra.mrb[70].mxu1 %v6927_v15 }
 0x4ac   : > { %3161 = vmatprep.mubr.f32.mxu1 %v6625_v26  ;;  %v6947_v26 = vld [vmem:[#allocation3 + $0x1a8] sm:$0xff] }
 0x4af   : > { %3162 = vmatmul.mubr.f32.gmra.mrb[72].mxu1 %v6931_v53 }
 0x4b0   : > { %3166 = vmatprep.mubr.f32.mxu1 %v7297_v40  ;;  %v6951_v40 = vld [vmem:[#allocation3 + $0x1b0] sm:$0xff] }
 0x4b3   : > { %3167 = vmatmul.mubr.f32.gmra.mrb[74].mxu1 %v6935_v25 }
 0x4b4   : > { %3171 = vmatprep.mubr.f32.mxu1 %v6643_v43  ;;  %v7302_v43 = vld [vmem:[#allocation35_spill] sm:$0xff] }
 0x4b7   : > { %3172 = vmatmul.mubr.f32.gmra.mrb[76].mxu1 %v6939_v58 }
 0x4b8   : > { %3176 = vmatprep.mubr.f32.mxu1 %v7298_v27  ;;  %v7303_v27 = vld [vmem:[#allocation38_spill] sm:$0xff] }
 0x4bb   : > { %3177 = vmatmul.mubr.f32.gmra.mrb[78].mxu1 %v6943_v48 }
 0x4bc   : > { %3181 = vmatprep.mubr.f32.mxu1 %v7299_v62  ;;  %v6962_v62 = vld [vmem:[#allocation3 + $0x209] sm:$0xff] }
 0x4bf   : > { %3182 = vmatmul.mubr.f32.gmra.mrb[80].mxu1 %v6947_v26 }
 0x4c0   : > { %3186 = vmatprep.mubr.f32.mxu1 %v7300_v30  ;;  %v7304_v30 = vld [vmem:[#allocation39_spill] sm:$0xff] }
 0x4c3   : > { %3187 = vmatmul.mubr.f32.gmra.mrb[82].mxu1 %v6951_v40 }
 0x4c4   : > { %3191 = vmatprep.mubr.f32.mxu1 %v6793_v23 }
 0x4c7   : > { %3192 = vmatmul.mubr.f32.gmra.mrb[84].mxu1 %v7302_v43  ;;  %v7307_v43 = vld [vmem:[#allocation27_spill] sm:$0xff] }
 0x4c8   : > { %3196 = vmatprep.mubr.f32.mxu1 %v6801_v11 }
 0x4cb   : > { %3197 = vmatmul.mubr.f32.gmra.mrb[86].mxu1 %v6663_v18  ;;  %v2307_v18 = vld [vmem:[#allocation3 + $0x47] sm:$0xff] }
 0x4cc   : > { %3201 = vmatprep.mubr.f32.mxu1 %v6807_v55 }
 0x4cf   : > { %3202 = vmatmul.mubr.f32.gmra.mrb[88].mxu1 %v6679_v2  ;;  %v7306_v2 = vld [vmem:[#allocation26_spill] sm:$0xff] }
 0x4d0   : > { %3206 = vmatprep.mubr.f32.mxu1 %v6817_v16 }
 0x4d3   : > { %3207 = vmatmul.mubr.f32.gmra.mrb[90].mxu1 %v7303_v27  ;;  %v2309_v27 = vld [vmem:[#allocation3 + $0x67] sm:$0xff] }
 0x4d4   : > { %3211 = vmatprep.mubr.f32.mxu1 %v6962_v62 }
 0x4d7   : > { %3212 = vmatmul.mubr.f32.gmra.mrb[92].mxu1 %v7304_v30  ;;  %v7310_v30 = vld [vmem:[#allocation30_spill] sm:$0xff] }
 0x4d8   : > { %3216 = vmatprep.mubr.f32.mxu1 %v6966_v29 }
 0x4db   : > { %3217 = vmatmul.mubr.f32.gmra.mrb[94].mxu1 %v7305_v13  ;;  %v7311_v13 = vld [vmem:[#allocation31_spill] sm:$0xff] }
 0x4dc   : > { %3286 = vmatprep.mubr.f32.mxu1 %v6828_v17  ;;  %v7308_v17 = vld [vmem:[#allocation28_spill] sm:$0xff] }
 0x4df   : > { %3287 = vmatmul.mubr.f32.vlgmr.msra.gmra.mrb[32].mxu1 %v2307_v18  ;;  %v7312_v18 = vld [vmem:[#allocation32_spill] sm:$0xff] }
 0x4e0   : > { %3291 = vmatprep.mubr.f32.mxu1 %v6836_v60  ;;  %4683 = vmatpush3.bf16.msra.mxu1 %v7301_v61  ;;  %v2310_v60 = vld [vmem:[#allocation3 + $0x6f] sm:$0xff]  ;;  %v7309_v61 = vld [vmem:[#allocation29_spill] sm:$0xff] }
 0x4e1   : > { %4676 = vmatprep.subr.bf16.mxu1 %v7306_v2 }
 0x4e3   : > { %3292 = vmatmul.mubr.f32.gmra.mrb[34].mxu1 %v2308_v10  ;;  %v2317_v10 = vld [vmem:[#allocation3 + $0xe7] sm:$0xff] }
 0x4e4   : > { %3296 = vmatprep.mubr.f32.mxu1 %v6840_v24  ;;  %4684 = vmatpush3.bf16.msra.mxu1 %v7306_v2  ;;  %v2311_v24 = vld [vmem:[#allocation3 + $0x87] sm:$0xff] }
 0x4e5   : > { %4677 = vmatprep.subr.bf16.mxu1 %v7307_v43  ;;  %v2315_v2 = vld [vmem:[#allocation3 + $0xc7] sm:$0xff] }
 0x4e7   : > { %3297 = vmatmul.mubr.f32.gmra.mrb[36].mxu1 %v2309_v27  ;;  %v2363_v27 = vld [vmem:[#allocation3 + $0x1c8] sm:$0xff] }
 0x4e8   : > { %3301 = vmatprep.mubr.f32.mxu1 %v6848_v21  ;;  %4685 = vmatpush3.bf16.msra.mxu1 %v7307_v43  ;;  %v2312_v21 = vld [vmem:[#allocation3 + $0x8f] sm:$0xff]  ;;  %v2319_v43 = vld [vmem:[#allocation3 + $0x107] sm:$0xff] }
 0x4e9   : > { %4678 = vmatprep.subr.bf16.mxu1 %v7308_v17 }
 0x4eb   : > { %3302 = vmatmul.mubr.f32.gmra.mrb[38].mxu1 %v2310_v60  ;;  %v2365_v60 = vld [vmem:[#allocation3 + $0x1e8] sm:$0xff] }
 0x4ec   : > { %3306 = vmatprep.mubr.f32.mxu1 %v6852_v38  ;;  %4686 = vmatpush3.bf16.msra.mxu1 %v7308_v17  ;;  %v2313_v38 = vld [vmem:[#allocation3 + $0xa7] sm:$0xff]  ;;  %v2364_v17 = vld [vmem:[#allocation3 + $0x1d0] sm:$0xff] }
 0x4ed   : > { %4679 = vmatprep.subr.bf16.mxu1 %v7309_v61 }
 0x4ef   : > { %3307 = vmatmul.mubr.f32.gmra.mrb[40].mxu1 %v2311_v24  ;;  %v2367_v24 = vld [vmem:[#allocation3 + $0x208] sm:$0xff] }
 0x4f0   : > { %3311 = vmatprep.mubr.f32.mxu1 %v6860_v1  ;;  %4687 = vmatpush3.bf16.msra.mxu1 %v7309_v61  ;;  %v2314_v1 = vld [vmem:[#allocation3 + $0xaf] sm:$0xff] }
 0x4f1   : > { %4680 = vmatprep.subr.bf16.mxu1 %v7310_v30  ;;  %v2366_v61 = vld [vmem:[#allocation3 + $0x1f0] sm:$0xff] }
 0x4f3   : > { %3312 = vmatmul.mubr.f32.gmra.mrb[42].mxu1 %v2312_v21  ;;  %v2337_v21 = vld [vmem:[#allocation3 + $0x227] sm:$0xff] }
 0x4f4   : > { %3316 = vmatprep.mubr.f32.mxu1 %v6864_v9  ;;  %4688 = vmatpush3.bf16.msra.mxu1 %v7310_v30  ;;  %v2316_v9 = vld [vmem:[#allocation3 + $0xcf] sm:$0xff] }
 0x4f5   : > { %4681 = vmatprep.subr.bf16.mxu1 %v7311_v13  ;;  %v2369_v30 = vld [vmem:[#allocation3 + $0x228] sm:$0xff] }
 0x4f7   : > { %3317 = vmatmul.mubr.f32.gmra.mrb[44].mxu1 %v2313_v38  ;;  %v2338_v38 = vld [vmem:[#allocation3 + $0x22f] sm:$0xff] }
 0x4f8   : > { %3321 = vmatprep.mubr.f32.mxu1 %v6872_v37  ;;  %4689 = vmatpush3.bf16.msra.mxu1 %v7311_v13  ;;  %v2318_v37 = vld [vmem:[#allocation3 + $0xef] sm:$0xff] }
 0x4f9   : > { %4682 = vmatprep.subr.bf16.mxu1 %v7312_v18  ;;  %v2370_v13 = vld [vmem:[#allocation3 + $0x230] sm:$0xff] }
 0x4fb   : > { %3322 = vmatmul.mubr.f32.gmra.mrb[46].mxu1 %v2314_v1  ;;  %v7018_v1 = vstv %s5585_s25  ;;  %s7178_s25 = scalar_lea.hbm %s7230_s4, %s3970_s24 }
 0x4fc   : > { %3326 = vmatprep.mubr.f32.mxu1 %v6876_v50  ;;  %4690 = vmatpush3.bf16.msra.mxu1 %v7312_v18  ;;  %v2320_v50 = vld [vmem:[#allocation3 + $0x10f] sm:$0xff] }
 0x4ff   : > { %3327 = vmatmul.mubr.f32.gmra.mrb[48].mxu1 %v2315_v2 }
 0x500   : > { %3331 = vmatprep.mubr.f32.mxu1 %v6884_v7  ;;  %v2321_v7 = vld [vmem:[#allocation3 + $0x127] sm:$0xff] }
 0x503   : > { %3332 = vmatmul.mubr.f32.gmra.mrb[50].mxu1 %v2316_v9 }
 0x504   : > { %3336 = vmatprep.mubr.f32.mxu1 %v6888_v35  ;;  %v2322_v35 = vld [vmem:[#allocation3 + $0x12f] sm:$0xff] }
 0x507   : > { %3337 = vmatmul.mubr.f32.gmra.mrb[52].mxu1 %v2317_v10  ;;  %v5204_v10 = vld [vmem:[%s5569_s11] sm:$0xff] }
 0x508   : > { %3341 = vmatprep.mubr.f32.mxu1 %v6896_v14  ;;  %v2323_v14 = vld [vmem:[#allocation3 + $0x147] sm:$0xff] }
 0x50b   : > { %3342 = vmatmul.mubr.f32.gmra.mrb[54].mxu1 %v2318_v37 }
 0x50c   : > { %3346 = vmatprep.mubr.f32.mxu1 %v6900_v5  ;;  %v2324_v5 = vld [vmem:[#allocation3 + $0x14f] sm:$0xff] }
 0x50f   : > { %3347 = vmatmul.mubr.f32.gmra.mrb[56].mxu1 %v2319_v43 }
 0x510   : > { %3351 = vmatprep.mubr.f32.mxu1 %v6908_v47  ;;  %v2325_v47 = vld [vmem:[#allocation3 + $0x167] sm:$0xff] }
 0x513   : > { %3352 = vmatmul.mubr.f32.gmra.mrb[58].mxu1 %v2320_v50 }
 0x514   : > { %3356 = vmatprep.mubr.f32.mxu1 %v6912_v28  ;;  %v2326_v28 = vld [vmem:[#allocation3 + $0x16f] sm:$0xff] }
 0x517   : > { %3357 = vmatmul.mubr.f32.gmra.mrb[60].mxu1 %v2321_v7 }
 0x518   : > { %3361 = vmatprep.mubr.f32.mxu1 %v6919_v8  ;;  %v2327_v8 = vld [vmem:[#allocation3 + $0x187] sm:$0xff] }
 0x51b   : > { %3362 = vmatmul.mubr.f32.gmra.mrb[62].mxu1 %v2322_v35 }
 0x51c   : > { %3366 = vmatprep.mubr.f32.mxu1 %v6923_v56  ;;  %v2328_v56 = vld [vmem:[#allocation3 + $0x18f] sm:$0xff] }
 0x51f   : > { %3367 = vmatmul.mubr.f32.gmra.mrb[64].mxu1 %v2323_v14 }
 0x520   : > { %3371 = vmatprep.mubr.f32.mxu1 %v6927_v15  ;;  %v2329_v15 = vld [vmem:[#allocation3 + $0x1a7] sm:$0xff] }
 0x523   : > { %3372 = vmatmul.mubr.f32.gmra.mrb[66].mxu1 %v2324_v5  ;;  %v5205_v5 = vld [vmem:[%s5569_s11 + $0x8] sm:$0xff] }
 0x524   : > { %3376 = vmatprep.mubr.f32.mxu1 %v6931_v53  ;;  %v2330_v53 = vld [vmem:[#allocation3 + $0x1af] sm:$0xff] }
 0x527   : > { %3377 = vmatmul.mubr.f32.gmra.mrb[68].mxu1 %v2325_v47 }
 0x528   : > { %3381 = vmatprep.mubr.f32.mxu1 %v6935_v25  ;;  %v2331_v25 = vld [vmem:[#allocation3 + $0x1c7] sm:$0xff] }
 0x52b   : > { %3382 = vmatmul.mubr.f32.gmra.mrb[70].mxu1 %v2326_v28 }
 0x52c   : > { %3386 = vmatprep.mubr.f32.mxu1 %v6939_v58  ;;  %v2332_v58 = vld [vmem:[#allocation3 + $0x1cf] sm:$0xff] }
 0x52f   : > { %3387 = vmatmul.mubr.f32.gmra.mrb[72].mxu1 %v2327_v8 }
 0x530   : > { %3391 = vmatprep.mubr.f32.mxu1 %v6943_v48  ;;  %v2333_v48 = vld [vmem:[#allocation3 + $0x1e7] sm:$0xff] }
 0x533   : > { %3392 = vmatmul.mubr.f32.gmra.mrb[74].mxu1 %v2328_v56 }
 0x534   : > { %3396 = vmatprep.mubr.f32.mxu1 %v6947_v26  ;;  %v2334_v26 = vld [vmem:[#allocation3 + $0x1ef] sm:$0xff] }
 0x537   : > { %3397 = vmatmul.mubr.f32.gmra.mrb[76].mxu1 %v2329_v15 }
 0x538   : > { %3401 = vmatprep.mubr.f32.mxu1 %v6951_v40  ;;  %v2368_v40 = vld [vmem:[#allocation3 + $0x210] sm:$0xff] }
 0x53b   : > { %3402 = vmatmul.mubr.f32.gmra.mrb[78].mxu1 %v2330_v53 }
 0x53c   : > { %3406 = vmatprep.mubr.f32.mxu1 %v2363_v27  ;;  %v5206_v27 = vld [vmem:[%s5569_s11 + $0x10] sm:$0xff] }
 0x53f   : > { %3407 = vmatmul.mubr.f32.gmra.mrb[80].mxu1 %v2331_v25 }
 0x540   : > { %3411 = vmatprep.mubr.f32.mxu1 %v2364_v17 }
 0x543   : > { %3412 = vmatmul.mubr.f32.gmra.mrb[82].mxu1 %v2332_v58 }
 0x544   : > { %3416 = vmatprep.mubr.f32.mxu1 %v2365_v60 }
 0x547   : > { %3417 = vmatmul.mubr.f32.gmra.mrb[84].mxu1 %v2333_v48 }
 0x548   : > { %3421 = vmatprep.mubr.f32.mxu1 %v2366_v61 }
 0x54b   : > { %3422 = vmatmul.mubr.f32.gmra.mrb[86].mxu1 %v2334_v26  ;;  %v5207_v26 = vld [vmem:[%s5569_s11 + $0x18] sm:$0xff] }
 0x54c   : > { %3426 = vmatprep.mubr.f32.mxu1 %v2367_v24 }
 0x54f   : > { %3427 = vmatmul.mubr.f32.gmra.mrb[88].mxu1 %v6804_v54  ;;  %v2401_v54 = vld [vmem:[#allocation3 + $0x229] sm:$0xff] }
 0x550   : > { %3431 = vmatprep.mubr.f32.mxu1 %v2368_v40 }
 0x553   : > { %3432 = vmatmul.mubr.f32.gmra.mrb[90].mxu1 %v6812_v51  ;;  %v2402_v51 = vld [vmem:[#allocation3 + $0x231] sm:$0xff] }
 0x554   : > { %3436 = vmatprep.mubr.f32.mxu1 %v2369_v30 }
 0x557   : > { %3437 = vmatmul.mubr.f32.gmra.mrb[92].mxu1 %v2337_v21 }
 0x558   : > { %3441 = vmatprep.mubr.f32.mxu1 %v2370_v13 }
 0x55b   : > { %3442 = vmatmul.mubr.f32.gmra.mrb[94].mxu1 %v2338_v38 }
 0x55c   : > { %4215 = vmatprep.mubr.f32.mxu1 %v6793_v23 }
 0x55f   : > { %4216 = vmatmul.mubr.f32.vlgmr.msra.gmra.mrb[96].mxu1 %v6801_v11 }
 0x560   : > { %4218 = vmatprep.mubr.f32.mxu1 %v6807_v55  ;;  %v7022_v55 = vstv %s5587_s30  ;;  %s5325_s30 = scalar_lea.vmem %s7180_s29, 4096 }
 0x561   : > { %p5326_p9 = scmp.ne.s32.totalorder %s7180_s29, %s5325_s30 }
 0x563   : > { %4219 = vmatmul.mubr.f32.gmra.mrb[98].mxu1 %v6817_v16  ;;  %p5327_p2 = pnand %p5326_p9, %p7313_p10 }
 0x564   : > { %4221 = vmatprep.mubr.f32.mxu1 %v6962_v62 }
 0x565   : > { %p5328_p4 = pneg %p5327_p2 }
 0x567   : > { %4222 = vmatmul.mubr.f32.gmra.mrb[100].mxu1 %v6966_v29 }
 0x568   : > { %4224 = vmatprep.mubr.f32.mxu1 %v2401_v54  ;;  %v5208_v54 = vld [vmem:[%s5569_s11 + $0x20] sm:$0xff] }
 0x56b   : > { %4225 = vmatmul.mubr.f32.gmra.mrb[102].mxu1 %v2402_v51 }
 0x5b2   : > { %v3288_v18 = vpop.f32.mrb[32].mxu1 }
 0x5b3   : > { %v3514_v23 = vadd.f32 %v6788_v42, %v3288_v18  ;;  %v3290_v11 = vpop.f32.mrb[33].mxu1 }
 0x5b5   : > { %v3673_v16 = vmul.f32 %v7018_v1, %v3514_v23 }
 0x5b6   : > { %v3293_v62 = vpop.f32.mrb[34].mxu1 }
 0x5b7   : > { %v3706_v2 = vadd.f32 %v7022_v55, %v3673_v16  ;;  %v3519_v29 = vadd.f32 %v6785_v46, %v3293_v62  ;;  %v3295_v9 = vpop.f32.mrb[35].mxu1 }
 0x5b9   : > { %v3738_v37 = vadd.f32 %v5204_v10, %v3706_v2  ;;  %v3674_v43 = vmul.f32 %v7018_v1, %v3519_v29  ;;  %v5209_v2 = vld [vmem:[%s5569_s11 + $0x28] sm:$0xff] }
 0x5ba   : > { %v3298_v42 = vpop.f32.mrb[36].mxu1 }
 0x5bb   : > { %v3770_v50 = vmax.f32 %v3738_v37, 0.0  ;;  %v3707_v7 = vadd.f32 %v7022_v55, %v3674_v43  ;;  %v3524_v35 = vadd.f32 %v6798_v3, %v3298_v42  ;;  %v3300_v14 = vpop.f32.mrb[37].mxu1 }
 0x5bd   : > { %3802 = vst [vmem:[%s5589_s12] sm:$0xff] %v3770_v50  ;;  %v3739_v47 = vadd.f32 %v5205_v5, %v3707_v7  ;;  %v3675_v46 = vmul.f32 %v7018_v1, %v3524_v35  ;;  %v5210_v50 = vld [vmem:[%s5569_s11 + $0x30] sm:$0xff] }
 0x5be   : > { %v3303_v28 = vpop.f32.mrb[38].mxu1 }
 0x5bf   : > { %v3771_v8 = vmax.f32 %v3739_v47, 0.0  ;;  %v3708_v56 = vadd.f32 %v7022_v55, %v3675_v46  ;;  %v3529_v15 = vadd.f32 %v6795_v44, %v3303_v28  ;;  %v3305_v53 = vpop.f32.mrb[39].mxu1  ;;  %v5211_v28 = vld [vmem:[%s5569_s11 + $0x38] sm:$0xff] }
 0x5c1   : > { %3803 = vst [vmem:[%s5589_s12 + $0x8] sm:$0xff] %v3771_v8  ;;  %v3740_v25 = vadd.f32 %v5206_v27, %v3708_v56  ;;  %v3676_v3 = vmul.f32 %v7018_v1, %v3529_v15 }
 0x5c2   : > { %v3308_v17 = vpop.f32.mrb[40].mxu1 }
 0x5c3   : > { %v3772_v58 = vmax.f32 %v3740_v25, 0.0  ;;  %v3709_v60 = vadd.f32 %v7022_v55, %v3676_v3  ;;  %v3534_v48 = vadd.f32 %v6814_v22, %v3308_v17  ;;  %v3310_v61 = vpop.f32.mrb[41].mxu1  ;;  %v5212_v3 = vld [vmem:[%s5569_s11 + $0x40] sm:$0xff] }
 0x5c5   : > { %3804 = vst [vmem:[%s5589_s12 + $0x10] sm:$0xff] %v3772_v58  ;;  %v3741_v24 = vadd.f32 %v5207_v26, %v3709_v60  ;;  %v3677_v44 = vmul.f32 %v7018_v1, %v3534_v48 }
 0x5c6   : > { %v3313_v40 = vpop.f32.mrb[42].mxu1 }
 0x5c7   : > { %v3773_v30 = vmax.f32 %v3741_v24, 0.0  ;;  %v3710_v21 = vadd.f32 %v7022_v55, %v3677_v44  ;;  %v3539_v13 = vadd.f32 %v6809_v4, %v3313_v40  ;;  %v3315_v38 = vpop.f32.mrb[43].mxu1  ;;  %v5213_v24 = vld [vmem:[%s5569_s11 + $0x48] sm:$0xff] }
 0x5c9   : > { %3805 = vst [vmem:[%s5589_s12 + $0x18] sm:$0xff] %v3773_v30  ;;  %v3742_v51 = vadd.f32 %v5208_v54, %v3710_v21  ;;  %v3678_v22 = vmul.f32 %v7018_v1, %v3539_v13  ;;  %v5214_v54 = vld [vmem:[%s5569_s11 + $0x50] sm:$0xff] }
 0x5ca   : > { %v3318_v18 = vpop.f32.mrb[44].mxu1 }
 0x5cb   : > { %v3774_v23 = vmax.f32 %v3742_v51, 0.0  ;;  %v3711_v11 = vadd.f32 %v7022_v55, %v3678_v22  ;;  %v3544_v16 = vadd.f32 %v6823_v59, %v3318_v18  ;;  %v3320_v62 = vpop.f32.mrb[45].mxu1 }
 0x5cc   : > { %v5215_v62 = vld [vmem:[%s5569_s11 + $0x58] sm:$0xff] }
 0x5cd   : > { %3806 = vst [vmem:[%s5589_s12 + $0x20] sm:$0xff] %v3774_v23  ;;  %v3743_v29 = vadd.f32 %v5209_v2, %v3711_v11  ;;  %v3679_v4 = vmul.f32 %v7018_v1, %v3544_v16 }
 0x5ce   : > { %v3323_v9 = vpop.f32.mrb[46].mxu1 }
 0x5cf   : > { %v3775_v10 = vmax.f32 %v3743_v29, 0.0  ;;  %v3712_v37 = vadd.f32 %v7022_v55, %v3679_v4  ;;  %v3549_v43 = vadd.f32 %v6821_v63, %v3323_v9  ;;  %v3325_v42 = vpop.f32.mrb[47].mxu1 }
 0x5d1   : > { %3807 = vst [vmem:[%s5589_s12 + $0x28] sm:$0xff] %v3775_v10  ;;  %v3744_v7 = vadd.f32 %v5210_v50, %v3712_v37  ;;  %v3680_v59 = vmul.f32 %v7018_v1, %v3549_v43  ;;  %v5216_v43 = vld [vmem:[%s5569_s11 + $0x60] sm:$0xff] }
 0x5d2   : > { %v3328_v35 = vpop.f32.mrb[48].mxu1 }
 0x5d3   : > { %v3776_v14 = vmax.f32 %v3744_v7, 0.0  ;;  %v3713_v5 = vadd.f32 %v7022_v55, %v3680_v59  ;;  %v3554_v47 = vadd.f32 %v6833_v33, %v3328_v35  ;;  %v3330_v46 = vpop.f32.mrb[49].mxu1 }
 0x5d5   : > { %3808 = vst [vmem:[%s5589_s12 + $0x30] sm:$0xff] %v3776_v14  ;;  %v3745_v8 = vadd.f32 %v5211_v28, %v3713_v5  ;;  %v3681_v63 = vmul.f32 %v7018_v1, %v3554_v47  ;;  %v5217_v5 = vld [vmem:[%s5569_s11 + $0x68] sm:$0xff] }
 0x5d6   : > { %v3333_v56 = vpop.f32.mrb[50].mxu1 }
 0x5d7   : > { %v3777_v15 = vmax.f32 %v3745_v8, 0.0  ;;  %v3714_v53 = vadd.f32 %v7022_v55, %v3681_v63  ;;  %v3559_v27 = vadd.f32 %v6830_v20, %v3333_v56  ;;  %v3335_v25 = vpop.f32.mrb[51].mxu1 }
 0x5d9   : > { %3809 = vst [vmem:[%s5589_s12 + $0x38] sm:$0xff] %v3777_v15  ;;  %v3746_v17 = vadd.f32 %v5212_v3, %v3714_v53  ;;  %v3682_v33 = vmul.f32 %v7018_v1, %v3559_v27  ;;  %v5218_v15 = vld [vmem:[%s5569_s11 + $0x70] sm:$0xff] }
 0x5da   : > { %v3338_v58 = vpop.f32.mrb[52].mxu1 }
 0x5db   : > { %v3778_v60 = vmax.f32 %v3746_v17, 0.0  ;;  %v3715_v48 = vadd.f32 %v7022_v55, %v3682_v33  ;;  %v3564_v61 = vadd.f32 %v6845_v19, %v3338_v58  ;;  %v3340_v26 = vpop.f32.mrb[53].mxu1  ;;  %v5219_v58 = vld [vmem:[%s5569_s11 + $0x78] sm:$0xff] }
 0x5dd   : > { %3810 = vst [vmem:[%s5589_s12 + $0x40] sm:$0xff] %v3778_v60  ;;  %v3747_v44 = vadd.f32 %v5213_v24, %v3715_v48  ;;  %v3683_v20 = vmul.f32 %v7018_v1, %v3564_v61 }
 0x5de   : > { %v3343_v40 = vpop.f32.mrb[54].mxu1 }
 0x5df   : > { %v3779_v30 = vmax.f32 %v3747_v44, 0.0  ;;  %v3716_v21 = vadd.f32 %v7022_v55, %v3683_v20  ;;  %v3569_v13 = vadd.f32 %v6842_v39, %v3343_v40  ;;  %v3345_v38 = vpop.f32.mrb[55].mxu1  ;;  %v5220_v20 = vld [vmem:[%s5569_s11 + $0x80] sm:$0xff] }
 0x5e1   : > { %3811 = vst [vmem:[%s5589_s12 + $0x48] sm:$0xff] %v3779_v30  ;;  %v3748_v51 = vadd.f32 %v5214_v54, %v3716_v21  ;;  %v3684_v19 = vmul.f32 %v7018_v1, %v3569_v13 }
 0x5e2   : > { %v3348_v22 = vpop.f32.mrb[56].mxu1 }
 0x5e3   : > { %v3780_v18 = vmax.f32 %v3748_v51, 0.0  ;;  %v3717_v23 = vadd.f32 %v7022_v55, %v3684_v19  ;;  %v3574_v11 = vadd.f32 %v6857_v57, %v3348_v22  ;;  %v3350_v16 = vpop.f32.mrb[57].mxu1  ;;  %v5221_v51 = vld [vmem:[%s5569_s11 + $0x88] sm:$0xff] }
 0x5e5   : > { %3812 = vst [vmem:[%s5589_s12 + $0x50] sm:$0xff] %v3780_v18  ;;  %v3749_v2 = vadd.f32 %v5215_v62, %v3717_v23  ;;  %v3685_v39 = vmul.f32 %v7018_v1, %v3574_v11  ;;  %v5222_v62 = vld [vmem:[%s5569_s11 + $0x90] sm:$0xff] }
 0x5e6   : > { %v3353_v29 = vpop.f32.mrb[58].mxu1 }
 0x5e7   : > { %v3781_v4 = vmax.f32 %v3749_v2, 0.0  ;;  %v3718_v9 = vadd.f32 %v7022_v55, %v3685_v39  ;;  %v3579_v10 = vadd.f32 %v6854_v32, %v3353_v29  ;;  %v3355_v37 = vpop.f32.mrb[59].mxu1 }
 0x5e8   : > { %v5223_v37 = vld [vmem:[%s5569_s11 + $0x98] sm:$0xff] }
 0x5e9   : > { %3813 = vst [vmem:[%s5589_s12 + $0x58] sm:$0xff] %v3781_v4  ;;  %v3750_v42 = vadd.f32 %v5216_v43, %v3718_v9  ;;  %v3686_v57 = vmul.f32 %v7018_v1, %v3579_v10 }
 0x5ea   : > { %v3358_v50 = vpop.f32.mrb[60].mxu1 }
 0x5eb   : > { %v3782_v7 = vmax.f32 %v3750_v42, 0.0  ;;  %v3719_v59 = vadd.f32 %v7022_v55, %v3686_v57  ;;  %v3584_v35 = vadd.f32 %v6869_v31, %v3358_v50  ;;  %v3360_v14 = vpop.f32.mrb[61].mxu1 }
 0x5ed   : > { %3814 = vst [vmem:[%s5589_s12 + $0x60] sm:$0xff] %v3782_v7  ;;  %v3751_v47 = vadd.f32 %v5217_v5, %v3719_v59  ;;  %v3687_v32 = vmul.f32 %v7018_v1, %v3584_v35  ;;  %v5224_v35 = vld [vmem:[%s5569_s11 + $0xa0] sm:$0xff] }
 0x5ee   : > { %v3363_v46 = vpop.f32.mrb[62].mxu1 }
 0x5ef   : > { %v3783_v28 = vmax.f32 %v3751_v47, 0.0  ;;  %v3720_v8 = vadd.f32 %v7022_v55, %v3687_v32  ;;  %v3589_v63 = vadd.f32 %v6866_v12, %v3363_v46  ;;  %v3365_v56 = vpop.f32.mrb[63].mxu1 }
 0x5f1   : > { %3815 = vst [vmem:[%s5589_s12 + $0x68] sm:$0xff] %v3783_v28  ;;  %v3752_v53 = vadd.f32 %v5218_v15, %v3720_v8  ;;  %v3688_v31 = vmul.f32 %v7018_v1, %v3589_v63  ;;  %v5225_v8 = vld [vmem:[%s5569_s11 + $0xa8] sm:$0xff] }
 0x5f2   : > { %v3368_v27 = vpop.f32.mrb[64].mxu1 }
 0x5f3   : > { %v3784_v25 = vmax.f32 %v3752_v53, 0.0  ;;  %v3721_v3 = vadd.f32 %v7022_v55, %v3688_v31  ;;  %v3594_v17 = vadd.f32 %v6881_v36, %v3368_v27  ;;  %v3370_v33 = vpop.f32.mrb[65].mxu1 }
 0x5f5   : > { %3816 = vst [vmem:[%s5589_s12 + $0x70] sm:$0xff] %v3784_v25  ;;  %v3753_v60 = vadd.f32 %v5219_v58, %v3721_v3  ;;  %v3689_v12 = vmul.f32 %v7018_v1, %v3594_v17  ;;  %v5226_v25 = vld [vmem:[%s5569_s11 + $0xb0] sm:$0xff] }
 0x5f6   : > { %v3373_v48 = vpop.f32.mrb[66].mxu1 }
 0x5f7   : > { %v3785_v61 = vmax.f32 %v3753_v60, 0.0  ;;  %v3722_v26 = vadd.f32 %v7022_v55, %v3689_v12  ;;  %v3599_v24 = vadd.f32 %v6878_v49, %v3373_v48  ;;  %v3375_v44 = vpop.f32.mrb[67].mxu1  ;;  %v5227_v12 = vld [vmem:[%s5569_s11 + $0xb8] sm:$0xff] }
 0x5f9   : > { %3817 = vst [vmem:[%s5589_s12 + $0x78] sm:$0xff] %v3785_v61  ;;  %v3754_v40 = vadd.f32 %v5220_v20, %v3722_v26  ;;  %v3690_v36 = vmul.f32 %v7018_v1, %v3599_v24 }
 0x5fa   : > { %v3378_v30 = vpop.f32.mrb[68].mxu1 }
 0x5fb   : > { %v3786_v21 = vmax.f32 %v3754_v40, 0.0  ;;  %v3723_v13 = vadd.f32 %v7022_v55, %v3690_v36  ;;  %v3604_v38 = vadd.f32 %v6893_v45, %v3378_v30  ;;  %v3380_v54 = vpop.f32.mrb[69].mxu1 }
 0x5fd   : > { %3818 = vst [vmem:[%s5589_s12 + $0x80] sm:$0xff] %v3786_v21  ;;  %v3755_v19 = vadd.f32 %v5221_v51, %v3723_v13  ;;  %v3691_v49 = vmul.f32 %v7018_v1, %v3604_v38 }
 0x5fe   : > { %v3383_v22 = vpop.f32.mrb[70].mxu1 }
 0x5ff   : > { %v3787_v18 = vmax.f32 %v3755_v19, 0.0  ;;  %v3724_v23 = vadd.f32 %v7022_v55, %v3691_v49  ;;  %v3609_v11 = vadd.f32 %v6890_v6, %v3383_v22  ;;  %v3385_v16 = vpop.f32.mrb[71].mxu1 }
 0x601   : > { %3819 = vst [vmem:[%s5589_s12 + $0x88] sm:$0xff] %v3787_v18  ;;  %v3756_v2 = vadd.f32 %v5222_v62, %v3724_v23  ;;  %v3692_v45 = vmul.f32 %v7018_v1, %v3609_v11 }
 0x602   : > { %v3388_v39 = vpop.f32.mrb[72].mxu1 }
 0x603   : > { %v3788_v29 = vmax.f32 %v3756_v2, 0.0  ;;  %v3725_v4 = vadd.f32 %v7022_v55, %v3692_v45  ;;  %v3614_v9 = vadd.f32 %v6905_v34, %v3388_v39  ;;  %v3390_v10 = vpop.f32.mrb[73].mxu1 }
 0x605   : > { %3820 = vst [vmem:[%s5589_s12 + $0x90] sm:$0xff] %v3788_v29  ;;  %v3757_v43 = vadd.f32 %v5223_v37, %v3725_v4  ;;  %v3693_v6 = vmul.f32 %v7018_v1, %v3614_v9  ;;  %v5228_v9 = vld [vmem:[%s5569_s11 + $0xc8] sm:$0xff] }
 0x606   : > { %v3393_v42 = vpop.f32.mrb[74].mxu1 }
 0x607   : > { %v3789_v57 = vmax.f32 %v3757_v43, 0.0  ;;  %v3726_v50 = vadd.f32 %v7022_v55, %v3693_v6  ;;  %v3619_v7 = vadd.f32 %v6902_v0, %v3393_v42  ;;  %v3395_v59 = vpop.f32.mrb[75].mxu1  ;;  %v5229_v43 = vld [vmem:[%s5569_s11 + $0xc0] sm:$0xff] }
 0x609   : > { %3821 = vst [vmem:[%s5589_s12 + $0x98] sm:$0xff] %v3789_v57  ;;  %v3758_v14 = vadd.f32 %v5224_v35, %v3726_v50  ;;  %v3694_v34 = vmul.f32 %v7018_v1, %v3619_v7 }
 0x60a   : > { %v3398_v5 = vpop.f32.mrb[76].mxu1 }
 0x60b   : > { %v3790_v47 = vmax.f32 %v3758_v14, 0.0  ;;  %v3727_v32 = vadd.f32 %v7022_v55, %v3694_v34  ;;  %v3624_v46 = vadd.f32 %v6917_v52, %v3398_v5  ;;  %v3400_v28 = vpop.f32.mrb[77].mxu1 }
 0x60c   : > { %v5231_v28 = vld [vmem:[%s5569_s11 + $0xd0] sm:$0xff] }
 0x60d   : > { %3822 = vst [vmem:[%s5589_s12 + $0xa0] sm:$0xff] %v3790_v47  ;;  %v3759_v63 = vadd.f32 %v5225_v8, %v3727_v32  ;;  %v3695_v0 = vmul.f32 %v7018_v1, %v3624_v46  ;;  %v5230_v47 = vld [vmem:[%s5569_s11 + $0xd8] sm:$0xff] }
 0x60e   : > { %v3403_v56 = vpop.f32.mrb[78].mxu1 }
 0x60f   : > { %v3791_v15 = vmax.f32 %v3759_v63, 0.0  ;;  %v3728_v53 = vadd.f32 %v7022_v55, %v3695_v0  ;;  %v3629_v31 = vadd.f32 %v6914_v41, %v3403_v56  ;;  %v3405_v27 = vpop.f32.mrb[79].mxu1 }
 0x611   : > { %3823 = vst [vmem:[%s5589_s12 + $0xa8] sm:$0xff] %v3791_v15  ;;  %v3760_v3 = vadd.f32 %v5226_v25, %v3728_v53  ;;  %v3696_v52 = vmul.f32 %v7018_v1, %v3629_v31 }
 0x612   : > { %v3408_v17 = vpop.f32.mrb[80].mxu1 }
 0x613   : > { %v3792_v33 = vmax.f32 %v3760_v3, 0.0  ;;  %v3729_v58 = vadd.f32 %v7022_v55, %v3696_v52  ;;  %v3410_v60 = vpop.f32.mrb[81].mxu1  ;;  %v5232_v52 = vld [vmem:[%s5569_s11 + $0xe8] sm:$0xff] }
 0x615   : > { %3824 = vst [vmem:[%s5589_s12 + $0xb0] sm:$0xff] %v3792_v33  ;;  %v3761_v48 = vadd.f32 %v5227_v12, %v3729_v58  ;;  %v5233_v58 = vld [vmem:[%s5569_s11 + $0xe0] sm:$0xff] }
 0x616   : > { %v3413_v61 = vpop.f32.mrb[82].mxu1 }
 0x617   : > { %v3793_v26 = vmax.f32 %v3761_v48, 0.0  ;;  %v3415_v24 = vpop.f32.mrb[83].mxu1 }
 0x619   : > { %3825 = vst [vmem:[%s5589_s12 + $0xb8] sm:$0xff] %v3793_v26 }
 0x61a   : > { %v3418_v41 = vpop.f32.mrb[84].mxu1 }
 0x61b   : > { %v3420_v44 = vpop.f32.mrb[85].mxu1 }
 0x61e   : > { %v3423_v20 = vpop.f32.mrb[86].mxu1 }
 0x61f   : > { %v3425_v40 = vpop.f32.mrb[87].mxu1 }
 0x622   : > { %v3428_v36 = vpop.f32.mrb[88].mxu1 }
 0x623   : > { %v3430_v30 = vpop.f32.mrb[89].mxu1 }
 0x626   : > { %v3433_v21 = vpop.f32.mrb[90].mxu1 }
 0x627   : > { %v3435_v13 = vpop.f32.mrb[91].mxu1 }
 0x62a   : > { %v3438_v38 = vpop.f32.mrb[92].mxu1 }
 0x62b   : > { %v3440_v54 = vpop.f32.mrb[93].mxu1 }
 0x62e   : > { %v3443_v51 = vpop.f32.mrb[94].mxu1 }
 0x62f   : > { %v3445_v19 = vpop.f32.mrb[95].mxu1 }
 0x632   : > { %v4217_v49 = vpop.f32.mrb[96].mxu1 }
 0x633   : > { %v3639_v22 = vadd.f32 %v4217_v49, %v3413_v61  ;;  %v3633_v18 = vpop.f32.mrb[97].mxu1 }
 0x634   : > { %v3634_v23 = vadd.f32 %v3633_v18, %v3408_v17 }
 0x635   : > { %v3698_v11 = vmul.f32 %v7018_v1, %v3639_v22 }
 0x636   : > { %v3697_v16 = vmul.f32 %v7018_v1, %v3634_v23  ;;  %v4220_v62 = vpop.f32.mrb[98].mxu1 }
 0x637   : > { %v3731_v2 = vadd.f32 %v7022_v55, %v3698_v11  ;;  %v3649_v45 = vadd.f32 %v4220_v62, %v3423_v20  ;;  %v3643_v39 = vpop.f32.mrb[99].mxu1  ;;  %v5235_v20 = vld [vmem:[%s5569_s11 + $0xf0] sm:$0xff] }
 0x638   : > { %v3730_v29 = vadd.f32 %v7022_v55, %v3697_v16  ;;  %v3644_v4 = vadd.f32 %v3643_v39, %v3418_v41  ;;  %v5234_v41 = vld [vmem:[%s5569_s11 + $0xf8] sm:$0xff]  ;;  %s5409_s11 = smov [#allocation12]  }
 0x639   : > { %v3763_v10 = vadd.f32 %v5228_v9, %v3731_v2  ;;  %v3700_v37 = vmul.f32 %v7018_v1, %v3649_v45  ;;  %s5329_s14 = sshll.u32 %s5409_s11, 4  ;;  %s5330_s14 = int_to_ptr.vmem [resolvable:$false] %s5329_s14 }
 0x63a   : > { %v3762_v6 = vadd.f32 %v5229_v43, %v3730_v29  ;;  %v3699_v42 = vmul.f32 %v7018_v1, %v3644_v4  ;;  %v4223_v57 = vpop.f32.mrb[100].mxu1  ;;  %s5331_s22 = scalar_lea.vmem %s5330_s14, 8192  ;;  %p5332_p11 = scmp.lt.s32.totalorder %s7180_s29, %s5330_s14 }
 0x63b   : > { %v3795_v50 = vmax.f32 %v3763_v10, 0.0  ;;  %v3733_v7 = vadd.f32 %v7022_v55, %v3700_v37  ;;  %v3659_v59 = vadd.f32 %v4223_v57, %v3433_v21  ;;  %v3653_v35 = vpop.f32.mrb[101].mxu1  ;;  %p5333_p1 = scmp.lt.s32.totalorder %s5331_s22, %s5325_s30 }
 0x63c   : > { %v3794_v14 = vmax.f32 %v3762_v6, 0.0  ;;  %v3732_v34 = vadd.f32 %v7022_v55, %v3699_v42  ;;  %v3654_v5 = vadd.f32 %v3653_v35, %v3428_v36 }
 0x63d   : > { %3827 = vst [vmem:[%s5589_s12 + $0xc8] sm:$0xff] %v3795_v50  ;;  %v3765_v32 = vadd.f32 %v5230_v47, %v3733_v7  ;;  %v3702_v46 = vmul.f32 %v7018_v1, %v3659_v59  ;;  %p5334_p0 = por %p5333_p1, %p5332_p11 }
 0x63e   : > { %3826 = vst [vmem:[%s5589_s12 + $0xc0] sm:$0xff] %v3794_v14  ;;  %v3764_v8 = vadd.f32 %v5231_v28, %v3732_v34  ;;  %v3701_v63 = vmul.f32 %v7018_v1, %v3654_v5  ;;  %v4226_v0 = vpop.f32.mrb[102].mxu1 }
 0x63f   : > { %v3797_v56 = vmax.f32 %v3765_v32, 0.0  ;;  %v3735_v15 = vadd.f32 %v7022_v55, %v3702_v46  ;;  %v3669_v53 = vadd.f32 %v4226_v0, %v3443_v51  ;;  %v3663_v31 = vpop.f32.mrb[103].mxu1  ;;  %p5335_p7 = pnand %p5334_p0, %p5328_p4 }
 0x640   : > { %v3796_v27 = vmax.f32 %v3764_v8, 0.0  ;;  %v3734_v25 = vadd.f32 %v7022_v55, %v3701_v63  ;;  %v3664_v3 = vadd.f32 %v3663_v31, %v3438_v38 }
 0x641   : > { %3829 = vst [vmem:[%s5589_s12 + $0xd8] sm:$0xff] %v3797_v56  ;;  %v3767_v17 = vadd.f32 %v5232_v52, %v3735_v15  ;;  %v3704_v33 = vmul.f32 %v7018_v1, %v3669_v53 }
 0x642   : > { %3828 = vst [vmem:[%s5589_s12 + $0xd0] sm:$0xff] %v3796_v27  ;;  %v3766_v60 = vadd.f32 %v5233_v58, %v3734_v25  ;;  %v3703_v12 = vmul.f32 %v7018_v1, %v3664_v3 }
 0x643   : > { %v3799_v48 = vmax.f32 %v3767_v17, 0.0  ;;  %v3737_v61 = vadd.f32 %v7022_v55, %v3704_v33 }
 0x644   : > { %v3798_v26 = vmax.f32 %v3766_v60, 0.0  ;;  %v3736_v24 = vadd.f32 %v7022_v55, %v3703_v12 }
 0x645   : > { %3831 = vst [vmem:[%s5589_s12 + $0xe8] sm:$0xff] %v3799_v48  ;;  %v3769_v44 = vadd.f32 %v5234_v41, %v3737_v61 }
 0x646   : > { %3830 = vst [vmem:[%s5589_s12 + $0xe0] sm:$0xff] %v3798_v26  ;;  %v3768_v40 = vadd.f32 %v5235_v20, %v3736_v24 }
 0x647   : > { %v3801_v36 = vmax.f32 %v3769_v44, 0.0 }
 0x648   : > { %v3800_v1 = vmax.f32 %v3768_v40, 0.0 }
 0x649   : > { %3833 = vst [vmem:[%s5589_s12 + $0xf8] sm:$0xff] %v3801_v36 }
 0x64a   : > { %3832 = vst [vmem:[%s5589_s12 + $0xf0] sm:$0xff] %v3800_v1 }
 0x64b   : > { %5338 = shalt.err (!%p5335_p7)
}
 0x64c   : > { %s5339_s12 = scalar_lea.hbm %s7178_s25, 4096  ;;  %s5343_s10 = scalar_lea.hbm %s7230_s4, 8192 }
 0x64d   : > { %p5340_p6 = scmp.ne.s32.totalorder %s7178_s25, %s5339_s12  ;;  %p5344_p5 = scmp.lt.u32.totalorder %s7178_s25, %s7230_s4 }
 0x64e   : > { %p5345_p12 = scmp.lt.u32.totalorder %s5343_s10, %s5339_s12  ;;  %p5347_p9 = scmp.lt.u32.totalorder %s5339_s12, %s7178_s25 }
 0x64f   : > { %p5341_p8 = pnand %p5340_p6, %p7313_p10 }
 0x650   : > { %p5346_p3 = por %p5345_p12, %p5344_p5 }
 0x651   : > { %p5342_p13 = pneg %p5341_p8 }
 0x652   : > { %p5348_p2 = por %p5347_p9, %p5346_p3 }
 0x654   : > { %p5349_p4 = pnand %p5348_p2, %p5342_p13 }
 0x656   : > { %5352 = shalt.err (!%p5349_p4)
}
 0x657   : > { %s5410_s26 = smov 128   ;;  %s5411_s3 = smov 8  }
 0x658   : > { %5113 = dma.vmem_to_hbm [thread:$0]  (%p7313_p10), %s7180_s29, 4096, %s7178_s25, %s3835_s19, %s5410_s26, %s5410_s26, %s5411_s3  }
 0x659 PF: > { %s3863_s8 = sand.u32 1, %s5387_s15   ;;  %p7314_p11 = scmp.ne.s32.totalorder %s7270_s28, 0 }
 0x65a   : > { %p7315_p1 = scmp.ge.s32.totalorder %s5399_s18, 2  ;;  %s3864_s13 = scalar_lea.sflag [#allocation9], %s3863_s8 }
 0x65c   : > { %p5124_p0 = pnand %p7315_p1, %p7314_p11 }
 0x65e   : > { %5382 = dma.done.wait (!%p5124_p0), %s3864_s13, 4096  }
 0x65f   : > { %5384 = vsyncadd (!%p5124_p0), %s3864_s13, 4294963200  ;;  %s7316_s24 = sld [smem:[#allocation24_spill]]  ;;  %p18_p7 = scmp.ge.s32.totalorder %s5462_s21, 4  }
 0x660   : > { %s7317_s15 = smov %s5391_s16  ;;  %s7318_s16 = smov %s5395_s17 }
 0x661   : > { %s7320_s18 = smov %s5462_s21  ;;  %20 = sbr.rel (!%p18_p7) target bundleno = 9 (0x9), region = 96 }
 0x665   : > { %s7319_s17 = smov %s7316_s24 }
 0x668   :  { %3869 = vsyncpa [#allocation8], 1 }
 0x669   :  { %3871 = vsyncpa [#allocation8 + $0x1], 1 }
 0x66a   :  { %3872 = vsyncpa [#allocation9], 1 }
 0x66b   :  { %3874 = vsyncpa [#allocation9 + $0x1], 1 }
 0x66c   :  { %3875 = vsyncpa [#allocation10], 1 }
 0x66d   :  { %3877 = vsyncpa [#allocation10 + $0x1], 1 }
 0x66e   :  { %3878 = vsyncmov [#allocation6] }
 0x671   :  { %s3879_s18 = vpop.sfrf %3878 }
 0x672   :  { %p3967_p10 = scmp.ne.s32.totalorder %s3879_s18, 0 }
 0x674   :  { %3883 = shalt.err (%p3967_p10)  }
 0x675   :  { %3885 = vsyncmov [#allocation6 + $0x1] }
 0x678   :  { %s3886_s27 = vpop.sfrf %3885 }
 0x679   :  { %p3968_p6 = scmp.ne.s32.totalorder %s3886_s27, 0 }
 0x67b   :  { %3890 = shalt.err (%p3968_p6)  }

</bundles_post_ra>
